<compile_context>
chip_gen: v7x
topology: tpu7x:2x2x1
jax: 0.10.0
libtpu: 0.0.40
codegen_flags: <defaults>
</compile_context>

<pallas_src>
import jax
import jax.numpy as jnp
import numpy as np
from jax.experimental import pallas as pl
from jax.experimental.pallas import tpu as pltpu

LEAK = 0.2
MB = 128           # lanes per maxpool-member / pooled block
ONEHOT_OFF = 30    # one-hot lanes start right after the 30 conv2 channels
S_OFF = 64         # state-feature lanes inside the second 128-lane block
NS_OFF = 96        # next-state-feature lanes


def _leaky(x):
    # F.leaky_relu(x, 0.2) == max(x, 0.2 * x)
    return jnp.maximum(x, LEAK * x)


def _bf(x):
    # bf16 rounding helper so the pure-JAX reference matches the bf16-input /
    # f32-accumulate kernel precision.
    return jnp.asarray(x, jnp.float32).astype(jnp.bfloat16).astype(jnp.float32)


def _round_up(n, m):
    return ((n + m - 1) // m) * m


# --------------------------------------------------------------------------- #
# Pallas kernel
# --------------------------------------------------------------------------- #
def disc_kernel(gamma_ref, tail_ref, packed_ref, logpi_ref,
                w1_ref, b1_ref, w2_ref, b2_ref,
                wl1_ref, bl1_ref, wfc2_ref, bfc2_ref, wh2_ref, bh2_ref,
                wfin_ref, out_ref):
    f32, bf16 = jnp.float32, jnp.bfloat16
    kpad = w1_ref.shape[0]

    x = packed_ref[:, :kpad]                      # [T, Kpad] bf16  (conv input)
    blk2 = packed_ref[:, kpad:kpad + MB]          # [T, 128]  bf16  (onehot/s/ns)

    # conv1 (3x3, pad=1) for all 9 positions, member-major duplicated: ONE dot.
    # TODO(synk): on v7x under VMEM pressure split into 4 [T,128]@[128,128]
    #             dots with a running max (w1 is already member-major).
    c1raw = jnp.dot(x, w1_ref[...], preferred_element_type=f32)        # [T,512]

    # MaxPool2d(2, stride=1): max over the 4 member blocks FIRST, then a single
    # 128-wide bias add + leaky (bias identical across members, leaky monotone).
    pooled = jnp.maximum(
        jnp.maximum(c1raw[:, 0:MB], c1raw[:, MB:2 * MB]),
        jnp.maximum(c1raw[:, 2 * MB:3 * MB], c1raw[:, 3 * MB:4 * MB]))
    p = _leaky(pooled + b1_ref[...])                                    # [T,128]

    # conv2 (2x2 valid, 20->30) padded to 128 lanes -> lanes >= 30 exactly zero.
    c2 = _leaky(jnp.dot(p.astype(bf16), w2_ref[...],
                        preferred_element_type=f32) + b2_ref[...])      # [T,128]

    # Fused fc1 | h_fc1(state) | h_fc1(next_state): onehot / sfeat / nsfeat ride
    # in blk2's zero-disjoint lanes, one VPU add drops them into c2's zero
    # lanes, then ONE [T,128]@[128,384] dot.
    f1in = (c2 + blk2.astype(f32)).astype(bf16)
    g1 = _leaky(jnp.dot(f1in, wl1_ref[...], preferred_element_type=f32)
                + bl1_ref[...])                                         # [T,384]
    g1b = g1.astype(bf16)

    # fc2 and h_fc2 (shared weights for state / next-state via block-diag cols).
    f2 = _leaky(jnp.dot(g1b[:, 0:MB], wfc2_ref[...],
                        preferred_element_type=f32) + bfc2_ref[...])    # [T,128]
    h2 = _leaky(jnp.dot(g1b[:, MB:3 * MB], wh2_ref[...],
                        preferred_element_type=f32) + bh2_ref[...])     # [T,256]

    # gamma-precombine BEFORE the last dot; fc3 + h_fc3 merge into one dot.
    gamma = gamma_ref[0]
    hcomb = gamma * h2[:, MB:2 * MB] - h2[:, 0:MB]                      # [T,128]
    fin = jnp.concatenate([f2, hcomb], axis=1).astype(bf16)             # [T,256]
    val = jnp.dot(fin, wfin_ref[...], preferred_element_type=f32)       # [T, 1]

    bias = tail_ref[0] + (gamma - 1.0) * tail_ref[1]   # fc3_b + (g-1)*h_fc3_b
    out_ref[...] = val + bias - logpi_ref[...]


def run_discriminator(gamma, packed, logpi, kparams, *, tile_b=1024):
    """packed [B, Kpad+128] bf16, logpi [B,1] f32 -> [B,1] f32."""
    B, lanes = packed.shape
    kpad = lanes - MB
    # Large tiles amortize the ~0.35us/step grid overhead; cap by the padded
    # batch so tiny batches don't balloon.  On v7x keep tile_b <= 2048 (64 MiB
    # VMEM) and prefer bp // tile_b >= 2 so both TensorCores get work.
    tile_b = max(256, min(tile_b, _round_up(max(B, 1), 256)))
    bp = _round_up(B, tile_b)
    if bp != B:
        packed = jnp.pad(packed, ((0, bp - B), (0, 0)))
        logpi = jnp.pad(logpi, ((0, bp - B), (0, 0)))

    gamma_arr = jnp.asarray([gamma], jnp.float32)
    *vmem_w, tail = kparams

    smem_spec = pl.BlockSpec(memory_space=pltpu.MemorySpace.SMEM)
    in_specs = [
        smem_spec,                                          # gamma
        smem_spec,                                          # [fc3_b, h_fc3_b]
        pl.BlockSpec((tile_b, lanes), lambda i: (i, 0)),    # packed activations
        pl.BlockSpec((tile_b, 1), lambda i: (i, 0)),        # log_pis (f32)
    ] + [pl.BlockSpec(w.shape, lambda i: (0, 0)) for w in vmem_w]

    flops = 2 * bp * (kpad * 4 * MB + MB * MB + MB * 3 * MB
                      + MB * MB + 2 * MB * 2 * MB + 2 * MB)
    bytes_accessed = int(bp * (lanes * 2 + 4 + 4)
                         + sum(int(np.prod(w.shape)) * w.dtype.itemsize
                               for w in vmem_w))

    out = pl.pallas_call(
        disc_kernel,
        out_shape=jax.ShapeDtypeStruct((bp, 1), jnp.float32),
        grid=(bp // tile_b,),
        in_specs=in_specs,
        out_specs=pl.BlockSpec((tile_b, 1), lambda i: (i, 0)),
        compiler_params=pltpu.CompilerParams(
            dimension_semantics=("parallel",),
            # ~10-25 MB live at tile_b=1024-2048; 32 MiB is safe on every gen
            # (raise towards 64-96 MiB on v5e/v6e when sweeping larger tiles).
            vmem_limit_bytes=32 * 1024 * 1024),
        cost_estimate=pl.CostEstimate(flops=flops, transcendentals=0,
                                      bytes_accessed=bytes_accessed),
    )(gamma_arr, tail, packed, logpi, *vmem_w)
    return out[:B]


# --------------------------------------------------------------------------- #
# Parameter init (PyTorch layouts) + host-side repack for the kernel
# --------------------------------------------------------------------------- #
def init_raw_params(key, path_dim, link_dim, action_num):
    cin = path_dim + link_dim + 2          # rs_input_dim + 1
    hs_in = path_dim + link_dim + 1        # hs_input_dim + 1

    def uinit(k, shape, fan_in):
        b = 1.0 / np.sqrt(fan_in)
        return jax.random.uniform(k, shape, jnp.float32, -b, b)

    keys = jax.random.split(key, 16)
    return dict(
        conv1_w=uinit(keys[0], (20, cin, 3, 3), cin * 9),
        conv1_b=uinit(keys[1], (20,), cin * 9),
        conv2_w=uinit(keys[2], (30, 20, 2, 2), 20 * 4),
        conv2_b=uinit(keys[3], (30,), 20 * 4),
        fc1_w=uinit(keys[4], (120, 30 + action_num), 30 + action_num),
        fc1_b=uinit(keys[5], (120,), 30 + action_num),
        fc2_w=uinit(keys[6], (84, 120), 120),
        fc2_b=uinit(keys[7], (84,), 120),
        fc3_w=uinit(keys[8], (1, 84), 84),
        fc3_b=uinit(keys[9], (1,), 84),
        h_fc1_w=uinit(keys[10], (120, hs_in), hs_in),
        h_fc1_b=uinit(keys[11], (120,), hs_in),
        h_fc2_w=uinit(keys[12], (84, 120), 120),
        h_fc2_b=uinit(keys[13], (84,), 120),
        h_fc3_w=uinit(keys[14], (1, 84), 84),
        h_fc3_b=uinit(keys[15], (1,), 84),
    )


def pack_kernel_params(raw):
    bf16, f32 = jnp.bfloat16, jnp.float32
    conv1_w = np.asarray(raw["conv1_w"], np.float32)      # [20, Cin, 3, 3]
    conv1_b = np.asarray(raw["conv1_b"], np.float32)
    cout, cin = conv1_w.shape[0], conv1_w.shape[1]
    kpad = _round_up(cin * 9, 128)

    # conv1 block weight: column (m*128 + g*20 + o) = conv1 output channel o at
    # conv position p = member m of pool window g; rows are xflat index c*9+q.
    w1d = np.zeros((kpad, 4 * MB), np.float32)
    for m in range(4):
        di, dj = divmod(m, 2)
        for g in range(4):
            gi, gj = divmod(g, 2)
            pi, pj = gi + di, gj + dj                     # conv1 output pos
            col0 = m * MB + g * cout
            for qi in range(3):
                for qj in range(3):
                    ki, kj = qi - pi + 1, qj - pj + 1     # kernel offset
                    if 0 <= ki < 3 and 0 <= kj < 3:
                        rows = np.arange(cin) * 9 + (qi * 3 + qj)
                        w1d[rows, col0:col0 + cout] = conv1_w[:, :, ki, kj].T
    # conv1 bias: identical across member blocks -> hoisted past the maxpool.
    b1 = np.zeros((1, MB), np.float32)
    for g in range(4):
        b1[0, g * cout:(g + 1) * cout] = conv1_b

    # conv2 (2x2 valid) padded to a 128-lane output block (cols >= 30 zero).
    conv2_w = np.asarray(raw["conv2_w"], np.float32)      # [30, 20, 2, 2]
    w2 = np.zeros((MB, MB), np.float32)
    w2[:4 * cout, :30] = conv2_w.transpose(2, 3, 1, 0).reshape(4 * cout, 30)
    b2 = np.zeros((1, MB), np.float32)
    b2[0, :30] = np.asarray(raw["conv2_b"], np.float32)

    # fused fc1 | h_fc1(state) | h_fc1(next_state): [128, 384]
    fc1_w = np.asarray(raw["fc1_w"], np.float32)          # [120, 30+A]
    h1_w = np.asarray(raw["h_fc1_w"], np.float32)         # [120, H]
    A = fc1_w.shape[1] - 30
    H = h1_w.shape[1]
    assert 30 + A <= S_OFF, "one-hot lanes overlap the state-feature lanes"
    assert H <= NS_OFF - S_OFF and NS_OFF + H <= MB, "h features too wide"
    wl1 = np.zeros((MB, 3 * MB), np.float32)
    wl1[:30, :120] = fc1_w[:, :30].T
    wl1[ONEHOT_OFF:ONEHOT_OFF + A, :120] = fc1_w[:, 30:].T
    wl1[S_OFF:S_OFF + H, MB:MB + 120] = h1_w.T
    wl1[NS_OFF:NS_OFF + H, 2 * MB:2 * MB + 120] = h1_w.T
    bl1 = np.zeros((1, 3 * MB), np.float32)
    bl1[0, :120] = np.asarray(raw["fc1_b"])
    bl1[0, MB:MB + 120] = np.asarray(raw["h_fc1_b"])
    bl1[0, 2 * MB:2 * MB + 120] = np.asarray(raw["h_fc1_b"])

    # fc2 and block-diag h_fc2 (state cols 0..83, next-state cols 128..211).
    fc2_w = np.asarray(raw["fc2_w"], np.float32)          # [84, 120]
    h2_w = np.asarray(raw["h_fc2_w"], np.float32)
    wfc2 = np.zeros((MB, MB), np.float32)
    wfc2[:120, :84] = fc2_w.T
    bfc2 = np.zeros((1, MB), np.float32)
    bfc2[0, :84] = np.asarray(raw["fc2_b"])
    wh2 = np.zeros((2 * MB, 2 * MB), np.float32)
    wh2[:120, :84] = h2_w.T
    wh2[MB:MB + 120, MB:MB + 84] = h2_w.T
    bh2 = np.zeros((1, 2 * MB), np.float32)
    bh2[0, :84] = np.asarray(raw["h_fc2_b"])
    bh2[0, MB:MB + 84] = np.asarray(raw["h_fc2_b"])

    # fc3 and h_fc3 merged into one [256,1] column (gamma is applied to the
    # pre-combined h lanes in-kernel; biases go to the SMEM tail).
    wfin = np.zeros((2 * MB, 1), np.float32)
    wfin[:84, 0] = np.asarray(raw["fc3_w"], np.float32)[0]
    wfin[MB:MB + 84, 0] = np.asarray(raw["h_fc3_w"], np.float32)[0]
    tail = np.array([np.asarray(raw["fc3_b"])[0],
                     np.asarray(raw["h_fc3_b"])[0]], np.float32)

    return (jnp.asarray(w1d, bf16), jnp.asarray(b1, f32),
            jnp.asarray(w2, bf16), jnp.asarray(b2, f32),
            jnp.asarray(wl1, bf16), jnp.asarray(bl1, f32),
            jnp.asarray(wfc2, bf16), jnp.asarray(bfc2, f32),
            jnp.asarray(wh2, bf16), jnp.asarray(bh2, f32),
            jnp.asarray(wfin, bf16), jnp.asarray(tail, f32))


# --------------------------------------------------------------------------- #
# Plain-JAX glue: feature gathering (index/gather/reshape only, no compute)
# --------------------------------------------------------------------------- #
def build_features(tables, action_num, states, des, act, time_steps,
                   next_states):
    (action_state_pad, policy_mask_pad, path_feature, link_feature,
     speed_table, new_index) = tables
    B = states.shape[0]

    neigh = action_state_pad[states]                                  # [B, 9]
    npath = path_feature[neigh, des[:, None], :]                      # [B,9,P]
    nedge = link_feature[neigh, :]                                    # [B,9,L]
    nmask = policy_mask_pad[states][..., None].astype(jnp.float32)    # [B,9,1]
    nspeed = speed_table[neigh, time_steps[:, None]][..., None]       # [B,9,1]
    nf = jnp.concatenate([nspeed, npath, nedge, nmask], axis=-1)
    nf = nf[:, new_index, :]
    C = nf.shape[-1]
    x = nf.reshape(B, 3, 3, C).transpose(0, 3, 1, 2)                  # NCHW
    xflat = x.reshape(B, C * 9)                                       # [B, C*9]

    def state_feat(st):
        pf = path_feature[st, des, :]
        ef = link_feature[st, :]
        sp = speed_table[st, time_steps][:, None]
        return jnp.concatenate([sp, pf, ef], axis=-1)

    sfeat = state_feat(states)
    nsfeat = state_feat(next_states)
    onehot = jax.nn.one_hot(act, action_num, dtype=jnp.float32)
    return x, xflat, onehot, sfeat, nsfeat


def pack_activations(xflat, onehot, sfeat, nsfeat):
    """One dense bf16 stream [B, Kpad+128]: conv input, then a 128-lane block
    holding the one-hot action (lanes 30..), sfeat (64..) and nsfeat (96..)."""
    B, K = xflat.shape
    kpad = _round_up(K, 128)
    A, H = onehot.shape[1], sfeat.shape[1]
    assert 30 + A <= S_OFF and H <= NS_OFF - S_OFF and NS_OFF + H <= MB
    blk2 = jnp.zeros((B, MB), jnp.float32)
    blk2 = blk2.at[:, ONEHOT_OFF:ONEHOT_OFF + A].set(onehot)
    blk2 = blk2.at[:, S_OFF:S_OFF + H].set(sfeat)
    blk2 = blk2.at[:, NS_OFF:NS_OFF + H].set(nsfeat)
    xp = jnp.pad(xflat, ((0, 0), (0, kpad - K)))
    return jnp.concatenate([xp, blk2], axis=1).astype(jnp.bfloat16)


# --------------------------------------------------------------------------- #
# Pure-JAX reference (direct conv math on the original-layout weights)
# --------------------------------------------------------------------------- #
def reference(gamma, x_nchw, onehot, sfeat, nsfeat, logpi, raw):
    B, C = x_nchw.shape[0], x_nchw.shape[1]
    w1 = _bf(raw["conv1_w"].reshape(20, C * 9).T)
    xp = jnp.pad(_bf(x_nchw), ((0, 0), (0, 0), (1, 1), (1, 1)))
    convs = []
    for i in range(3):
        for j in range(3):
            patch = xp[:, :, i:i + 3, j:j + 3].reshape(B, C * 9)
            convs.append(patch @ w1)                       # bias hoisted below

    def pool4(a, b, c, d):
        return jnp.maximum(jnp.maximum(a, b), jnp.maximum(c, d))

    pooled = jnp.concatenate(
        [pool4(convs[0], convs[1], convs[3], convs[4]),
         pool4(convs[1], convs[2], convs[4], convs[5]),
         pool4(convs[3], convs[4], convs[6], convs[7]),
         pool4(convs[4], convs[5], convs[7], convs[8])], axis=1)      # [B, 80]
    p = _leaky(pooled + jnp.tile(raw["conv1_b"], 4)[None, :])

    w2 = _bf(raw["conv2_w"].transpose(2, 3, 1, 0).reshape(80, 30))
    c2 = _leaky(_bf(p) @ w2 + raw["conv2_b"][None, :])

    fc1_w = raw["fc1_w"]
    f1 = _leaky(_bf(c2) @ _bf(fc1_w[:, :30].T)
                + _bf(onehot) @ _bf(fc1_w[:, 30:].T)
                + raw["fc1_b"][None, :])
    f2 = _leaky(_bf(f1) @ _bf(raw["fc2_w"].T) + raw["fc2_b"][None, :])
    rs = _bf(f2) @ _bf(raw["fc3_w"].T)               # fc3 bias folded into tail

    def h2_of(s):
        h = _leaky(_bf(s) @ _bf(raw["h_fc1_w"].T) + raw["h_fc1_b"][None, :])
        return _leaky(_bf(h) @ _bf(raw["h_fc2_w"].T) + raw["h_fc2_b"][None, :])

    hcomb = gamma * h2_of(nsfeat) - h2_of(sfeat)
    hval = _bf(hcomb) @ _bf(raw["h_fc3_w"].T)
    tail = raw["fc3_b"][0] + (gamma - 1.0) * raw["h_fc3_b"][0]
    return rs + hval + tail - logpi


# --------------------------------------------------------------------------- #
if __name__ == "__main__":
    key = jax.random.PRNGKey(0)
    path_dim, link_dim = 8, 4
    action_num = 8                 # 3x3 neighbourhood => 8 actions + self
    n_links, n_des, n_t = 20, 12, 10
    B = 8
    gamma = 0.95

    (k_par, k_as, k_pm, k_pf, k_lf, k_sp,
     k_s, k_d, k_a, k_ns, k_t, k_lp) = jax.random.split(key, 12)

    raw = init_raw_params(k_par, path_dim, link_dim, action_num)
    kparams = pack_kernel_params(raw)

    # environment tables (buffers of the torch module)
    action_state = jax.random.randint(k_as, (n_links, action_num), 0, n_links)
    action_state_pad = jnp.concatenate(
        [action_state, jnp.arange(n_links, dtype=jnp.int32)[:, None]], axis=1)
    policy_mask = jax.random.randint(k_pm, (n_links, action_num), 0, 2)
    policy_mask_pad = jnp.concatenate(
        [policy_mask, jnp.zeros((n_links, 1), jnp.int32)], axis=1)
    path_feature = jax.random.normal(k_pf, (n_links, n_des, path_dim),
                                     jnp.float32)
    link_feature = jax.random.normal(k_lf, (n_links, link_dim), jnp.float32)
    # TODO(synk): dense speed_table[link, time] stands in for the sparse
    #             speed_data dict; missing (link, time) pairs must be zero.
    speed_table = jax.random.uniform(k_sp, (n_links, n_t), jnp.float32)
    new_index = jnp.array([7, 0, 1, 6, 8, 2, 5, 4, 3], jnp.int32)
    tables = (action_state_pad, policy_mask_pad, path_feature, link_feature,
              speed_table, new_index)

    # forward() inputs
    states = jax.random.randint(k_s, (B,), 0, n_links)
    des = jax.random.randint(k_d, (B,), 0, n_des)
    act = jax.random.randint(k_a, (B,), 0, action_num)
    next_states = jax.random.randint(k_ns, (B,), 0, n_links)
    time_steps = jax.random.randint(k_t, (B,), 0, n_t)
    log_pis = jax.random.normal(k_lp, (B, 1), jnp.float32)

    x_nchw, xflat, onehot, sfeat, nsfeat = build_features(
        tables, action_num, states, des, act, time_steps, next_states)
    packed = pack_activations(xflat, onehot, sfeat, nsfeat)

    out = run_discriminator(gamma, packed, log_pis, kparams, tile_b=1024)
    out = jax.block_until_ready(out)

    ref = reference(gamma, x_nchw, onehot, sfeat, nsfeat, log_pis, raw)
    np.testing.assert_allclose(np.asarray(out), np.asarray(ref),
                               rtol=1e-2, atol=1e-2)
    print("KERNEL_OK")
</pallas_src>

<mosaic_0001>
module attributes {stable_mosaic.version = 11 : i64} {
  func.func @disc_kernel(%arg0: i32, %arg1: memref<1xf32, #tpu.memory_space<smem>>, %arg2: memref<2xf32, #tpu.memory_space<smem>>, %arg3: memref<256x256xbf16, #tpu.memory_space<vmem>>, %arg4: memref<256x1xf32, #tpu.memory_space<vmem>>, %arg5: memref<128x512xbf16, #tpu.memory_space<vmem>>, %arg6: memref<1x128xf32, #tpu.memory_space<vmem>>, %arg7: memref<128x128xbf16, #tpu.memory_space<vmem>>, %arg8: memref<1x128xf32, #tpu.memory_space<vmem>>, %arg9: memref<128x384xbf16, #tpu.memory_space<vmem>>, %arg10: memref<1x384xf32, #tpu.memory_space<vmem>>, %arg11: memref<128x128xbf16, #tpu.memory_space<vmem>>, %arg12: memref<1x128xf32, #tpu.memory_space<vmem>>, %arg13: memref<256x256xbf16, #tpu.memory_space<vmem>>, %arg14: memref<1x256xf32, #tpu.memory_space<vmem>>, %arg15: memref<256x1xbf16, #tpu.memory_space<vmem>>, %arg16: memref<256x1xf32, #tpu.memory_space<vmem>>) attributes {dimension_semantics = [#tpu.dimension_semantics<parallel>], iteration_bounds = array<i64: 1>, scalar_prefetch = 0 : i64, scratch_operands = 0 : i64, tpu.core_type = #tpu.core_type<tc>, window_params = [{transform_indices = @transform_0, window_bounds = array<i64: 1>}, {transform_indices = @transform_1, window_bounds = array<i64: 2>}, {transform_indices = @transform_2, window_bounds = array<i64: 256, 256>}, {transform_indices = @transform_3, window_bounds = array<i64: 256, 1>}, {pipeline_mode = #tpu.pipeline_mode<synchronous>, transform_indices = @transform_4, window_bounds = array<i64: 128, 512>}, {pipeline_mode = #tpu.pipeline_mode<synchronous>, transform_indices = @transform_5, window_bounds = array<i64: 1, 128>}, {pipeline_mode = #tpu.pipeline_mode<synchronous>, transform_indices = @transform_6, window_bounds = array<i64: 128, 128>}, {pipeline_mode = #tpu.pipeline_mode<synchronous>, transform_indices = @transform_7, window_bounds = array<i64: 1, 128>}, {pipeline_mode = #tpu.pipeline_mode<synchronous>, transform_indices = @transform_8, window_bounds = array<i64: 128, 384>}, {pipeline_mode = #tpu.pipeline_mode<synchronous>, transform_indices = @transform_9, window_bounds = array<i64: 1, 384>}, {pipeline_mode = #tpu.pipeline_mode<synchronous>, transform_indices = @transform_10, window_bounds = array<i64: 128, 128>}, {pipeline_mode = #tpu.pipeline_mode<synchronous>, transform_indices = @transform_11, window_bounds = array<i64: 1, 128>}, {pipeline_mode = #tpu.pipeline_mode<synchronous>, transform_indices = @transform_12, window_bounds = array<i64: 256, 256>}, {pipeline_mode = #tpu.pipeline_mode<synchronous>, transform_indices = @transform_13, window_bounds = array<i64: 1, 256>}, {pipeline_mode = #tpu.pipeline_mode<synchronous>, transform_indices = @transform_14, window_bounds = array<i64: 256, 1>}, {transform_indices = @transform_15, window_bounds = array<i64: 256, 1>}]} {
    %c0 = arith.constant 0 : index
    %c0_0 = arith.constant 0 : index
    %0 = vector.load %arg3[%c0, %c0_0] : memref<256x256xbf16, #tpu.memory_space<vmem>>, vector<256x128xbf16>
    %c0_1 = arith.constant 0 : index
    %c128 = arith.constant 128 : index
    %1 = vector.load %arg3[%c0_1, %c128] : memref<256x256xbf16, #tpu.memory_space<vmem>>, vector<256x128xbf16>
    %c0_2 = arith.constant 0 : index
    %c0_3 = arith.constant 0 : index
    %2 = vector.load %arg5[%c0_2, %c0_3] : memref<128x512xbf16, #tpu.memory_space<vmem>>, vector<128x512xbf16>
    %cst = arith.constant dense<0.000000e+00> : vector<256x512xf32>
    %3 = tpu.matmul %0, %2, %cst {dimension_numbers = #tpu.dot_dimension_numbers<[1], [0], [0], [1], [0, 0, 1, 1], [], []>} : vector<256x128xbf16>, vector<128x512xbf16>, vector<256x512xf32> -> vector<256x512xf32>
    %4 = vector.extract_strided_slice %3 {offsets = [0, 0], sizes = [256, 128], strides = [1, 1]} : vector<256x512xf32> to vector<256x128xf32>
    %5 = vector.extract_strided_slice %3 {offsets = [0, 128], sizes = [256, 128], strides = [1, 1]} : vector<256x512xf32> to vector<256x128xf32>
    %6 = arith.maximumf %4, %5 : vector<256x128xf32>
    %7 = vector.extract_strided_slice %3 {offsets = [0, 256], sizes = [256, 128], strides = [1, 1]} : vector<256x512xf32> to vector<256x128xf32>
    %8 = vector.extract_strided_slice %3 {offsets = [0, 384], sizes = [256, 128], strides = [1, 1]} : vector<256x512xf32> to vector<256x128xf32>
    %9 = arith.maximumf %7, %8 : vector<256x128xf32>
    %10 = arith.maximumf %6, %9 : vector<256x128xf32>
    %c0_4 = arith.constant 0 : index
    %c0_5 = arith.constant 0 : index
    %11 = vector.load %arg6[%c0_4, %c0_5] : memref<1x128xf32, #tpu.memory_space<vmem>>, vector<1x128xf32>
    %12 = vector.broadcast %11 : vector<1x128xf32> to vector<256x128xf32>
    %13 = arith.addf %10, %12 : vector<256x128xf32>
    %cst_6 = arith.constant 2.000000e-01 : f32
    %14 = vector.broadcast %cst_6 : f32 to vector<256x128xf32>
    %15 = arith.mulf %14, %13 : vector<256x128xf32>
    %16 = arith.maximumf %13, %15 : vector<256x128xf32>
    %17 = arith.truncf %16 : vector<256x128xf32> to vector<256x128xbf16>
    %c0_7 = arith.constant 0 : index
    %c0_8 = arith.constant 0 : index
    %18 = vector.load %arg7[%c0_7, %c0_8] : memref<128x128xbf16, #tpu.memory_space<vmem>>, vector<128x128xbf16>
    %cst_9 = arith.constant dense<0.000000e+00> : vector<256x128xf32>
    %19 = tpu.matmul %17, %18, %cst_9 {dimension_numbers = #tpu.dot_dimension_numbers<[1], [0], [0], [1], [0, 0, 1, 1], [], []>} : vector<256x128xbf16>, vector<128x128xbf16>, vector<256x128xf32> -> vector<256x128xf32>
    %c0_10 = arith.constant 0 : index
    %c0_11 = arith.constant 0 : index
    %20 = vector.load %arg8[%c0_10, %c0_11] : memref<1x128xf32, #tpu.memory_space<vmem>>, vector<1x128xf32>
    %21 = vector.broadcast %20 : vector<1x128xf32> to vector<256x128xf32>
    %22 = arith.addf %19, %21 : vector<256x128xf32>
    %cst_12 = arith.constant 2.000000e-01 : f32
    %23 = vector.broadcast %cst_12 : f32 to vector<256x128xf32>
    %24 = arith.mulf %23, %22 : vector<256x128xf32>
    %25 = arith.maximumf %22, %24 : vector<256x128xf32>
    %26 = arith.extf %1 : vector<256x128xbf16> to vector<256x128xf32>
    %27 = arith.addf %25, %26 : vector<256x128xf32>
    %28 = arith.truncf %27 : vector<256x128xf32> to vector<256x128xbf16>
    %c0_13 = arith.constant 0 : index
    %c0_14 = arith.constant 0 : index
    %29 = vector.load %arg9[%c0_13, %c0_14] : memref<128x384xbf16, #tpu.memory_space<vmem>>, vector<128x384xbf16>
    %cst_15 = arith.constant dense<0.000000e+00> : vector<256x384xf32>
    %30 = tpu.matmul %28, %29, %cst_15 {dimension_numbers = #tpu.dot_dimension_numbers<[1], [0], [0], [1], [0, 0, 1, 1], [], []>} : vector<256x128xbf16>, vector<128x384xbf16>, vector<256x384xf32> -> vector<256x384xf32>
    %c0_16 = arith.constant 0 : index
    %c0_17 = arith.constant 0 : index
    %31 = vector.load %arg10[%c0_16, %c0_17] : memref<1x384xf32, #tpu.memory_space<vmem>>, vector<1x384xf32>
    %32 = vector.broadcast %31 : vector<1x384xf32> to vector<256x384xf32>
    %33 = arith.addf %30, %32 : vector<256x384xf32>
    %cst_18 = arith.constant 2.000000e-01 : f32
    %34 = vector.broadcast %cst_18 : f32 to vector<256x384xf32>
    %35 = arith.mulf %34, %33 : vector<256x384xf32>
    %36 = arith.maximumf %33, %35 : vector<256x384xf32>
    %37 = arith.truncf %36 : vector<256x384xf32> to vector<256x384xbf16>
    %38 = vector.extract_strided_slice %37 {offsets = [0, 0], sizes = [256, 128], strides = [1, 1]} : vector<256x384xbf16> to vector<256x128xbf16>
    %c0_19 = arith.constant 0 : index
    %c0_20 = arith.constant 0 : index
    %39 = vector.load %arg11[%c0_19, %c0_20] : memref<128x128xbf16, #tpu.memory_space<vmem>>, vector<128x128xbf16>
    %cst_21 = arith.constant dense<0.000000e+00> : vector<256x128xf32>
    %40 = tpu.matmul %38, %39, %cst_21 {dimension_numbers = #tpu.dot_dimension_numbers<[1], [0], [0], [1], [0, 0, 1, 1], [], []>} : vector<256x128xbf16>, vector<128x128xbf16>, vector<256x128xf32> -> vector<256x128xf32>
    %c0_22 = arith.constant 0 : index
    %c0_23 = arith.constant 0 : index
    %41 = vector.load %arg12[%c0_22, %c0_23] : memref<1x128xf32, #tpu.memory_space<vmem>>, vector<1x128xf32>
    %42 = vector.broadcast %41 : vector<1x128xf32> to vector<256x128xf32>
    %43 = arith.addf %40, %42 : vector<256x128xf32>
    %cst_24 = arith.constant 2.000000e-01 : f32
    %44 = vector.broadcast %cst_24 : f32 to vector<256x128xf32>
    %45 = arith.mulf %44, %43 : vector<256x128xf32>
    %46 = arith.maximumf %43, %45 : vector<256x128xf32>
    %47 = vector.extract_strided_slice %37 {offsets = [0, 128], sizes = [256, 256], strides = [1, 1]} : vector<256x384xbf16> to vector<256x256xbf16>
    %c0_25 = arith.constant 0 : index
    %c0_26 = arith.constant 0 : index
    %48 = vector.load %arg13[%c0_25, %c0_26] : memref<256x256xbf16, #tpu.memory_space<vmem>>, vector<256x256xbf16>
    %cst_27 = arith.constant dense<0.000000e+00> : vector<256x256xf32>
    %49 = tpu.matmul %47, %48, %cst_27 {dimension_numbers = #tpu.dot_dimension_numbers<[1], [0], [0], [1], [0, 0, 1, 1], [], []>} : vector<256x256xbf16>, vector<256x256xbf16>, vector<256x256xf32> -> vector<256x256xf32>
    %c0_28 = arith.constant 0 : index
    %c0_29 = arith.constant 0 : index
    %50 = vector.load %arg14[%c0_28, %c0_29] : memref<1x256xf32, #tpu.memory_space<vmem>>, vector<1x256xf32>
    %51 = vector.broadcast %50 : vector<1x256xf32> to vector<256x256xf32>
    %52 = arith.addf %49, %51 : vector<256x256xf32>
    %cst_30 = arith.constant 2.000000e-01 : f32
    %53 = vector.broadcast %cst_30 : f32 to vector<256x256xf32>
    %54 = arith.mulf %53, %52 : vector<256x256xf32>
    %55 = arith.maximumf %52, %54 : vector<256x256xf32>
    %c0_31 = arith.constant 0 : index
    %56 = memref.load %arg1[%c0_31] : memref<1xf32, #tpu.memory_space<smem>>
    %57 = vector.extract_strided_slice %55 {offsets = [0, 128], sizes = [256, 128], strides = [1, 1]} : vector<256x256xf32> to vector<256x128xf32>
    %58 = vector.broadcast %56 : f32 to vector<256x128xf32>
    %59 = arith.mulf %58, %57 : vector<256x128xf32>
    %60 = vector.extract_strided_slice %55 {offsets = [0, 0], sizes = [256, 128], strides = [1, 1]} : vector<256x256xf32> to vector<256x128xf32>
    %61 = arith.subf %59, %60 : vector<256x128xf32>
    %62 = tpu.concatenate %46, %61 in 1 : vector<256x128xf32>, vector<256x128xf32> -> vector<256x256xf32>
    %63 = arith.truncf %62 : vector<256x256xf32> to vector<256x256xbf16>
    %c0_32 = arith.constant 0 : index
    %c0_33 = arith.constant 0 : index
    %64 = vector.load %arg15[%c0_32, %c0_33] : memref<256x1xbf16, #tpu.memory_space<vmem>>, vector<256x1xbf16>
    %cst_34 = arith.constant dense<0.000000e+00> : vector<256x1xf32>
    %65 = tpu.matmul %63, %64, %cst_34 {dimension_numbers = #tpu.dot_dimension_numbers<[1], [0], [0], [1], [0, 0, 1, 1], [], []>} : vector<256x256xbf16>, vector<256x1xbf16>, vector<256x1xf32> -> vector<256x1xf32>
    %c0_35 = arith.constant 0 : index
    %66 = memref.load %arg2[%c0_35] : memref<2xf32, #tpu.memory_space<smem>>
    %cst_36 = arith.constant 1.000000e+00 : f32
    %67 = arith.subf %56, %cst_36 : f32
    %c1 = arith.constant 1 : index
    %68 = memref.load %arg2[%c1] : memref<2xf32, #tpu.memory_space<smem>>
    %69 = arith.mulf %67, %68 : f32
    %70 = arith.addf %66, %69 : f32
    %71 = vector.broadcast %70 : f32 to vector<256x1xf32>
    %72 = arith.addf %65, %71 : vector<256x1xf32>
    %c0_37 = arith.constant 0 : index
    %c0_38 = arith.constant 0 : index
    %73 = vector.load %arg4[%c0_37, %c0_38] : memref<256x1xf32, #tpu.memory_space<vmem>>, vector<256x1xf32>
    %74 = arith.subf %72, %73 : vector<256x1xf32>
    %c0_39 = arith.constant 0 : index
    %c0_40 = arith.constant 0 : index
    %75 = vector.load %arg16[%c0_39, %c0_40] : memref<256x1xf32, #tpu.memory_space<vmem>>, vector<256x1xf32>
    tpu.vector_store %arg16[%c0_39, %c0_40], %74 {strides = array<i32>} : memref<256x1xf32, #tpu.memory_space<vmem>>, vector<256x1xf32>,
    return
  }
  func.func @transform_0(%arg0: i32) -> i32 {
    %c0_i32 = arith.constant 0 : i32
    %c0_i32_0 = arith.constant 0 : i32
    return %c0_i32 : i32
  }
  func.func @transform_1(%arg0: i32) -> i32 {
    %c0_i32 = arith.constant 0 : i32
    %c0_i32_0 = arith.constant 0 : i32
    return %c0_i32 : i32
  }
  func.func @transform_2(%arg0: i32) -> (i32, i32) {
    %c0_i32 = arith.constant 0 : i32
    %c0_i32_0 = arith.constant 0 : i32
    return %arg0, %c0_i32 : i32, i32
  }
  func.func @transform_3(%arg0: i32) -> (i32, i32) {
    %c0_i32 = arith.constant 0 : i32
    %c0_i32_0 = arith.constant 0 : i32
    return %arg0, %c0_i32 : i32, i32
  }
  func.func @transform_4(%arg0: i32) -> (i32, i32) {
    %c0_i32 = arith.constant 0 : i32
    %c0_i32_0 = arith.constant 0 : i32
    %c0_i32_1 = arith.constant 0 : i32
    return %c0_i32, %c0_i32_0 : i32, i32
  }
  func.func @transform_5(%arg0: i32) -> (i32, i32) {
    %c0_i32 = arith.constant 0 : i32
    %c0_i32_0 = arith.constant 0 : i32
    %c0_i32_1 = arith.constant 0 : i32
    return %c0_i32, %c0_i32_0 : i32, i32
  }
  func.func @transform_6(%arg0: i32) -> (i32, i32) {
    %c0_i32 = arith.constant 0 : i32
    %c0_i32_0 = arith.constant 0 : i32
    %c0_i32_1 = arith.constant 0 : i32
    return %c0_i32, %c0_i32_0 : i32, i32
  }
  func.func @transform_7(%arg0: i32) -> (i32, i32) {
    %c0_i32 = arith.constant 0 : i32
    %c0_i32_0 = arith.constant 0 : i32
    %c0_i32_1 = arith.constant 0 : i32
    return %c0_i32, %c0_i32_0 : i32, i32
  }
  func.func @transform_8(%arg0: i32) -> (i32, i32) {
    %c0_i32 = arith.constant 0 : i32
    %c0_i32_0 = arith.constant 0 : i32
    %c0_i32_1 = arith.constant 0 : i32
    return %c0_i32, %c0_i32_0 : i32, i32
  }
  func.func @transform_9(%arg0: i32) -> (i32, i32) {
    %c0_i32 = arith.constant 0 : i32
    %c0_i32_0 = arith.constant 0 : i32
    %c0_i32_1 = arith.constant 0 : i32
    return %c0_i32, %c0_i32_0 : i32, i32
  }
  func.func @transform_10(%arg0: i32) -> (i32, i32) {
    %c0_i32 = arith.constant 0 : i32
    %c0_i32_0 = arith.constant 0 : i32
    %c0_i32_1 = arith.constant 0 : i32
    return %c0_i32, %c0_i32_0 : i32, i32
  }
  func.func @transform_11(%arg0: i32) -> (i32, i32) {
    %c0_i32 = arith.constant 0 : i32
    %c0_i32_0 = arith.constant 0 : i32
    %c0_i32_1 = arith.constant 0 : i32
    return %c0_i32, %c0_i32_0 : i32, i32
  }
  func.func @transform_12(%arg0: i32) -> (i32, i32) {
    %c0_i32 = arith.constant 0 : i32
    %c0_i32_0 = arith.constant 0 : i32
    %c0_i32_1 = arith.constant 0 : i32
    return %c0_i32, %c0_i32_0 : i32, i32
  }
  func.func @transform_13(%arg0: i32) -> (i32, i32) {
    %c0_i32 = arith.constant 0 : i32
    %c0_i32_0 = arith.constant 0 : i32
    %c0_i32_1 = arith.constant 0 : i32
    return %c0_i32, %c0_i32_0 : i32, i32
  }
  func.func @transform_14(%arg0: i32) -> (i32, i32) {
    %c0_i32 = arith.constant 0 : i32
    %c0_i32_0 = arith.constant 0 : i32
    %c0_i32_1 = arith.constant 0 : i32
    return %c0_i32, %c0_i32_0 : i32, i32
  }
  func.func @transform_15(%arg0: i32) -> (i32, i32) {
    %c0_i32 = arith.constant 0 : i32
    %c0_i32_0 = arith.constant 0 : i32
    return %arg0, %c0_i32 : i32, i32
  }
}

</mosaic_0001>

<bundles_post_ra>
// kernel: tpu_custom_call.1
= control target key start
LH: loop header
LB: loop body
LE: loop exit
PB: predicated region body
PF: predicated region fallthrough
CT: control target
= control target key end

     0   :  { %21 = vsyncpa [#allocation5], 0  ;;  %s5537_s0 = inlined_call_operand.<no memory space> [shape: f32[1], index: 0, kind: input, shape index: {}]   ;;  %s5538_s1 = inlined_call_operand.vmem [shape: f32[2], index: 1, kind: input, shape index: {}]   ;;  %s5539_s2 = inlined_call_operand.vmem [shape: bf16[256,256], index: 2, kind: input, shape index: {}]   ;;  %s5540_s3 = inlined_call_operand.vmem [shape: f32[256,1], index: 3, kind: input, shape index: {}]   ;;  %s5541_s4 = inlined_call_operand.hbm [shape: bf16[128,512], index: 4, kind: input, shape index: {}]   ;;  %s5542_s5 = inlined_call_operand.vmem [shape: f32[1,128], index: 5, kind: input, shape index: {}]   ;;  %s5543_s6 = inlined_call_operand.vmem [shape: bf16[128,128], index: 6, kind: input, shape index: {}]   ;;  %s5544_s7 = inlined_call_operand.vmem [shape: f32[1,128], index: 7, kind: input, shape index: {}]   ;;  %s5545_s8 = inlined_call_operand.hbm [shape: bf16[128,384], index: 8, kind: input, shape index: {}]   ;;  %s5546_s9 = inlined_call_operand.vmem [shape: f32[1,384], index: 9, kind: input, shape index: {}]   ;;  %s5547_s10 = inlined_call_operand.vmem [shape: bf16[128,128], index: 10, kind: input, shape index: {}]   ;;  %s5548_s11 = inlined_call_operand.vmem [shape: f32[1,128], index: 11, kind: input, shape index: {}]   ;;  %s5549_s12 = inlined_call_operand.hbm [shape: bf16[256,256], index: 12, kind: input, shape index: {}]   ;;  %s5550_s13 = inlined_call_operand.vmem [shape: f32[1,256], index: 13, kind: input, shape index: {}]   ;;  %s5551_s14 = inlined_call_operand.vmem [shape: bf16[256,1], index: 14, kind: input, shape index: {}]   ;;  %s5552_s15 = inlined_call_operand.vmem [shape: f32[256,1], index: 15, kind: output, shape index: {}]  }
   0x1   :  { %22 = vsyncpa [#allocation4], 0 }
   0x2   :  { %23 = vsyncpa [#allocation8], 0  ;;  %s4280_s18 = smov [#allocation7]   ;;  %s32_s22 = sshll.u32 %s5538_s1, 4  ;;  %s33_s22 = int_to_ptr.vmem [resolvable:$true] %s32_s22 }
   0x3   :  { %s63_s19 = sshll.u32 %s4280_s18, 4  ;;  %s4196_s25 = scalar_lea.hbm %s5545_s8, 3072  ;;  %s64_s19 = int_to_ptr.vmem [resolvable:$true] %s63_s19 }
   0x4   :  { %p4197_p0 = scmp.ne.s32.totalorder %s5545_s8, %s4196_s25  ;;  %p4200_p1 = scmp.lt.u32.totalorder %s4196_s25, %s5545_s8 }
   0x6   :  { %p4202_p2 = pnand %p4200_p1, %p4197_p0 }
   0x8   :  { %4205 = shalt.err (!%p4202_p2)
}
   0x9   :  { %s4206_s30 = scalar_lea.vmem %s64_s19, 3072  ;;  %p4211_p4 = scmp.lt.s32.totalorder %s64_s19, %s64_s19 }
   0xa   :  { %p4207_p3 = scmp.ne.s32.totalorder %s64_s19, %s4206_s30  ;;  %p4212_p5 = scmp.lt.s32.totalorder %s4206_s30, %s4206_s30 }
   0xc   :  { %p4213_p6 = por %p4212_p5, %p4211_p4 }
   0xe   :  { %p4214_p7 = pnand %p4213_p6, %p4207_p3 }
  0x10   :  { %4217 = shalt.err (!%p4214_p7)
}
  0x11   :  { %s4281_s1 = smov 192   ;;  %s4282_s16 = smov 12  }
  0x12   :  { %69 = dma.hbm_to_vmem [thread:$0]  %s5545_s8, 3072, %s64_s19, [#allocation8], %s4281_s1, %s4281_s1, %s4282_s16  }
  0x13   :  { %s4218_s20 = scalar_lea.vmem %s33_s22, 16  ;;  %p4223_p9 = scmp.lt.s32.totalorder %s33_s22, %s33_s22 }
  0x14   :  { %p4219_p8 = scmp.ne.s32.totalorder %s33_s22, %s4218_s20  ;;  %p4224_p10 = scmp.lt.s32.totalorder %s4218_s20, %s4218_s20 }
  0x16   :  { %p4225_p11 = por %p4224_p10, %p4223_p9 }
  0x18   :  { %p4226_p12 = pnand %p4225_p11, %p4219_p8 }
  0x1a   :  { %4229 = shalt.err (!%p4226_p12)
}
  0x1b   :  { %s4283_s21 = smov [#allocation3]   ;;  %s4284_s23 = smov [#allocation6]  }
  0x1c   :  { %35 = dma.vmem_to_smem %s33_s22, 16, %s4283_s21, [#allocation5]  }
  0x1d   :  { %s45_s24 = sshll.u32 %s4284_s23, 4  ;;  %s4230_s27 = scalar_lea.hbm %s5541_s4, 4096  ;;  %s46_s24 = int_to_ptr.vmem [resolvable:$true] %s45_s24 }
  0x1e   :  { %p4231_p13 = scmp.ne.s32.totalorder %s5541_s4, %s4230_s27  ;;  %p4234_p0 = scmp.lt.u32.totalorder %s4230_s27, %s5541_s4 }
  0x20   :  { %p4236_p1 = pnand %p4234_p0, %p4231_p13 }
  0x22   :  { %4239 = shalt.err (!%p4236_p1)
}
  0x23   :  { %s4240_s30 = scalar_lea.vmem %s46_s24, 4096  ;;  %p4245_p3 = scmp.lt.s32.totalorder %s46_s24, %s46_s24 }
  0x24   :  { %p4241_p2 = scmp.ne.s32.totalorder %s46_s24, %s4240_s30  ;;  %p4246_p4 = scmp.lt.s32.totalorder %s4240_s30, %s4240_s30 }
  0x26   :  { %p4247_p5 = por %p4246_p4, %p4245_p3 }
  0x28   :  { %p4248_p6 = pnand %p4247_p5, %p4241_p2 }
  0x2a   :  { %4251 = shalt.err (!%p4248_p6)
}
  0x2b   :  { %s4285_s22 = smov 256   ;;  %s4286_s1 = smov 16  }
  0x2c   :  { %51 = dma.hbm_to_vmem [thread:$0]  %s5541_s4, 4096, %s46_s24, [#allocation4], %s4285_s22, %s4285_s22, %s4286_s1  }
  0x2d   :  { %s4287_s18 = smov [#allocation9]   ;;  %s4252_s25 = scalar_lea.hbm %s5549_s12, 4096 }
  0x2e   :  { %s81_s20 = sshll.u32 %s4287_s18, 4  ;;  %p4253_p7 = scmp.ne.s32.totalorder %s5549_s12, %s4252_s25  ;;  %s82_s20 = int_to_ptr.vmem [resolvable:$true] %s81_s20 }
  0x2f   :  { %p4256_p8 = scmp.lt.u32.totalorder %s4252_s25, %s5549_s12 }
  0x31   :  { %p4258_p9 = pnand %p4256_p8, %p4253_p7 }
  0x33   :  { %4261 = shalt.err (!%p4258_p9)
}
  0x34   :  { %s4262_s8 = scalar_lea.vmem %s82_s20, 4096  ;;  %p4267_p11 = scmp.lt.s32.totalorder %s82_s20, %s82_s20 }
  0x35   :  { %p4263_p10 = scmp.ne.s32.totalorder %s82_s20, %s4262_s8  ;;  %p4268_p12 = scmp.lt.s32.totalorder %s4262_s8, %s4262_s8 }
  0x37   :  { %p4269_p13 = por %p4268_p12, %p4267_p11 }
  0x39   :  { %p4270_p0 = pnand %p4269_p13, %p4263_p10 }
  0x3b   :  { %4273 = shalt.err (!%p4270_p0)
}
  0x3c   :  { %s4288_s4 = smov 128   ;;  %s4289_s24 = smov 8  }
  0x3d   :  { %87 = dma.hbm_to_vmem [thread:$0]  %s5549_s12, 4096, %s82_s20, [#allocation8], %s4288_s4, %s4288_s4, %s4289_s24  }
  0x3e   :  { %4274 = dma.done.wait [#allocation5], 16  }
  0x3f   :  { %4275 = vsyncadd [#allocation5], 4294967280 }
  0x40   :  { %4276 = dma.done.wait [#allocation4], 4096  }
  0x41   :  { %4277 = vsyncadd [#allocation4], 4294963200 }
  0x42   :  { %4278 = dma.done.wait [#allocation8], 7168  }
  0x43   :  { %4279 = vsyncadd [#allocation8], 4294960128 }
  0x44   :  { %104 = sfence }
  0x45   :  { %v4020_v0 = vld [vmem:[#allocation6 + $0x4] ss:$16 sps:$4 sm:$0xff]   ;;  %v4022_v1 = vld [vmem:[#allocation6] ss:$16 sps:$4 sm:$0xff]   ;;  %v5553_v2 = vmov 0   ;;  %v4085_v42 = vld [vmem:[%s5543_s6 + $0x8] sm:$0xff]  }
  0x46   :  { %610 = vmatprep.mubr.bf16.mxu1 %v5553_v2  ;;  %490 = vmatprep.mubr.bf16.mxu0 %v5553_v2  ;;  %v4023_v3 = vld [vmem:[#allocation6 + $0x24] ss:$16 sps:$4 sm:$0xff]   ;;  %v4025_v4 = vld [vmem:[#allocation6 + $0x20] ss:$16 sps:$4 sm:$0xff]   ;;  %v4047_v17 = vld [vmem:[#allocation6 + $0xc] ss:$16 sps:$4 sm:$0xff]  }
  0x47   :  { %3993 = vmatprep.subr.bf16.mxu1 %v4020_v0  ;;  %458 = vmatprep.subr.bf16.mxu0 %v4020_v0  ;;  %v4026_v5 = vld [vmem:[#allocation6 + $0x44] ss:$16 sps:$4 sm:$0xff]   ;;  %v4028_v6 = vld [vmem:[#allocation6 + $0x40] ss:$16 sps:$4 sm:$0xff]   ;;  %v4045_v20 = vld [vmem:[#allocation6 + $0x8] ss:$16 sps:$4 sm:$0xff]  }
  0x48   :  { %4001 = vmatpush1.bf16.msra.mxu1 %v4022_v1  ;;  %459 = vmatpush1.bf16.msra.mxu0 %v4022_v1  ;;  %v4029_v7 = vld [vmem:[#allocation6 + $0x64] ss:$16 sps:$4 sm:$0xff]   ;;  %v4031_v8 = vld [vmem:[#allocation6 + $0x60] ss:$16 sps:$4 sm:$0xff]   ;;  %v4050_v21 = vld [vmem:[#allocation6 + $0x2c] ss:$16 sps:$4 sm:$0xff]  }
  0x49   :  { %3994 = vmatprep.subr.bf16.mxu1 %v4023_v3  ;;  %460 = vmatprep.subr.bf16.mxu0 %v4023_v3  ;;  %v4032_v9 = vld [vmem:[#allocation6 + $0x84] ss:$16 sps:$4 sm:$0xff]   ;;  %v4034_v10 = vld [vmem:[#allocation6 + $0x80] ss:$16 sps:$4 sm:$0xff]   ;;  %v4048_v22 = vld [vmem:[#allocation6 + $0x28] ss:$16 sps:$4 sm:$0xff]  }
  0x4a   :  { %v4035_v11 = vld [vmem:[#allocation6 + $0xa4] ss:$16 sps:$4 sm:$0xff]   ;;  %v4037_v12 = vld [vmem:[#allocation6 + $0xa0] ss:$16 sps:$4 sm:$0xff]   ;;  %v4054_v24 = vld [vmem:[#allocation6 + $0x4c] ss:$16 sps:$4 sm:$0xff]  }
  0x4b   :  { %v4038_v13 = vld [vmem:[#allocation6 + $0xc4] ss:$16 sps:$4 sm:$0xff]   ;;  %v4040_v14 = vld [vmem:[#allocation6 + $0xc0] ss:$16 sps:$4 sm:$0xff]   ;;  %v4052_v25 = vld [vmem:[#allocation6 + $0x48] ss:$16 sps:$4 sm:$0xff]  }
  0x4c   :  { %4002 = vmatpush1.bf16.msra.mxu1 %v4025_v4  ;;  %461 = vmatpush1.bf16.msra.mxu0 %v4025_v4  ;;  %v4041_v15 = vld [vmem:[#allocation6 + $0xe4] ss:$16 sps:$4 sm:$0xff]   ;;  %v4043_v16 = vld [vmem:[#allocation6 + $0xe0] ss:$16 sps:$4 sm:$0xff]   ;;  %v4057_v27 = vld [vmem:[#allocation6 + $0x6c] ss:$16 sps:$4 sm:$0xff]  }
  0x4d   :  { %3995 = vmatprep.subr.bf16.mxu1 %v4026_v5  ;;  %462 = vmatprep.subr.bf16.mxu0 %v4026_v5  ;;  %v4415_v18 = vld [vmem:[%s5539_s2 + $0xc0] ss:$8 sps:$4 sm:$0xff]   ;;  %v4425_v23 = vld [vmem:[%s5539_s2 + $0xd0] ss:$8 sps:$4 sm:$0xff]   ;;  %v4061_v29 = vld [vmem:[#allocation6 + $0x8c] ss:$16 sps:$4 sm:$0xff]  }
  0x4e   :  { %v4072_v19 = vld [vmem:[%s5539_s2] ss:$8 sps:$4 sm:$0xff]   ;;  %v4073_v26 = vld [vmem:[%s5539_s2 + $0x10] ss:$8 sps:$4 sm:$0xff]   ;;  %v4064_v33 = vld [vmem:[#allocation6 + $0xac] ss:$16 sps:$4 sm:$0xff]  }
  0x4f   :  { %v4055_v28 = vld [vmem:[#allocation6 + $0x68] ss:$16 sps:$4 sm:$0xff]   ;;  %v4068_v35 = vld [vmem:[#allocation6 + $0xcc] ss:$16 sps:$4 sm:$0xff]   ;;  %v4084_v41 = vld [vmem:[%s5543_s6] sm:$0xff]   ;;  %s3157_s20 = sld [smem:[#allocation3]] }
  0x50   :  { %4003 = vmatpush1.bf16.msra.mxu1 %v4028_v6  ;;  %463 = vmatpush1.bf16.msra.mxu0 %v4028_v6  ;;  %v4436_v30 = vld [vmem:[%s5539_s2 + $0xe0] ss:$8 sps:$4 sm:$0xff]   ;;  %v4447_v36 = vld [vmem:[%s5539_s2 + $0xf0] ss:$8 sps:$4 sm:$0xff]   ;;  %v4071_v39 = vld [vmem:[#allocation6 + $0xec] ss:$16 sps:$4 sm:$0xff]  }
  0x51   :  { %3996 = vmatprep.subr.bf16.mxu1 %v4029_v7  ;;  %464 = vmatprep.subr.bf16.mxu0 %v4029_v7  ;;  %v4074_v31 = vld [vmem:[%s5539_s2 + $0x20] ss:$8 sps:$4 sm:$0xff]   ;;  %v4075_v37 = vld [vmem:[%s5539_s2 + $0x30] ss:$8 sps:$4 sm:$0xff]   ;;  %s3647_s25 = sadd.f32 -1.0, %s5537_s0  ;;  %vm3484_vm0 = vcmask 7168  }
  0x52   :  { %v4059_v32 = vld [vmem:[#allocation6 + $0x88] ss:$16 sps:$4 sm:$0xff]   ;;  %v4086_v44 = vld [vmem:[%s5543_s6 + $0x10] sm:$0xff]   ;;  %v4088_v53 = vld [vmem:[%s5543_s6 + $0x20] sm:$0xff]  }
  0x53   :  { %v4062_v34 = vld [vmem:[#allocation6 + $0xa8] ss:$16 sps:$4 sm:$0xff]   ;;  %v4090_v55 = vld [vmem:[%s5543_s6 + $0x30] sm:$0xff]  }
  0x54   :  { %4004 = vmatpush1.bf16.msra.mxu1 %v4031_v8  ;;  %465 = vmatpush1.bf16.msra.mxu0 %v4031_v8  ;;  %v4066_v38 = vld [vmem:[#allocation6 + $0xc8] ss:$16 sps:$4 sm:$0xff]  }
  0x55   :  { %3997 = vmatprep.subr.bf16.mxu1 %v4032_v9  ;;  %466 = vmatprep.subr.bf16.mxu0 %v4032_v9  ;;  %v4069_v40 = vld [vmem:[#allocation6 + $0xe8] ss:$16 sps:$4 sm:$0xff]  }
  0x56   :  { %v4076_v43 = vld [vmem:[%s5539_s2 + $0x40] ss:$8 sps:$4 sm:$0xff]   ;;  %v4087_v45 = vld [vmem:[%s5543_s6 + $0x18] sm:$0xff]  }
  0x57   :  { %v4077_v46 = vld [vmem:[%s5539_s2 + $0x50] ss:$8 sps:$4 sm:$0xff]   ;;  %v4078_v47 = vld [vmem:[%s5539_s2 + $0x60] ss:$8 sps:$4 sm:$0xff]  }
  0x58   :  { %4005 = vmatpush1.bf16.msra.mxu1 %v4034_v10  ;;  %467 = vmatpush1.bf16.msra.mxu0 %v4034_v10  ;;  %v4079_v48 = vld [vmem:[%s5539_s2 + $0x70] ss:$8 sps:$4 sm:$0xff]   ;;  %v4080_v49 = vld [vmem:[%s5539_s2 + $0x80] ss:$8 sps:$4 sm:$0xff]  }
  0x59   :  { %3998 = vmatprep.subr.bf16.mxu1 %v4035_v11  ;;  %468 = vmatprep.subr.bf16.mxu0 %v4035_v11  ;;  %v4081_v50 = vld [vmem:[%s5539_s2 + $0x90] ss:$8 sps:$4 sm:$0xff]   ;;  %v4082_v51 = vld [vmem:[%s5539_s2 + $0xa0] ss:$8 sps:$4 sm:$0xff]  }
  0x5a   :  { %v4083_v52 = vld [vmem:[%s5539_s2 + $0xb0] ss:$8 sps:$4 sm:$0xff]   ;;  %v4089_v54 = vld [vmem:[%s5543_s6 + $0x28] sm:$0xff]  }
  0x5b   :  { %v4091_v56 = vld [vmem:[%s5543_s6 + $0x38] sm:$0xff]   ;;  %v4107_v4 = vld [vmem:[#allocation7 + $0x8] ss:$12 sps:$4 sm:$0xff]  }
  0x5c   :  { %4006 = vmatpush1.bf16.msra.mxu1 %v4037_v12  ;;  %469 = vmatpush1.bf16.msra.mxu0 %v4037_v12  ;;  %v4103_v61 = vld [vmem:[#allocation7 + $0x4c] ss:$12 sps:$4 sm:$0xff]  }
  0x5d   :  { %3999 = vmatprep.subr.bf16.mxu1 %v4038_v13  ;;  %470 = vmatprep.subr.bf16.mxu0 %v4038_v13 }
  0x60   :  { %4007 = vmatpush1.bf16.msra.mxu1 %v4040_v14  ;;  %471 = vmatpush1.bf16.msra.mxu0 %v4040_v14 }
  0x61   :  { %4000 = vmatprep.subr.bf16.mxu1 %v4041_v15  ;;  %472 = vmatprep.subr.bf16.mxu0 %v4041_v15 }
  0x64   :  { %4008 = vmatpush1.bf16.msra.mxu1 %v4043_v16  ;;  %473 = vmatpush1.bf16.msra.mxu0 %v4043_v16 }
  0x65   :  { %651 = vmatprep.subr.bf16.mxu1 %v4047_v17  ;;  %3849 = vmatprep.subr.bf16.mxu0 %v4084_v41 }
  0x67   :  { %611 = vmatmul.mubr.bf16.vlgmr.msra.gmra.mrb[0].mxu1 %v4415_v18  ;;  %491 = vmatmul.mubr.bf16.vlgmr.msra.gmra.mrb[0].mxu0 %v4072_v19 }
  0x68   :  { %652 = vmatpush1.bf16.msra.mxu1 %v4045_v20  ;;  %620 = vmatprep.mubr.bf16.mxu1 %v5553_v2 }
  0x69   :  { %653 = vmatprep.subr.bf16.mxu1 %v4050_v21  ;;  %500 = vmatprep.mubr.bf16.mxu0 %v5553_v2 }
  0x6a   :  { %3850 = vmatpush3.bf16.msra.mxu0 %v4084_v41 }
  0x6b   :  { %3851 = vmatprep.subr.bf16.mxu0 %v4085_v42 }
  0x6c   :  { %654 = vmatpush1.bf16.msra.mxu1 %v4048_v22 }
  0x6d   :  { %655 = vmatprep.subr.bf16.mxu1 %v4054_v24 }
  0x6e   :  { %3852 = vmatpush3.bf16.msra.mxu0 %v4085_v42 }
  0x6f   :  { %621 = vmatmul.mubr.bf16.gmra.mrb[4].mxu1 %v4425_v23  ;;  %501 = vmatmul.mubr.bf16.gmra.mrb[4].mxu0 %v4073_v26 }
  0x70   :  { %656 = vmatpush1.bf16.msra.mxu1 %v4052_v25  ;;  %630 = vmatprep.mubr.bf16.mxu1 %v5553_v2 }
  0x71   :  { %657 = vmatprep.subr.bf16.mxu1 %v4057_v27  ;;  %510 = vmatprep.mubr.bf16.mxu0 %v5553_v2 }
  0x72   :  { %3853 = vmatprep.subr.bf16.mxu0 %v4086_v44 }
  0x73   :  { %3854 = vmatpush3.bf16.msra.mxu0 %v4086_v44  ;;  %v4092_v44 = vld [vmem:[#allocation7] ss:$12 sps:$4 sm:$0xff]  }
  0x74   :  { %658 = vmatpush1.bf16.msra.mxu1 %v4055_v28  ;;  %3855 = vmatprep.subr.bf16.mxu0 %v4087_v45  ;;  %v4097_v28 = vld [vmem:[#allocation7 + $0x1c] ss:$12 sps:$4 sm:$0xff]  }
  0x75   :  { %659 = vmatprep.subr.bf16.mxu1 %v4061_v29 }
  0x77   :  { %631 = vmatmul.mubr.bf16.gmra.mrb[8].mxu1 %v4436_v30  ;;  %511 = vmatmul.mubr.bf16.gmra.mrb[8].mxu0 %v4074_v31 }
  0x78   :  { %660 = vmatpush1.bf16.msra.mxu1 %v4059_v32  ;;  %640 = vmatprep.mubr.bf16.mxu1 %v5553_v2 }
  0x79   :  { %661 = vmatprep.subr.bf16.mxu1 %v4064_v33  ;;  %520 = vmatprep.mubr.bf16.mxu0 %v5553_v2 }
  0x7a   :  { %3856 = vmatpush3.bf16.msra.mxu0 %v4087_v45  ;;  %v4094_v45 = vld [vmem:[#allocation7 + $0x4] ss:$12 sps:$4 sm:$0xff]  }
  0x7b   :  { %3857 = vmatprep.subr.bf16.mxu0 %v4088_v53 }
  0x7c   :  { %662 = vmatpush1.bf16.msra.mxu1 %v4062_v34 }
  0x7d   :  { %663 = vmatprep.subr.bf16.mxu1 %v4068_v35 }
  0x7e   :  { %3858 = vmatpush3.bf16.msra.mxu0 %v4088_v53 }
  0x7f   :  { %641 = vmatmul.mubr.bf16.gmra.mrb[12].mxu1 %v4447_v36  ;;  %521 = vmatmul.mubr.bf16.gmra.mrb[12].mxu0 %v4075_v37 }
  0x80   :  { %664 = vmatpush1.bf16.msra.mxu1 %v4066_v38  ;;  %683 = vmatprep.mubr.bf16.mxu1 %v5553_v2 }
  0x81   :  { %665 = vmatprep.subr.bf16.mxu1 %v4071_v39  ;;  %530 = vmatprep.mubr.bf16.mxu0 %v5553_v2 }
  0x82   :  { %3859 = vmatprep.subr.bf16.mxu0 %v4089_v54 }
  0x83   :  { %3860 = vmatpush3.bf16.msra.mxu0 %v4089_v54 }
  0x84   :  { %666 = vmatpush1.bf16.msra.mxu1 %v4069_v40  ;;  %3861 = vmatprep.subr.bf16.mxu0 %v4090_v55 }
  0x85   :  { %1612 = vmatprep.subr.bf16.mxu1 %v4094_v45 }
  0x87   :  { %684 = vmatmul.mubr.bf16.vlgmr.msra.gmra.mrb[16].mxu1 %v4072_v19  ;;  %531 = vmatmul.mubr.bf16.gmra.mrb[16].mxu0 %v4076_v43 }
  0x88   :  { %693 = vmatprep.mubr.bf16.mxu1 %v5553_v2  ;;  %540 = vmatprep.mubr.bf16.mxu0 %v5553_v2 }
  0x89   :  { %3862 = vmatpush3.bf16.msra.mxu0 %v4090_v55  ;;  %1613 = vmatpush1.bf16.msra.mxu1 %v4092_v44 }
  0x8a   :  { %3863 = vmatprep.subr.bf16.mxu0 %v4091_v56  ;;  %1614 = vmatprep.subr.bf16.mxu1 %v4097_v28 }
  0x8d   :  { %3864 = vmatpush3.bf16.msra.mxu0 %v4091_v56 }
  0x8e   :  { %3897 = vmatprep.subr.bf16.mxu0 %v4107_v4 }
  0x8f   :  { %694 = vmatmul.mubr.bf16.gmra.mrb[20].mxu1 %v4073_v26  ;;  %541 = vmatmul.mubr.bf16.gmra.mrb[20].mxu0 %v4077_v46 }
  0x90   :  { %703 = vmatprep.mubr.bf16.mxu1 %v5553_v2  ;;  %550 = vmatprep.mubr.bf16.mxu0 %v5553_v2 }
  0x97   :  { %704 = vmatmul.mubr.bf16.gmra.mrb[24].mxu1 %v4074_v31  ;;  %551 = vmatmul.mubr.bf16.gmra.mrb[24].mxu0 %v4078_v47 }
  0x98   :  { %713 = vmatprep.mubr.bf16.mxu1 %v5553_v2  ;;  %560 = vmatprep.mubr.bf16.mxu0 %v5553_v2 }
  0x9f   :  { %714 = vmatmul.mubr.bf16.gmra.mrb[28].mxu1 %v4075_v37  ;;  %561 = vmatmul.mubr.bf16.gmra.mrb[28].mxu0 %v4079_v48 }
  0xa0   :  { %723 = vmatprep.mubr.bf16.mxu1 %v5553_v2  ;;  %570 = vmatprep.mubr.bf16.mxu0 %v5553_v2 }
  0xa7   :  { %724 = vmatmul.mubr.bf16.gmra.mrb[32].mxu1 %v4076_v43  ;;  %571 = vmatmul.mubr.bf16.gmra.mrb[32].mxu0 %v4080_v49 }
  0xa8   :  { %733 = vmatprep.mubr.bf16.mxu1 %v5553_v2  ;;  %580 = vmatprep.mubr.bf16.mxu0 %v5553_v2 }
  0xaf   :  { %734 = vmatmul.mubr.bf16.gmra.mrb[36].mxu1 %v4077_v46  ;;  %581 = vmatmul.mubr.bf16.gmra.mrb[36].mxu0 %v4081_v50 }
  0xb0   :  { %743 = vmatprep.mubr.bf16.mxu1 %v5553_v2  ;;  %590 = vmatprep.mubr.bf16.mxu0 %v5553_v2 }
  0xb7   :  { %744 = vmatmul.mubr.bf16.gmra.mrb[40].mxu1 %v4078_v47  ;;  %591 = vmatmul.mubr.bf16.gmra.mrb[40].mxu0 %v4082_v51 }
  0xb8   :  { %753 = vmatprep.mubr.bf16.mxu1 %v5553_v2  ;;  %600 = vmatprep.mubr.bf16.mxu0 %v5553_v2 }
  0xbf   :  { %754 = vmatmul.mubr.bf16.gmra.mrb[44].mxu1 %v4079_v48  ;;  %601 = vmatmul.mubr.bf16.gmra.mrb[44].mxu0 %v4083_v52 }
  0xc0   :  { %763 = vmatprep.mubr.bf16.mxu1 %v5553_v2 }
  0xc7   :  { %764 = vmatmul.mubr.bf16.gmra.mrb[48].mxu1 %v4080_v49 }
  0xc8   :  { %773 = vmatprep.mubr.bf16.mxu1 %v5553_v2 }
  0xcf   :  { %774 = vmatmul.mubr.bf16.gmra.mrb[52].mxu1 %v4081_v50 }
  0xd0   :  { %783 = vmatprep.mubr.bf16.mxu1 %v5553_v2 }
  0xd7   :  { %784 = vmatmul.mubr.bf16.gmra.mrb[56].mxu1 %v4082_v51 }
  0xd8   :  { %793 = vmatprep.mubr.bf16.mxu1 %v5553_v2 }
  0xdf   :  { %794 = vmatmul.mubr.bf16.gmra.mrb[60].mxu1 %v4083_v52  ;;  %v4629_v52 = vld [vmem:[%s5542_s5] ss:$0 sm:$0xff] }
  0xe0   :  { %803 = vmatprep.mubr.bf16.mxu1 %v5553_v2 }
  0xe7   :  { %804 = vmatmul.mubr.bf16.gmra.mrb[64].mxu1 %v4415_v18 }
  0xe8   :  { %813 = vmatprep.mubr.bf16.mxu1 %v5553_v2 }
  0xef   :  { %814 = vmatmul.mubr.bf16.gmra.mrb[68].mxu1 %v4425_v23 }
  0xf0   :  { %823 = vmatprep.mubr.bf16.mxu1 %v5553_v2 }
  0xf7   :  { %824 = vmatmul.mubr.bf16.gmra.mrb[72].mxu1 %v4436_v30 }
  0xf8   :  { %833 = vmatprep.mubr.bf16.mxu1 %v5553_v2 }
  0xff   :  { %834 = vmatmul.mubr.bf16.gmra.mrb[76].mxu1 %v4447_v36 }
 0x100   :  { %1644 = vmatprep.mubr.bf16.mxu1 %v5553_v2  ;;  %v4095_v2 = vld [vmem:[#allocation7 + $0x18] ss:$12 sps:$4 sm:$0xff]  }
 0x101   :  { %1615 = vmatpush1.bf16.msra.mxu1 %v4095_v2  ;;  %v4101_v2 = vld [vmem:[#allocation7 + $0x48] ss:$12 sps:$4 sm:$0xff]  }
 0x13a   :  { %v4531_v57 = vpop.f32.mrb[0].mxu1  ;;  %v4533_v58 = vpop.f32.mrb[0].mxu0 }
 0x13b   :  { %v4535_v59 = vpop.f32.mrb[1].mxu1  ;;  %v494_v60 = vpop.f32.mrb[1].mxu0 }
 0x13c   :  { %v4539_v62 = vpop.f32.mrb[2].mxu1  ;;  %v844_v63 = vmax.f32 %v4533_v58, %v494_v60  ;;  %v496_v0 = vpop.f32.mrb[2].mxu0 }
 0x13d   :  { %v4542_v1 = vpop.f32.mrb[3].mxu1  ;;  %v498_v3 = vpop.f32.mrb[3].mxu0 }
 0x13e   :  { %v845_v5 = vmax.f32 %v496_v0, %v498_v3 }
 0x142   :  { %v4546_v6 = vpop.f32.mrb[4].mxu1  ;;  %v4548_v7 = vpop.f32.mrb[4].mxu0 }
 0x143   :  { %v4550_v8 = vpop.f32.mrb[5].mxu1  ;;  %v4552_v9 = vpop.f32.mrb[5].mxu0 }
 0x144   :  { %v4556_v11 = vpop.f32.mrb[6].mxu1  ;;  %v846_v12 = vmax.f32 %v4548_v7, %v4552_v9  ;;  %v4560_v13 = vpop.f32.mrb[6].mxu0 }
 0x145   :  { %v4562_v14 = vpop.f32.mrb[7].mxu1  ;;  %v4564_v15 = vpop.f32.mrb[7].mxu0 }
 0x146   :  { %v847_v17 = vmax.f32 %v4560_v13, %v4564_v15 }
 0x14a   :  { %v4570_v18 = vpop.f32.mrb[8].mxu1  ;;  %v4572_v19 = vpop.f32.mrb[8].mxu0 }
 0x14b   :  { %v4574_v20 = vpop.f32.mrb[9].mxu1  ;;  %v4576_v21 = vpop.f32.mrb[9].mxu0 }
 0x14c   :  { %v4580_v23 = vpop.f32.mrb[10].mxu1  ;;  %v848_v24 = vmax.f32 %v4572_v19, %v4576_v21  ;;  %v4584_v25 = vpop.f32.mrb[10].mxu0 }
 0x14d   :  { %v4586_v26 = vpop.f32.mrb[11].mxu1  ;;  %v4588_v27 = vpop.f32.mrb[11].mxu0 }
 0x14e   :  { %v849_v29 = vmax.f32 %v4584_v25, %v4588_v27 }
 0x152   :  { %v4594_v30 = vpop.f32.mrb[12].mxu1  ;;  %v4596_v31 = vpop.f32.mrb[12].mxu0 }
 0x153   :  { %v4598_v32 = vpop.f32.mrb[13].mxu1  ;;  %v4600_v33 = vpop.f32.mrb[13].mxu0 }
 0x154   :  { %v4604_v35 = vpop.f32.mrb[14].mxu1  ;;  %v850_v36 = vmax.f32 %v4596_v31, %v4600_v33  ;;  %v4608_v37 = vpop.f32.mrb[14].mxu0  ;;  %v4113_v31 = vld [vmem:[#allocation7 + $0x50] ss:$12 sps:$4 sm:$0xff]  }
 0x155   :  { %v4610_v38 = vpop.f32.mrb[15].mxu1  ;;  %v4612_v39 = vpop.f32.mrb[15].mxu0 }
 0x156   :  { %v851_v41 = vmax.f32 %v4608_v37, %v4612_v39 }
 0x15a   :  { %v685_v42 = vpop.f32.mrb[16].mxu1  ;;  %v4618_v43 = vpop.f32.mrb[16].mxu0 }
 0x15b   :  { %v687_v46 = vpop.f32.mrb[17].mxu1  ;;  %v4620_v47 = vpop.f32.mrb[17].mxu0 }
 0x15c   :  { %v876_v48 = vmax.f32 %v685_v42, %v687_v46  ;;  %v689_v49 = vpop.f32.mrb[18].mxu1  ;;  %v852_v50 = vmax.f32 %v4618_v43, %v4620_v47  ;;  %v4624_v51 = vpop.f32.mrb[18].mxu0 }
 0x15d   :  { %v691_v53 = vpop.f32.mrb[19].mxu1  ;;  %v4631_v54 = vpop.f32.mrb[19].mxu0 }
 0x15e   :  { %v908_v55 = vmax.f32 %v844_v63, %v876_v48  ;;  %v877_v56 = vmax.f32 %v689_v49, %v691_v53  ;;  %v853_v58 = vmax.f32 %v4624_v51, %v4631_v54 }
 0x160   :  { %v947_v60 = vadd.f32 %v4629_v52, %v908_v55  ;;  %v909_v0 = vmax.f32 %v845_v5, %v877_v56  ;;  %v4100_v5 = vld [vmem:[#allocation7 + $0x34] ss:$12 sps:$4 sm:$0xff]  }
 0x161   :  { %1616 = vmatprep.subr.bf16.mxu1 %v4100_v5 }
 0x162   :  { %v979_v3 = vmul.f32 0.2, %v947_v60  ;;  %v948_v42 = vadd.f32 %v4629_v52, %v909_v0  ;;  %v695_v45 = vpop.f32.mrb[20].mxu1  ;;  %v4637_v46 = vpop.f32.mrb[20].mxu0 }
 0x163   :  { %v697_v40 = vpop.f32.mrb[21].mxu1  ;;  %v4639_v34 = vpop.f32.mrb[21].mxu0 }
 0x164   :  { %v980_v44 = vmul.f32 0.2, %v948_v42  ;;  %v878_v63 = vmax.f32 %v695_v45, %v697_v40  ;;  %v699_v48 = vpop.f32.mrb[22].mxu1  ;;  %v4643_v53 = vpop.f32.mrb[22].mxu0  ;;  %v1011_v56 = vmax.f32 %v947_v60, %v979_v3  ;;  %v4098_v45 = vld [vmem:[#allocation7 + $0x30] ss:$12 sps:$4 sm:$0xff]  }
 0x165   :  { %v701_v55 = vpop.f32.mrb[23].mxu1  ;;  %v4645_v0 = vpop.f32.mrb[23].mxu0  ;;  %1617 = vmatpush1.bf16.msra.mxu1 %v4098_v45 }
 0x166   :  { %v910_v22 = vmax.f32 %v846_v12, %v878_v63  ;;  %v879_v16 = vmax.f32 %v699_v48, %v701_v55  ;;  %v1012_v10 = vmax.f32 %v948_v42, %v980_v44  ;;  %v855_v40 = vmax.f32 %v4643_v53, %v4645_v0  ;;  %1618 = vmatprep.subr.bf16.mxu1 %v4103_v61 }
 0x168   :  { %v949_v49 = vadd.f32 %v4629_v52, %v910_v22  ;;  %v911_v28 = vmax.f32 %v847_v17, %v879_v16  ;;  %v1043_v60 = vpack.c.bf16 %v1012_v10, %v1011_v56  ;;  %v4106_v22 = vld [vmem:[#allocation7 + $0x64] ss:$12 sps:$4 sm:$0xff]  }
 0x169   :  { %1619 = vmatpush1.bf16.msra.mxu1 %v4101_v2  ;;  %v4109_v2 = vld [vmem:[#allocation7 + $0x78] ss:$12 sps:$4 sm:$0xff]  }
 0x16a   :  { %v981_v7 = vmul.f32 0.2, %v949_v49  ;;  %v950_v9 = vadd.f32 %v4629_v52, %v911_v28  ;;  %v705_v12 = vpop.f32.mrb[24].mxu1  ;;  %3865 = vmatprep.mubr.bf16.mxu0 %v1043_v60  ;;  %v4657_v3 = vpop.f32.mrb[24].mxu0  ;;  %v4104_v28 = vld [vmem:[#allocation7 + $0x60] ss:$12 sps:$4 sm:$0xff]   ;;  %1620 = vmatprep.subr.bf16.mxu1 %v4106_v22 }
 0x16b   :  { %v707_v42 = vpop.f32.mrb[25].mxu1  ;;  %v4659_v44 = vpop.f32.mrb[25].mxu0  ;;  %v4111_v60 = vld [vmem:[#allocation7 + $0x7c] ss:$12 sps:$4 sm:$0xff]  }
 0x16c   :  { %v982_v63 = vmul.f32 0.2, %v950_v9  ;;  %v880_v48 = vmax.f32 %v705_v12, %v707_v42  ;;  %v709_v13 = vpop.f32.mrb[26].mxu1  ;;  %v856_v10 = vmax.f32 %v4657_v3, %v4659_v44  ;;  %v4663_v15 = vpop.f32.mrb[26].mxu0  ;;  %v1013_v16 = vmax.f32 %v949_v49, %v981_v7  ;;  %v4108_v7 = vld [vmem:[#allocation7 + $0x20] ss:$12 sps:$4 sm:$0xff]  }
 0x16d   :  { %v711_v17 = vpop.f32.mrb[27].mxu1  ;;  %v4665_v5 = vpop.f32.mrb[27].mxu0  ;;  %1621 = vmatpush1.bf16.msra.mxu1 %v4104_v28 }
 0x16e   :  { %v1014_v55 = vmax.f32 %v950_v9, %v982_v63  ;;  %v912_v56 = vmax.f32 %v848_v24, %v880_v48  ;;  %v881_v45 = vmax.f32 %v709_v13, %v711_v17  ;;  %v857_v61 = vmax.f32 %v4663_v15, %v4665_v5  ;;  %1622 = vmatprep.subr.bf16.mxu1 %v4111_v60  ;;  %v4116_v48 = vld [vmem:[#allocation7 + $0x94] ss:$12 sps:$4 sm:$0xff]   ;;  %v4112_v17 = vld [vmem:[#allocation7 + $0x38] ss:$12 sps:$4 sm:$0xff]  }
 0x170   :  { %v1044_v12 = vpack.c.bf16 %v1014_v55, %v1013_v16  ;;  %v951_v42 = vadd.f32 %v4629_v52, %v912_v56  ;;  %v913_v49 = vmax.f32 %v849_v29, %v881_v45 }
 0x171   :  { %1623 = vmatpush1.bf16.msra.mxu1 %v4109_v2 }
 0x172   :  { %v983_v9 = vmul.f32 0.2, %v951_v42  ;;  %v952_v19 = vadd.f32 %v4629_v52, %v913_v49  ;;  %v715_v21 = vpop.f32.mrb[28].mxu1  ;;  %3866 = vmatmul.mubr.bf16.vlgmr.msra.gmra.mrb[48].mxu0 %v1044_v12  ;;  %v4677_v24 = vpop.f32.mrb[28].mxu0  ;;  %v4114_v49 = vld [vmem:[#allocation7 + $0x90] ss:$12 sps:$4 sm:$0xff]   ;;  %1624 = vmatprep.subr.bf16.mxu1 %v4116_v48 }
 0x173   :  { %v717_v63 = vpop.f32.mrb[29].mxu1  ;;  %v4679_v22 = vpop.f32.mrb[29].mxu0  ;;  %3898 = vmatpush3.bf16.msra.mxu0 %v4107_v4 }
 0x174   :  { %v984_v13 = vmul.f32 0.2, %v952_v19  ;;  %v882_v16 = vmax.f32 %v715_v21, %v717_v63  ;;  %v719_v25 = vpop.f32.mrb[30].mxu1  ;;  %v858_v27 = vmax.f32 %v4677_v24, %v4679_v22  ;;  %v4683_v29 = vpop.f32.mrb[30].mxu0  ;;  %3899 = vmatprep.subr.bf16.mxu0 %v4108_v7  ;;  %v1015_v56 = vmax.f32 %v951_v42, %v983_v9  ;;  %v4121_v21 = vld [vmem:[#allocation7 + $0xac] ss:$12 sps:$4 sm:$0xff]  }
 0x175   :  { %v721_v55 = vpop.f32.mrb[31].mxu1  ;;  %v4685_v45 = vpop.f32.mrb[31].mxu0  ;;  %1625 = vmatpush1.bf16.msra.mxu1 %v4114_v49 }
 0x176   :  { %v914_v4 = vmax.f32 %v850_v36, %v882_v16  ;;  %v883_v28 = vmax.f32 %v719_v25, %v721_v55  ;;  %v1016_v60 = vmax.f32 %v952_v19, %v984_v13  ;;  %v859_v12 = vmax.f32 %v4683_v29, %v4685_v45  ;;  %1626 = vmatprep.subr.bf16.mxu1 %v4121_v21  ;;  %v4117_v55 = vld [vmem:[#allocation7 + $0x68] ss:$12 sps:$4 sm:$0xff]  }
 0x177   :  { %3900 = vmatpush3.bf16.msra.mxu0 %v4108_v7  ;;  %v4119_v7 = vld [vmem:[#allocation7 + $0xa8] ss:$12 sps:$4 sm:$0xff]  }
 0x178   :  { %v953_v63 = vadd.f32 %v4629_v52, %v914_v4  ;;  %v915_v42 = vmax.f32 %v851_v41, %v883_v28  ;;  %v1045_v9 = vpack.c.bf16 %v1016_v60, %v1015_v56  ;;  %3901 = vmatprep.subr.bf16.mxu0 %v4112_v17 }
 0x179   :  { %1627 = vmatpush1.bf16.msra.mxu1 %v4119_v7 }
 0x17a   :  { %v985_v33 = vmul.f32 0.2, %v953_v63  ;;  %v954_v36 = vadd.f32 %v4629_v52, %v915_v42  ;;  %v725_v19 = vpop.f32.mrb[32].mxu1  ;;  %3869 = vmatprep.mubr.bf16.mxu0 %v1045_v9  ;;  %v4697_v13 = vpop.f32.mrb[32].mxu0 }
 0x17b   :  { %v727_v2 = vpop.f32.mrb[33].mxu1  ;;  %v4699_v48 = vpop.f32.mrb[33].mxu0  ;;  %3902 = vmatpush3.bf16.msra.mxu0 %v4112_v17 }
 0x17c   :  { %v986_v16 = vmul.f32 0.2, %v954_v36  ;;  %v884_v37 = vmax.f32 %v725_v19, %v727_v2  ;;  %v729_v39 = vpop.f32.mrb[34].mxu1  ;;  %v860_v41 = vmax.f32 %v4697_v13, %v4699_v48  ;;  %v4703_v25 = vpop.f32.mrb[34].mxu0  ;;  %3903 = vmatprep.subr.bf16.mxu0 %v4113_v31  ;;  %v1017_v4 = vmax.f32 %v953_v63, %v985_v33  ;;  %v4118_v33 = vld [vmem:[#allocation7 + $0x80] ss:$12 sps:$4 sm:$0xff]  }
 0x17d   :  { %v731_v56 = vpop.f32.mrb[35].mxu1  ;;  %v4705_v28 = vpop.f32.mrb[35].mxu0 }
 0x17e   :  { %v916_v60 = vmax.f32 %v852_v50, %v884_v37  ;;  %v885_v17 = vmax.f32 %v729_v39, %v731_v56  ;;  %v1018_v49 = vmax.f32 %v954_v36, %v986_v16  ;;  %v861_v21 = vmax.f32 %v4703_v25, %v4705_v28 }
 0x17f   :  { %3904 = vmatpush3.bf16.msra.mxu0 %v4113_v31 }
 0x180   :  { %v955_v42 = vadd.f32 %v4629_v52, %v916_v60  ;;  %v917_v9 = vmax.f32 %v853_v58, %v885_v17  ;;  %v1046_v63 = vpack.c.bf16 %v1018_v49, %v1017_v4  ;;  %3905 = vmatprep.subr.bf16.mxu0 %v4117_v55  ;;  %v4122_v58 = vld [vmem:[#allocation7 + $0x98] ss:$12 sps:$4 sm:$0xff]   ;;  %v5555_v4 = vmax.f32 %v4637_v46, %v4639_v34 }
 0x182   :  { %v987_v19 = vmul.f32 0.2, %v955_v42  ;;  %v956_v43 = vadd.f32 %v4629_v52, %v917_v9  ;;  %v735_v47 = vpop.f32.mrb[36].mxu1  ;;  %3870 = vmatmul.mubr.bf16.gmra.mrb[52].mxu0 %v1046_v63  ;;  %v4717_v50 = vpop.f32.mrb[36].mxu0 }
 0x183   :  { %v737_v36 = vpop.f32.mrb[37].mxu1  ;;  %v4719_v2 = vpop.f32.mrb[37].mxu0  ;;  %3906 = vmatpush3.bf16.msra.mxu0 %v4117_v55 }
 0x184   :  { %v988_v31 = vmul.f32 0.2, %v956_v43  ;;  %v886_v7 = vmax.f32 %v735_v47, %v737_v36  ;;  %v739_v16 = vpop.f32.mrb[38].mxu1  ;;  %v862_v51 = vmax.f32 %v4717_v50, %v4719_v2  ;;  %v4723_v54 = vpop.f32.mrb[38].mxu0  ;;  %3907 = vmatprep.subr.bf16.mxu0 %v4118_v33  ;;  %v1019_v39 = vmax.f32 %v955_v42, %v987_v19 }
 0x185   :  { %v741_v37 = vpop.f32.mrb[39].mxu1  ;;  %v4725_v56 = vpop.f32.mrb[39].mxu0 }
 0x186   :  { %v918_v60 = vmax.f32 %v5555_v4, %v886_v7  ;;  %v887_v17 = vmax.f32 %v739_v16, %v741_v37  ;;  %v1020_v55 = vmax.f32 %v956_v43, %v988_v31  ;;  %v863_v49 = vmax.f32 %v4723_v54, %v4725_v56 }
 0x187   :  { %3908 = vmatpush3.bf16.msra.mxu0 %v4118_v33 }
 0x188   :  { %v957_v9 = vadd.f32 %v4629_v52, %v918_v60  ;;  %v919_v63 = vmax.f32 %v855_v40, %v887_v17  ;;  %v1047_v47 = vpack.c.bf16 %v1020_v55, %v1019_v39  ;;  %3909 = vmatprep.subr.bf16.mxu0 %v4122_v58 }
 0x18a   :  { %v989_v42 = vmul.f32 0.2, %v957_v9  ;;  %v958_v19 = vadd.f32 %v4629_v52, %v919_v63  ;;  %v745_v36 = vpop.f32.mrb[40].mxu1  ;;  %3873 = vmatprep.mubr.bf16.mxu0 %v1047_v47  ;;  %v4737_v34 = vpop.f32.mrb[40].mxu0 }
 0x18b   :  { %v747_v46 = vpop.f32.mrb[41].mxu1  ;;  %v4739_v43 = vpop.f32.mrb[41].mxu0  ;;  %3910 = vmatpush3.bf16.msra.mxu0 %v4122_v58 }
 0x18c   :  { %v990_v33 = vmul.f32 0.2, %v958_v19  ;;  %v888_v31 = vmax.f32 %v745_v36, %v747_v46  ;;  %v749_v7 = vpop.f32.mrb[42].mxu1  ;;  %v864_v53 = vmax.f32 %v4737_v34, %v4739_v43  ;;  %v4743_v0 = vpop.f32.mrb[42].mxu0  ;;  %v1021_v16 = vmax.f32 %v957_v9, %v989_v42 }
 0x18d   :  { %v751_v40 = vpop.f32.mrb[43].mxu1  ;;  %v4745_v37 = vpop.f32.mrb[43].mxu0 }
 0x18e   :  { %v920_v39 = vmax.f32 %v856_v10, %v888_v31  ;;  %v889_v4 = vmax.f32 %v749_v7, %v751_v40  ;;  %v1022_v60 = vmax.f32 %v958_v19, %v990_v33  ;;  %v865_v58 = vmax.f32 %v4743_v0, %v4745_v37 }
 0x190   :  { %v959_v17 = vadd.f32 %v4629_v52, %v920_v39  ;;  %v921_v55 = vmax.f32 %v857_v61, %v889_v4  ;;  %v1048_v63 = vpack.c.bf16 %v1022_v60, %v1021_v16 }
 0x192   :  { %v991_v47 = vmul.f32 0.2, %v959_v17  ;;  %v960_v9 = vadd.f32 %v4629_v52, %v921_v55  ;;  %v755_v42 = vpop.f32.mrb[44].mxu1  ;;  %3874 = vmatmul.mubr.bf16.gmra.mrb[56].mxu0 %v1048_v63  ;;  %v4757_v36 = vpop.f32.mrb[44].mxu0 }
 0x193   :  { %v757_v3 = vpop.f32.mrb[45].mxu1  ;;  %v4759_v44 = vpop.f32.mrb[45].mxu0 }
 0x194   :  { %v992_v10 = vmul.f32 0.2, %v960_v9  ;;  %v890_v19 = vmax.f32 %v755_v42, %v757_v3  ;;  %v759_v46 = vpop.f32.mrb[46].mxu1  ;;  %v866_v33 = vmax.f32 %v4757_v36, %v4759_v44  ;;  %v4763_v31 = vpop.f32.mrb[46].mxu0  ;;  %v1023_v5 = vmax.f32 %v959_v17, %v991_v47 }
 0x195   :  { %v761_v15 = vpop.f32.mrb[47].mxu1  ;;  %v4765_v61 = vpop.f32.mrb[47].mxu0 }
 0x196   :  { %v922_v7 = vmax.f32 %v858_v27, %v890_v19  ;;  %v891_v40 = vmax.f32 %v759_v46, %v761_v15  ;;  %v1024_v16 = vmax.f32 %v960_v9, %v992_v10  ;;  %v867_v39 = vmax.f32 %v4763_v31, %v4765_v61 }
 0x197   :  { %v5557_v61 = vmax.f32 %v4539_v62, %v4542_v1  ;;  %v5559_v1 = vmax.f32 %v4556_v11, %v4562_v14  ;;  %v4123_v11 = vld [vmem:[#allocation7 + $0xb0] ss:$12 sps:$4 sm:$0xff]  }
 0x198   :  { %v961_v4 = vadd.f32 %v4629_v52, %v922_v7  ;;  %v923_v60 = vmax.f32 %v859_v12, %v891_v40  ;;  %v1049_v55 = vpack.c.bf16 %v1024_v16, %v1023_v5  ;;  %3911 = vmatprep.subr.bf16.mxu0 %v4123_v11 }
 0x199   :  { %3912 = vmatpush3.bf16.msra.mxu0 %v4123_v11  ;;  %v4127_v11 = vld [vmem:[#allocation9 + $0x10] ss:$8 sps:$4 sm:$0xff]  }
 0x19a   :  { %v993_v63 = vmul.f32 0.2, %v961_v4  ;;  %v962_v17 = vadd.f32 %v4629_v52, %v923_v60  ;;  %v765_v47 = vpop.f32.mrb[48].mxu1  ;;  %3877 = vmatprep.mubr.bf16.mxu0 %v1049_v55 }
 0x19b   :  { %v767_v42 = vpop.f32.mrb[49].mxu1 }
 0x19c   :  { %v994_v24 = vmul.f32 0.2, %v962_v17  ;;  %v892_v22 = vmax.f32 %v765_v47, %v767_v42  ;;  %v769_v27 = vpop.f32.mrb[50].mxu1  ;;  %v1025_v19 = vmax.f32 %v961_v4, %v993_v63 }
 0x19d   :  { %v771_v9 = vpop.f32.mrb[51].mxu1 }
 0x19e   :  { %v924_v3 = vmax.f32 %v860_v41, %v892_v22  ;;  %v893_v10 = vmax.f32 %v769_v27, %v771_v9  ;;  %v1026_v46 = vmax.f32 %v962_v17, %v994_v24 }
 0x1a0   :  { %v963_v29 = vadd.f32 %v4629_v52, %v924_v3  ;;  %v925_v45 = vmax.f32 %v861_v21, %v893_v10  ;;  %v1050_v12 = vpack.c.bf16 %v1026_v46, %v1025_v19 }
 0x1a2   :  { %v995_v15 = vmul.f32 0.2, %v963_v29  ;;  %v964_v5 = vadd.f32 %v4629_v52, %v925_v45  ;;  %v775_v7 = vpop.f32.mrb[52].mxu1  ;;  %3878 = vmatmul.mubr.bf16.gmra.mrb[60].mxu0 %v1050_v12 }
 0x1a3   :  { %v777_v40 = vpop.f32.mrb[53].mxu1 }
 0x1a4   :  { %v996_v16 = vmul.f32 0.2, %v964_v5  ;;  %v894_v60 = vmax.f32 %v775_v7, %v777_v40  ;;  %v779_v13 = vpop.f32.mrb[54].mxu1  ;;  %v1027_v55 = vmax.f32 %v963_v29, %v995_v15 }
 0x1a5   :  { %v781_v48 = vpop.f32.mrb[55].mxu1 }
 0x1a6   :  { %v926_v41 = vmax.f32 %v862_v51, %v894_v60  ;;  %v895_v4 = vmax.f32 %v779_v13, %v781_v48  ;;  %v1028_v63 = vmax.f32 %v964_v5, %v996_v16 }
 0x1a8   :  { %v965_v25 = vadd.f32 %v4629_v52, %v926_v41  ;;  %v927_v28 = vmax.f32 %v863_v49, %v895_v4  ;;  %v1051_v21 = vpack.c.bf16 %v1028_v63, %v1027_v55 }
 0x1aa   :  { %v997_v17 = vmul.f32 0.2, %v965_v25  ;;  %v966_v47 = vadd.f32 %v4629_v52, %v927_v28  ;;  %v785_v42 = vpop.f32.mrb[56].mxu1  ;;  %3881 = vmatprep.mubr.bf16.mxu0 %v1051_v21 }
 0x1ab   :  { %v787_v24 = vpop.f32.mrb[57].mxu1 }
 0x1ac   :  { %v998_v22 = vmul.f32 0.2, %v966_v47  ;;  %v896_v27 = vmax.f32 %v785_v42, %v787_v24  ;;  %v789_v50 = vpop.f32.mrb[58].mxu1  ;;  %v1029_v3 = vmax.f32 %v965_v25, %v997_v17 }
 0x1ad   :  { %v791_v2 = vpop.f32.mrb[59].mxu1 }
 0x1ae   :  { %v928_v51 = vmax.f32 %v864_v53, %v896_v27  ;;  %v897_v9 = vmax.f32 %v789_v50, %v791_v2  ;;  %v1030_v10 = vmax.f32 %v966_v47, %v998_v22  ;;  %v5558_v50 = vmax.f32 %v4546_v6, %v4550_v8 }
 0x1b0   :  { %v967_v54 = vadd.f32 %v4629_v52, %v928_v51  ;;  %v929_v56 = vmax.f32 %v865_v58, %v897_v9  ;;  %v1052_v49 = vpack.c.bf16 %v1030_v10, %v1029_v3 }
 0x1b2   :  { %v999_v19 = vmul.f32 0.2, %v967_v54  ;;  %v968_v46 = vadd.f32 %v4629_v52, %v929_v56  ;;  %v795_v29 = vpop.f32.mrb[60].mxu1  ;;  %3882 = vmatmul.mubr.bf16.gmra.mrb[64].mxu0 %v1052_v49 }
 0x1b3   :  { %v797_v45 = vpop.f32.mrb[61].mxu1 }
 0x1b4   :  { %v1000_v12 = vmul.f32 0.2, %v968_v46  ;;  %v898_v15 = vmax.f32 %v795_v29, %v797_v45  ;;  %v799_v34 = vpop.f32.mrb[62].mxu1  ;;  %v1031_v7 = vmax.f32 %v967_v54, %v999_v19 }
 0x1b5   :  { %v801_v43 = vpop.f32.mrb[63].mxu1 }
 0x1b6   :  { %v930_v53 = vmax.f32 %v866_v33, %v898_v15  ;;  %v899_v5 = vmax.f32 %v799_v34, %v801_v43  ;;  %v1032_v40 = vmax.f32 %v968_v46, %v1000_v12  ;;  %v5556_v33 = vmax.f32 %v4531_v57, %v4535_v59 }
 0x1b7   :  { %v5560_v12 = vmax.f32 %v4570_v18, %v4574_v20 }
 0x1b8   :  { %v969_v0 = vadd.f32 %v4629_v52, %v930_v53  ;;  %v931_v37 = vmax.f32 %v867_v39, %v899_v5  ;;  %v1053_v58 = vpack.c.bf16 %v1032_v40, %v1031_v7  ;;  %v5561_v5 = vmax.f32 %v4580_v23, %v4586_v26 }
 0x1ba   :  { %v1001_v16 = vmul.f32 0.2, %v969_v0  ;;  %v970_v60 = vadd.f32 %v4629_v52, %v931_v37  ;;  %v805_v13 = vpop.f32.mrb[64].mxu1  ;;  %3885 = vmatprep.mubr.bf16.mxu0 %v1053_v58 }
 0x1bb   :  { %v807_v48 = vpop.f32.mrb[65].mxu1 }
 0x1bc   :  { %v1002_v41 = vmul.f32 0.2, %v970_v60  ;;  %v900_v4 = vmax.f32 %v805_v13, %v807_v48  ;;  %v809_v36 = vpop.f32.mrb[66].mxu1  ;;  %v1033_v25 = vmax.f32 %v969_v0, %v1001_v16  ;;  %v5562_v48 = vmax.f32 %v4594_v30, %v4598_v32  ;;  %v4126_v30 = vld [vmem:[#allocation9 + $0x4] ss:$8 sps:$4 sm:$0xff]  }
 0x1bd   :  { %v811_v44 = vpop.f32.mrb[67].mxu1  ;;  %2706 = vmatprep.subr.bf16.mxu1 %v4126_v30  ;;  %v4844_v32 = vld [vmem:[%s5544_s7] ss:$0 sm:$0xff] }
 0x1be   :  { %v932_v55 = vmax.f32 %v5556_v33, %v900_v4  ;;  %v901_v63 = vmax.f32 %v809_v36, %v811_v44  ;;  %v1034_v28 = vmax.f32 %v970_v60, %v1002_v41  ;;  %v5563_v44 = vmax.f32 %v4604_v35, %v4610_v38 }
 0x1c0   :  { %v971_v31 = vadd.f32 %v4629_v52, %v932_v55  ;;  %v933_v39 = vmax.f32 %v5557_v61, %v901_v63  ;;  %v1054_v21 = vpack.c.bf16 %v1034_v28, %v1033_v25 }
 0x1c2   :  { %v1003_v17 = vmul.f32 0.2, %v971_v31  ;;  %v972_v47 = vadd.f32 %v4629_v52, %v933_v39  ;;  %v815_v42 = vpop.f32.mrb[68].mxu1  ;;  %3886 = vmatmul.mubr.bf16.gmra.mrb[68].mxu0 %v1054_v21 }
 0x1c3   :  { %v817_v24 = vpop.f32.mrb[69].mxu1 }
 0x1c4   :  { %v1004_v22 = vmul.f32 0.2, %v972_v47  ;;  %v902_v27 = vmax.f32 %v815_v42, %v817_v24  ;;  %v819_v57 = vpop.f32.mrb[70].mxu1  ;;  %v1035_v9 = vmax.f32 %v971_v31, %v1003_v17 }
 0x1c5   :  { %v821_v59 = vpop.f32.mrb[71].mxu1 }
 0x1c6   :  { %v934_v2 = vmax.f32 %v5558_v50, %v902_v27  ;;  %v903_v51 = vmax.f32 %v819_v57, %v821_v59  ;;  %v1036_v3 = vmax.f32 %v972_v47, %v1004_v22  ;;  %v141_v47 = vld [vmem:[%s5539_s2 + $0xc] ss:$16 sps:$4 sm:$0xff]  }
 0x1c8   :  { %v973_v62 = vadd.f32 %v4629_v52, %v934_v2  ;;  %v935_v10 = vmax.f32 %v5559_v1, %v903_v51  ;;  %v1055_v54 = vpack.c.bf16 %v1036_v3, %v1035_v9  ;;  %v1358_v9 = vunpack.c.h.bf16 %v141_v47 }
 0x1ca   :  { %v1005_v56 = vmul.f32 0.2, %v973_v62  ;;  %v974_v49 = vadd.f32 %v4629_v52, %v935_v10  ;;  %v825_v19 = vpop.f32.mrb[72].mxu1  ;;  %3889 = vmatprep.mubr.bf16.mxu0 %v1055_v54  ;;  %v1356_v10 = vunpack.c.l.bf16 %v141_v47 }
 0x1cb   :  { %v827_v46 = vpop.f32.mrb[73].mxu1 }
 0x1cc   :  { %v1006_v29 = vmul.f32 0.2, %v974_v49  ;;  %v904_v45 = vmax.f32 %v825_v19, %v827_v46  ;;  %v829_v6 = vpop.f32.mrb[74].mxu1  ;;  %v1037_v43 = vmax.f32 %v973_v62, %v1005_v56 }
 0x1cd   :  { %v831_v8 = vpop.f32.mrb[75].mxu1 }
 0x1ce   :  { %v936_v15 = vmax.f32 %v5560_v12, %v904_v45  ;;  %v905_v34 = vmax.f32 %v829_v6, %v831_v8  ;;  %v1038_v53 = vmax.f32 %v974_v49, %v1006_v29  ;;  %v4151_v45 = vld [vmem:[%s5547_s10] sm:$0xff]  }
 0x1cf   :  { %v4124_v12 = vld [vmem:[#allocation9] ss:$8 sps:$4 sm:$0xff]   ;;  %3945 = vmatprep.subr.bf16.mxu0 %v4151_v45 }
 0x1d0   :  { %v975_v14 = vadd.f32 %v4629_v52, %v936_v15  ;;  %v937_v7 = vmax.f32 %v5561_v5, %v905_v34  ;;  %v1056_v40 = vpack.c.bf16 %v1038_v53, %v1037_v43  ;;  %v4129_v15 = vld [vmem:[#allocation9 + $0x14] ss:$8 sps:$4 sm:$0xff]   ;;  %v4155_v34 = vld [vmem:[%s5547_s10 + $0x8] sm:$0xff]   ;;  %v5564_v43 = vmov 0  }
 0x1d2   :  { %v1007_v0 = vmul.f32 0.2, %v975_v14  ;;  %v976_v37 = vadd.f32 %v4629_v52, %v937_v7  ;;  %v835_v58 = vpop.f32.mrb[76].mxu1  ;;  %3890 = vmatmul.mubr.bf16.gmra.mrb[72].mxu0 %v1056_v40  ;;  %v4132_v7 = vld [vmem:[#allocation9 + $0x24] ss:$8 sps:$4 sm:$0xff]   ;;  %v4159_v40 = vld [vmem:[%s5547_s10 + $0x10] sm:$0xff]  }
 0x1d3   :  { %v837_v18 = vpop.f32.mrb[77].mxu1 }
 0x1d4   :  { %v1008_v20 = vmul.f32 0.2, %v976_v37  ;;  %v906_v16 = vmax.f32 %v835_v58, %v837_v18  ;;  %v839_v60 = vpop.f32.mrb[78].mxu1  ;;  %v1039_v23 = vmax.f32 %v975_v14, %v1007_v0  ;;  %v144_v0 = vld [vmem:[%s5539_s2 + $0x24] ss:$16 sps:$4 sm:$0xff]  }
 0x1d5   :  { %v841_v13 = vpop.f32.mrb[79].mxu1  ;;  %v145_v58 = vld [vmem:[%s5539_s2 + $0x2c] ss:$16 sps:$4 sm:$0xff]  }
 0x1d6   :  { %v938_v41 = vmax.f32 %v5562_v48, %v906_v16  ;;  %v907_v4 = vmax.f32 %v839_v60, %v841_v13  ;;  %v1040_v26 = vmax.f32 %v976_v37, %v1008_v20 }
 0x1d8   :  { %v977_v36 = vadd.f32 %v4629_v52, %v938_v41  ;;  %v939_v33 = vmax.f32 %v5563_v44, %v907_v4  ;;  %v1057_v55 = vpack.c.bf16 %v1040_v26, %v1039_v23  ;;  %v4130_v41 = vld [vmem:[#allocation9 + $0x20] ss:$8 sps:$4 sm:$0xff]   ;;  %v1361_v23 = vunpack.c.h.bf16 %v144_v0  ;;  %v4135_v44 = vld [vmem:[#allocation9 + $0x34] ss:$8 sps:$4 sm:$0xff]  }
 0x1da   :  { %v1009_v63 = vmul.f32 0.2, %v977_v36  ;;  %v978_v25 = vadd.f32 %v4629_v52, %v939_v33  ;;  %3893 = vmatprep.mubr.bf16.mxu0 %v1057_v55  ;;  %v140_v52 = vld [vmem:[%s5539_s2 + $0x4] ss:$16 sps:$4 sm:$0xff]   ;;  %v4163_v33 = vld [vmem:[%s5547_s10 + $0x18] sm:$0xff]  }
 0x1db   :  { %v1357_v2 = vunpack.c.h.bf16 %v140_v52  ;;  %v1355_v62 = vunpack.c.l.bf16 %v140_v52 }
 0x1dc   :  { %v1010_v28 = vmul.f32 0.2, %v978_v25  ;;  %v1041_v31 = vmax.f32 %v977_v36, %v1009_v63  ;;  %v1362_v36 = vunpack.c.h.bf16 %v145_v58  ;;  %v1359_v63 = vunpack.c.l.bf16 %v144_v0 }
 0x1de   :  { %v1042_v61 = vmax.f32 %v978_v25, %v1010_v28  ;;  %v1360_v28 = vunpack.c.l.bf16 %v145_v58 }
 0x1e0   :  { %v1058_v39 = vpack.c.bf16 %v1042_v61, %v1041_v31 }
 0x1e2   :  { %3894 = vmatmul.mubr.bf16.gmra.mrb[76].mxu0 %v1058_v39  ;;  %v4133_v39 = vld [vmem:[#allocation9 + $0x30] ss:$8 sps:$4 sm:$0xff]  }
 0x245   :  { %v3867_v21 = vpop.f32.mrb[48].mxu0 }
 0x246   :  { %v1173_v35 = vadd.f32 %v3867_v21, %v4844_v32  ;;  %v1164_v38 = vpop.f32.mrb[49].mxu0 }
 0x247   :  { %v1165_v17 = vadd.f32 %v4844_v32, %v1164_v38  ;;  %v3868_v42 = vpop.f32.mrb[50].mxu0  ;;  %v4167_v38 = vld [vmem:[%s5547_s10 + $0x20] sm:$0xff]  }
 0x248   :  { %v1293_v24 = vmul.f32 0.2, %v1173_v35  ;;  %v1176_v22 = vadd.f32 %v3868_v42, %v4844_v32  ;;  %v1167_v27 = vpop.f32.mrb[51].mxu0 }
 0x249   :  { %v1291_v57 = vmul.f32 0.2, %v1165_v17  ;;  %v1168_v59 = vadd.f32 %v4844_v32, %v1167_v27  ;;  %v4171_v27 = vld [vmem:[%s5547_s10 + $0x28] sm:$0xff]  }
 0x24a   :  { %v1325_v50 = vmax.f32 %v1173_v35, %v1293_v24  ;;  %v1294_v51 = vmul.f32 0.2, %v1176_v22  ;;  %v4138_v35 = vld [vmem:[#allocation9 + $0x44] ss:$8 sps:$4 sm:$0xff]   ;;  %v4136_v24 = vld [vmem:[#allocation9 + $0x40] ss:$8 sps:$4 sm:$0xff]  }
 0x24b   :  { %v1323_v3 = vmax.f32 %v1165_v17, %v1291_v57  ;;  %v1292_v1 = vmul.f32 0.2, %v1168_v59 }
 0x24c   :  { %v1326_v54 = vmax.f32 %v1176_v22, %v1294_v51  ;;  %v1389_v49 = vadd.f32 %v1357_v2, %v1325_v50  ;;  %v4141_v22 = vld [vmem:[#allocation9 + $0x54] ss:$8 sps:$4 sm:$0xff]   ;;  %v4144_v51 = vld [vmem:[#allocation9 + $0x64] ss:$8 sps:$4 sm:$0xff]  }
 0x24d   :  { %v1324_v56 = vmax.f32 %v1168_v59, %v1292_v1  ;;  %v1387_v46 = vadd.f32 %v1355_v62, %v1323_v3  ;;  %v4139_v59 = vld [vmem:[#allocation9 + $0x50] ss:$8 sps:$4 sm:$0xff]   ;;  %v149_v62 = vld [vmem:[%s5539_s2 + $0x4c] ss:$16 sps:$4 sm:$0xff]  }
 0x24e   :  { %v1390_v19 = vadd.f32 %v1358_v9, %v1326_v54  ;;  %v148_v9 = vld [vmem:[%s5539_s2 + $0x44] ss:$16 sps:$4 sm:$0xff]  }
 0x24f   :  { %v1388_v29 = vadd.f32 %v1356_v10, %v1324_v56 }
 0x250   :  { %v1420_v6 = vpack.c.bf16 %v1390_v19, %v1389_v49 }
 0x251   :  { %v1419_v8 = vpack.c.bf16 %v1388_v29, %v1387_v46  ;;  %v4142_v46 = vld [vmem:[#allocation9 + $0x60] ss:$8 sps:$4 sm:$0xff]  }
 0x253   :  { %1645 = vmatmul.mubr.bf16.vlgmr.msra.gmra.mrb[80].mxu1 %v1419_v8  ;;  %3913 = vmatprep.mubr.bf16.mxu0 %v1419_v8  ;;  %v1366_v8 = vunpack.c.h.bf16 %v149_v62 }
 0x254   :  { %3914 = vmatmul.mubr.bf16.vlgmr.msra.gmra.mrb[80].mxu0 %v1420_v6  ;;  %1654 = vmatprep.mubr.bf16.mxu1 %v5564_v43 }
 0x255   :  { %v3871_v53 = vpop.f32.mrb[52].mxu0  ;;  %2707 = vmatpush1.bf16.msra.mxu1 %v4124_v12  ;;  %3946 = vmatpush3.bf16.msra.mxu0 %v4151_v45  ;;  %v1365_v45 = vunpack.c.h.bf16 %v148_v9  ;;  %v4147_v12 = vld [vmem:[#allocation9 + $0x74] ss:$8 sps:$4 sm:$0xff]  }
 0x256   :  { %v1189_v14 = vadd.f32 %v3871_v53, %v4844_v32  ;;  %v1180_v5 = vpop.f32.mrb[53].mxu0  ;;  %2708 = vmatprep.subr.bf16.mxu1 %v4129_v15  ;;  %3947 = vmatprep.subr.bf16.mxu0 %v4155_v34 }
 0x257   :  { %v1181_v37 = vadd.f32 %v4844_v32, %v1180_v5  ;;  %v3872_v18 = vpop.f32.mrb[54].mxu0 }
 0x258   :  { %v1297_v20 = vmul.f32 0.2, %v1189_v14  ;;  %v1192_v16 = vadd.f32 %v3872_v18, %v4844_v32  ;;  %v1183_v60 = vpop.f32.mrb[55].mxu0 }
 0x259   :  { %v1295_v13 = vmul.f32 0.2, %v1181_v37  ;;  %v1184_v48 = vadd.f32 %v4844_v32, %v1183_v60  ;;  %2709 = vmatpush1.bf16.msra.mxu1 %v4127_v11  ;;  %3948 = vmatpush3.bf16.msra.mxu0 %v4155_v34  ;;  %v1363_v34 = vunpack.c.l.bf16 %v148_v9  ;;  %v1364_v11 = vunpack.c.l.bf16 %v149_v62  ;;  %v4148_v60 = vld [vmem:[#allocation9 + $0x80] ss:$8 sps:$4 sm:$0xff]  }
 0x25a   :  { %v1329_v4 = vmax.f32 %v1189_v14, %v1297_v20  ;;  %v1298_v26 = vmul.f32 0.2, %v1192_v16  ;;  %2710 = vmatprep.subr.bf16.mxu1 %v4132_v7  ;;  %3949 = vmatprep.subr.bf16.mxu0 %v4159_v40  ;;  %v4145_v7 = vld [vmem:[#allocation9 + $0x70] ss:$8 sps:$4 sm:$0xff]  }
 0x25b   :  { %v1327_v55 = vmax.f32 %v1181_v37, %v1295_v13  ;;  %v1296_v25 = vmul.f32 0.2, %v1184_v48  ;;  %1655 = vmatmul.mubr.bf16.gmra.mrb[84].mxu1 %v1420_v6  ;;  %v4150_v37 = vld [vmem:[#allocation9 + $0x84] ss:$8 sps:$4 sm:$0xff]   ;;  %v4154_v13 = vld [vmem:[#allocation9 + $0x94] ss:$8 sps:$4 sm:$0xff]  }
 0x25c   :  { %v1330_v31 = vmax.f32 %v1192_v16, %v1298_v26  ;;  %1664 = vmatprep.mubr.bf16.mxu1 %v5564_v43  ;;  %v1393_v30 = vadd.f32 %v1361_v23, %v1329_v4  ;;  %v4158_v26 = vld [vmem:[#allocation9 + $0xa4] ss:$8 sps:$4 sm:$0xff]  }
 0x25d   :  { %v1328_v61 = vmax.f32 %v1184_v48, %v1296_v25  ;;  %2711 = vmatpush1.bf16.msra.mxu1 %v4130_v41  ;;  %3950 = vmatpush3.bf16.msra.mxu0 %v4159_v40  ;;  %v1391_v52 = vadd.f32 %v1359_v63, %v1327_v55  ;;  %v4152_v41 = vld [vmem:[#allocation9 + $0x90] ss:$8 sps:$4 sm:$0xff]  }
 0x25e   :  { %v1394_v21 = vadd.f32 %v1362_v36, %v1330_v31  ;;  %2712 = vmatprep.subr.bf16.mxu1 %v4135_v44  ;;  %3951 = vmatprep.subr.bf16.mxu0 %v4163_v33  ;;  %v152_v36 = vld [vmem:[%s5539_s2 + $0x64] ss:$16 sps:$4 sm:$0xff]  }
 0x25f   :  { %v1392_v17 = vadd.f32 %v1360_v28, %v1328_v61 }
 0x260   :  { %v1422_v47 = vpack.c.bf16 %v1394_v21, %v1393_v30  ;;  %v1369_v21 = vunpack.c.h.bf16 %v152_v36 }
 0x261   :  { %v1421_v42 = vpack.c.bf16 %v1392_v17, %v1391_v52  ;;  %2713 = vmatpush1.bf16.msra.mxu1 %v4133_v39  ;;  %3952 = vmatpush3.bf16.msra.mxu0 %v4163_v33  ;;  %v153_v33 = vld [vmem:[%s5539_s2 + $0x6c] ss:$16 sps:$4 sm:$0xff]   ;;  %v4156_v39 = vld [vmem:[#allocation9 + $0xa0] ss:$8 sps:$4 sm:$0xff]  }
 0x262   :  { %2714 = vmatprep.subr.bf16.mxu1 %v4138_v35  ;;  %3953 = vmatprep.subr.bf16.mxu0 %v4167_v38  ;;  %v4162_v52 = vld [vmem:[#allocation9 + $0xb4] ss:$8 sps:$4 sm:$0xff]  }
 0x263   :  { %1665 = vmatmul.mubr.bf16.gmra.mrb[88].mxu1 %v1421_v42  ;;  %3917 = vmatprep.mubr.bf16.mxu0 %v1421_v42 }
 0x264   :  { %3918 = vmatmul.mubr.bf16.gmra.mrb[84].mxu0 %v1422_v47  ;;  %1674 = vmatprep.mubr.bf16.mxu1 %v5564_v43 }
 0x265   :  { %v3875_v57 = vpop.f32.mrb[56].mxu0  ;;  %2715 = vmatpush1.bf16.msra.mxu1 %v4136_v24  ;;  %3954 = vmatpush3.bf16.msra.mxu0 %v4167_v38  ;;  %v1370_v38 = vunpack.c.h.bf16 %v153_v33  ;;  %v1368_v24 = vunpack.c.l.bf16 %v153_v33 }
 0x266   :  { %v1205_v50 = vadd.f32 %v3875_v57, %v4844_v32  ;;  %v1196_v2 = vpop.f32.mrb[57].mxu0  ;;  %2716 = vmatprep.subr.bf16.mxu1 %v4141_v22  ;;  %3955 = vmatprep.subr.bf16.mxu0 %v4171_v27  ;;  %v4160_v57 = vld [vmem:[#allocation9 + $0xb0] ss:$8 sps:$4 sm:$0xff]  }
 0x267   :  { %v1197_v3 = vadd.f32 %v4844_v32, %v1196_v2  ;;  %v3876_v1 = vpop.f32.mrb[58].mxu0  ;;  %v4166_v2 = vld [vmem:[#allocation9 + $0xc4] ss:$8 sps:$4 sm:$0xff]  }
 0x268   :  { %v1301_v10 = vmul.f32 0.2, %v1205_v50  ;;  %v1208_v54 = vadd.f32 %v3876_v1, %v4844_v32  ;;  %v1199_v56 = vpop.f32.mrb[59].mxu0  ;;  %v4164_v1 = vld [vmem:[#allocation9 + $0xc0] ss:$8 sps:$4 sm:$0xff]  }
 0x269   :  { %v1299_v49 = vmul.f32 0.2, %v1197_v3  ;;  %v1200_v19 = vadd.f32 %v4844_v32, %v1199_v56  ;;  %2717 = vmatpush1.bf16.msra.mxu1 %v4139_v59  ;;  %3956 = vmatpush3.bf16.msra.mxu0 %v4171_v27  ;;  %v4168_v56 = vld [vmem:[#allocation9 + $0xd0] ss:$8 sps:$4 sm:$0xff]  }
 0x26a   :  { %v1333_v29 = vmax.f32 %v1205_v50, %v1301_v10  ;;  %v1302_v6 = vmul.f32 0.2, %v1208_v54  ;;  %2718 = vmatprep.subr.bf16.mxu1 %v4144_v51  ;;  %v4170_v10 = vld [vmem:[#allocation9 + $0xd4] ss:$8 sps:$4 sm:$0xff]  }
 0x26b   :  { %v1331_v15 = vmax.f32 %v1197_v3, %v1299_v49  ;;  %v1300_v53 = vmul.f32 0.2, %v1200_v19  ;;  %1675 = vmatmul.mubr.bf16.gmra.mrb[92].mxu1 %v1422_v47  ;;  %v1367_v47 = vunpack.c.l.bf16 %v152_v36 }
 0x26c   :  { %v1334_v14 = vmax.f32 %v1208_v54, %v1302_v6  ;;  %1684 = vmatprep.mubr.bf16.mxu1 %v5564_v43  ;;  %v1397_v40 = vadd.f32 %v1365_v45, %v1333_v29  ;;  %v156_v29 = vld [vmem:[%s5539_s2 + $0x84] ss:$16 sps:$4 sm:$0xff]   ;;  %v157_v6 = vld [vmem:[%s5539_s2 + $0x8c] ss:$16 sps:$4 sm:$0xff]  }
 0x26d   :  { %v1332_v5 = vmax.f32 %v1200_v19, %v1300_v53  ;;  %2719 = vmatpush1.bf16.msra.mxu1 %v4142_v46  ;;  %v1395_v58 = vadd.f32 %v1363_v34, %v1331_v15  ;;  %v4174_v46 = vld [vmem:[#allocation9 + $0xe4] ss:$8 sps:$4 sm:$0xff]  }
 0x26e   :  { %v1398_v0 = vadd.f32 %v1366_v8, %v1334_v14  ;;  %2720 = vmatprep.subr.bf16.mxu1 %v4147_v12  ;;  %v4172_v14 = vld [vmem:[#allocation9 + $0xe0] ss:$8 sps:$4 sm:$0xff]  }
 0x26f   :  { %v1396_v18 = vadd.f32 %v1364_v11, %v1332_v5 }
 0x270   :  { %v1424_v20 = vpack.c.bf16 %v1398_v0, %v1397_v40  ;;  %v1374_v0 = vunpack.c.h.bf16 %v157_v6 }
 0x271   :  { %v1423_v16 = vpack.c.bf16 %v1396_v18, %v1395_v58  ;;  %2721 = vmatpush1.bf16.msra.mxu1 %v4145_v7  ;;  %v1373_v7 = vunpack.c.h.bf16 %v156_v29  ;;  %v1371_v58 = vunpack.c.l.bf16 %v156_v29 }
 0x272   :  { %2722 = vmatprep.subr.bf16.mxu1 %v4150_v37 }
 0x273   :  { %1685 = vmatmul.mubr.bf16.gmra.mrb[96].mxu1 %v1423_v16  ;;  %3921 = vmatprep.mubr.bf16.mxu0 %v1423_v16 }
 0x274   :  { %3922 = vmatmul.mubr.bf16.gmra.mrb[88].mxu0 %v1424_v20  ;;  %1694 = vmatprep.mubr.bf16.mxu1 %v5564_v43 }
 0x275   :  { %v3879_v48 = vpop.f32.mrb[60].mxu0  ;;  %2723 = vmatpush1.bf16.msra.mxu1 %v4148_v60 }
 0x276   :  { %v1221_v4 = vadd.f32 %v3879_v48, %v4844_v32  ;;  %v1212_v23 = vpop.f32.mrb[61].mxu0  ;;  %2724 = vmatprep.subr.bf16.mxu1 %v4154_v13 }
 0x277   :  { %v1213_v44 = vadd.f32 %v4844_v32, %v1212_v23  ;;  %v3880_v55 = vpop.f32.mrb[62].mxu0 }
 0x278   :  { %v1305_v63 = vmul.f32 0.2, %v1221_v4  ;;  %v1224_v25 = vadd.f32 %v3880_v55, %v4844_v32  ;;  %v1215_v28 = vpop.f32.mrb[63].mxu0  ;;  %v160_v55 = vld [vmem:[%s5539_s2 + $0xa4] ss:$16 sps:$4 sm:$0xff]  }
 0x279   :  { %v1303_v31 = vmul.f32 0.2, %v1213_v44  ;;  %v1216_v61 = vadd.f32 %v4844_v32, %v1215_v28  ;;  %2725 = vmatpush1.bf16.msra.mxu1 %v4152_v41 }
 0x27a   :  { %v1337_v30 = vmax.f32 %v1221_v4, %v1305_v63  ;;  %v1306_v35 = vmul.f32 0.2, %v1224_v25  ;;  %2726 = vmatprep.subr.bf16.mxu1 %v4158_v26 }
 0x27b   :  { %v1335_v17 = vmax.f32 %v1213_v44, %v1303_v31  ;;  %v1304_v42 = vmul.f32 0.2, %v1216_v61  ;;  %1695 = vmatmul.mubr.bf16.gmra.mrb[100].mxu1 %v1424_v20  ;;  %v1372_v20 = vunpack.c.l.bf16 %v157_v6 }
 0x27c   :  { %v1338_v22 = vmax.f32 %v1224_v25, %v1306_v35  ;;  %1704 = vmatprep.mubr.bf16.mxu1 %v5564_v43  ;;  %v1401_v59 = vadd.f32 %v1369_v21, %v1337_v30  ;;  %v161_v25 = vld [vmem:[%s5539_s2 + $0xac] ss:$16 sps:$4 sm:$0xff]  }
 0x27d   :  { %v1336_v27 = vmax.f32 %v1216_v61, %v1304_v42  ;;  %2727 = vmatpush1.bf16.msra.mxu1 %v4156_v39  ;;  %v1399_v51 = vadd.f32 %v1367_v47, %v1335_v17  ;;  %v1378_v17 = vunpack.c.h.bf16 %v161_v25  ;;  %v1375_v42 = vunpack.c.l.bf16 %v160_v55 }
 0x27e   :  { %v1402_v50 = vadd.f32 %v1370_v38, %v1338_v22  ;;  %2728 = vmatprep.subr.bf16.mxu1 %v4162_v52  ;;  %v1377_v38 = vunpack.c.h.bf16 %v160_v55  ;;  %v1376_v22 = vunpack.c.l.bf16 %v161_v25  ;;  %v169_v55 = vld [vmem:[%s5539_s2 + $0xec] ss:$16 sps:$4 sm:$0xff]  }
 0x27f   :  { %v1400_v9 = vadd.f32 %v1368_v24, %v1336_v27 }
 0x280   :  { %v1426_v3 = vpack.c.bf16 %v1402_v50, %v1401_v59 }
 0x281   :  { %v1425_v62 = vpack.c.bf16 %v1400_v9, %v1399_v51  ;;  %2729 = vmatpush1.bf16.msra.mxu1 %v4160_v57 }
 0x282   :  { %2730 = vmatprep.subr.bf16.mxu1 %v4166_v2 }
 0x283   :  { %1705 = vmatmul.mubr.bf16.gmra.mrb[104].mxu1 %v1425_v62  ;;  %3925 = vmatprep.mubr.bf16.mxu0 %v1425_v62 }
 0x284   :  { %3926 = vmatmul.mubr.bf16.gmra.mrb[92].mxu0 %v1426_v3  ;;  %1714 = vmatprep.mubr.bf16.mxu1 %v5564_v43 }
 0x285   :  { %v3883_v54 = vpop.f32.mrb[64].mxu0  ;;  %2731 = vmatpush1.bf16.msra.mxu1 %v4164_v1 }
 0x286   :  { %v1237_v49 = vadd.f32 %v3883_v54, %v4844_v32  ;;  %v1228_v19 = vpop.f32.mrb[65].mxu0  ;;  %2732 = vmatprep.subr.bf16.mxu1 %v4170_v10  ;;  %v164_v54 = vld [vmem:[%s5539_s2 + $0xc4] ss:$16 sps:$4 sm:$0xff]  }
 0x287   :  { %v1229_v45 = vadd.f32 %v4844_v32, %v1228_v19  ;;  %v3884_v8 = vpop.f32.mrb[66].mxu0 }
 0x288   :  { %v1309_v12 = vmul.f32 0.2, %v1237_v49  ;;  %v1240_v15 = vadd.f32 %v3884_v8, %v4844_v32  ;;  %v1231_v34 = vpop.f32.mrb[67].mxu0 }
 0x289   :  { %v1307_v53 = vmul.f32 0.2, %v1229_v45  ;;  %v1232_v11 = vadd.f32 %v4844_v32, %v1231_v34  ;;  %2733 = vmatpush1.bf16.msra.mxu1 %v4168_v56 }
 0x28a   :  { %v1341_v5 = vmax.f32 %v1237_v49, %v1309_v12  ;;  %v1310_v40 = vmul.f32 0.2, %v1240_v15  ;;  %2734 = vmatprep.subr.bf16.mxu1 %v4174_v46  ;;  %v165_v49 = vld [vmem:[%s5539_s2 + $0xcc] ss:$16 sps:$4 sm:$0xff]  }
 0x28b   :  { %v1339_v37 = vmax.f32 %v1229_v45, %v1307_v53  ;;  %v1308_v18 = vmul.f32 0.2, %v1232_v11  ;;  %1715 = vmatmul.mubr.bf16.gmra.mrb[108].mxu1 %v1426_v3  ;;  %v1382_v53 = vunpack.c.h.bf16 %v165_v49 }
 0x28c   :  { %v1342_v16 = vmax.f32 %v1240_v15, %v1310_v40  ;;  %1724 = vmatprep.mubr.bf16.mxu1 %v5564_v43  ;;  %v1405_v13 = vadd.f32 %v1373_v7, %v1341_v5  ;;  %v1381_v15 = vunpack.c.h.bf16 %v164_v54  ;;  %v1380_v7 = vunpack.c.l.bf16 %v165_v49 }
 0x28d   :  { %v1340_v60 = vmax.f32 %v1232_v11, %v1308_v18  ;;  %2735 = vmatpush1.bf16.msra.mxu1 %v4172_v14  ;;  %v1403_v41 = vadd.f32 %v1371_v58, %v1339_v37  ;;  %v1379_v14 = vunpack.c.l.bf16 %v164_v54  ;;  %v4178_v18 = vld [vmem:[#allocation9 + $0xf4] ss:$8 sps:$4 sm:$0xff]  }
 0x28e   :  { %v1406_v48 = vadd.f32 %v1374_v0, %v1342_v16  ;;  %2736 = vmatprep.subr.bf16.mxu1 %v4178_v18 }
 0x28f   :  { %v1404_v4 = vadd.f32 %v1372_v20, %v1340_v60  ;;  %v4175_v60 = vld [vmem:[%s5547_s10 + $0x30] sm:$0xff]  }
 0x290   :  { %v1428_v23 = vpack.c.bf16 %v1406_v48, %v1405_v13  ;;  %v4176_v13 = vld [vmem:[#allocation9 + $0xf0] ss:$8 sps:$4 sm:$0xff]   ;;  %3957 = vmatprep.subr.bf16.mxu0 %v4175_v60 }
 0x291   :  { %v1427_v26 = vpack.c.bf16 %v1404_v4, %v1403_v41  ;;  %2737 = vmatpush1.bf16.msra.mxu1 %v4176_v13  ;;  %3958 = vmatpush3.bf16.msra.mxu0 %v4175_v60  ;;  %v4179_v4 = vld [vmem:[%s5547_s10 + $0x38] sm:$0xff]   ;;  %v4180_v13 = vld [vmem:[%s5551_s14 + $0x40] sm:$0xff]  }
 0x292   :  { %3959 = vmatprep.subr.bf16.mxu0 %v4179_v4 }
 0x293   :  { %1725 = vmatmul.mubr.bf16.gmra.mrb[112].mxu1 %v1427_v26  ;;  %3929 = vmatprep.mubr.bf16.mxu0 %v1427_v26 }
 0x294   :  { %3930 = vmatmul.mubr.bf16.gmra.mrb[96].mxu0 %v1428_v23  ;;  %1734 = vmatprep.mubr.bf16.mxu1 %v5564_v43 }
 0x295   :  { %v3887_v36 = vpop.f32.mrb[68].mxu0  ;;  %3960 = vmatpush3.bf16.msra.mxu0 %v4179_v4 }
 0x296   :  { %v1253_v44 = vadd.f32 %v3887_v36, %v4844_v32  ;;  %v1244_v33 = vpop.f32.mrb[69].mxu0  ;;  %3737 = vmatprep.subr.bf16.mxu0 %v4180_v13 }
 0x297   :  { %v1245_v63 = vadd.f32 %v4844_v32, %v1244_v33  ;;  %v3888_v28 = vpop.f32.mrb[70].mxu0 }
 0x298   :  { %v1313_v31 = vmul.f32 0.2, %v1253_v44  ;;  %v1256_v61 = vadd.f32 %v3888_v28, %v4844_v32  ;;  %v1247_v39 = vpop.f32.mrb[71].mxu0 }
 0x299   :  { %v1311_v30 = vmul.f32 0.2, %v1245_v63  ;;  %v1248_v21 = vadd.f32 %v4844_v32, %v1247_v39 }
 0x29a   :  { %v1345_v35 = vmax.f32 %v1253_v44, %v1313_v31  ;;  %v1314_v52 = vmul.f32 0.2, %v1256_v61  ;;  %v168_v44 = vld [vmem:[%s5539_s2 + $0xe4] ss:$16 sps:$4 sm:$0xff]  }
 0x29b   :  { %v1343_v47 = vmax.f32 %v1245_v63, %v1311_v30  ;;  %v1312_v24 = vmul.f32 0.2, %v1248_v21  ;;  %1735 = vmatmul.mubr.bf16.gmra.mrb[116].mxu1 %v1428_v23 }
 0x29c   :  { %v1346_v27 = vmax.f32 %v1256_v61, %v1314_v52  ;;  %1744 = vmatprep.mubr.bf16.mxu1 %v5564_v43  ;;  %v1409_v59 = vadd.f32 %v1377_v38, %v1345_v35  ;;  %v1386_v38 = vunpack.c.h.bf16 %v169_v55 }
 0x29d   :  { %v1344_v57 = vmax.f32 %v1248_v21, %v1312_v24  ;;  %v1407_v2 = vadd.f32 %v1375_v42, %v1343_v47  ;;  %v1385_v21 = vunpack.c.h.bf16 %v168_v44  ;;  %v1384_v42 = vunpack.c.l.bf16 %v169_v55 }
 0x29e   :  { %v1410_v50 = vadd.f32 %v1378_v17, %v1346_v27  ;;  %v1383_v17 = vunpack.c.l.bf16 %v168_v44 }
 0x29f   :  { %v1408_v51 = vadd.f32 %v1376_v22, %v1344_v57 }
 0x2a0   :  { %v1430_v9 = vpack.c.bf16 %v1410_v50, %v1409_v59 }
 0x2a1   :  { %v1429_v3 = vpack.c.bf16 %v1408_v51, %v1407_v2 }
 0x2a3   :  { %1745 = vmatmul.mubr.bf16.gmra.mrb[120].mxu1 %v1429_v3  ;;  %3933 = vmatprep.mubr.bf16.mxu0 %v1429_v3 }
 0x2a4   :  { %3934 = vmatmul.mubr.bf16.gmra.mrb[100].mxu0 %v1430_v9  ;;  %1754 = vmatprep.mubr.bf16.mxu1 %v5564_v43 }
 0x2a5   :  { %v3891_v62 = vpop.f32.mrb[72].mxu0 }
 0x2a6   :  { %v1269_v1 = vadd.f32 %v3891_v62, %v4844_v32  ;;  %v1260_v10 = vpop.f32.mrb[73].mxu0  ;;  %v1467_v62 = vld [vmem:[%s5546_s9] sm:$0x7] }
 0x2a7   :  { %v1261_v56 = vadd.f32 %v4844_v32, %v1260_v10  ;;  %v3892_v19 = vpop.f32.mrb[74].mxu0 }
 0x2a8   :  { %v1317_v46 = vmul.f32 0.2, %v1269_v1  ;;  %v1272_v29 = vadd.f32 %v3892_v19, %v4844_v32  ;;  %v1263_v45 = vpop.f32.mrb[75].mxu0 }
 0x2a9   :  { %v1315_v6 = vmul.f32 0.2, %v1261_v56  ;;  %v1264_v8 = vadd.f32 %v4844_v32, %v1263_v45 }
 0x2aa   :  { %v1349_v12 = vmax.f32 %v1269_v1, %v1317_v46  ;;  %v1318_v34 = vmul.f32 0.2, %v1272_v29 }
 0x2ab   :  { %v1347_v11 = vmax.f32 %v1261_v56, %v1315_v6  ;;  %v1316_v5 = vmul.f32 0.2, %v1264_v8  ;;  %1755 = vmatmul.mubr.bf16.gmra.mrb[124].mxu1 %v1430_v9 }
 0x2ac   :  { %v1350_v40 = vmax.f32 %v1272_v29, %v1318_v34  ;;  %1764 = vmatprep.mubr.bf16.mxu1 %v5564_v43  ;;  %v1413_v37 = vadd.f32 %v1381_v15, %v1349_v12 }
 0x2ad   :  { %v1348_v0 = vmax.f32 %v1264_v8, %v1316_v5  ;;  %v1411_v20 = vadd.f32 %v1379_v14, %v1347_v11 }
 0x2ae   :  { %v1414_v58 = vadd.f32 %v1382_v53, %v1350_v40 }
 0x2af   :  { %v1412_v16 = vadd.f32 %v1380_v7, %v1348_v0 }
 0x2b0   :  { %v1432_v48 = vpack.c.bf16 %v1414_v58, %v1413_v37 }
 0x2b1   :  { %v1431_v41 = vpack.c.bf16 %v1412_v16, %v1411_v20 }
 0x2b3   :  { %1765 = vmatmul.mubr.bf16.gmra.mrb[128].mxu1 %v1431_v41  ;;  %3937 = vmatprep.mubr.bf16.mxu0 %v1431_v41 }
 0x2b4   :  { %3938 = vmatmul.mubr.bf16.gmra.mrb[104].mxu0 %v1432_v48  ;;  %1774 = vmatprep.mubr.bf16.mxu1 %v5564_v43 }
 0x2b5   :  { %v3895_v23 = vpop.f32.mrb[76].mxu0 }
 0x2b6   :  { %v1285_v26 = vadd.f32 %v3895_v23, %v4844_v32  ;;  %v1276_v36 = vpop.f32.mrb[77].mxu0 }
 0x2b7   :  { %v1277_v33 = vadd.f32 %v4844_v32, %v1276_v36  ;;  %v3896_v63 = vpop.f32.mrb[78].mxu0 }
 0x2b8   :  { %v1321_v25 = vmul.f32 0.2, %v1285_v26  ;;  %v1288_v28 = vadd.f32 %v3896_v63, %v4844_v32  ;;  %v1279_v31 = vpop.f32.mrb[79].mxu0 }
 0x2b9   :  { %v1319_v61 = vmul.f32 0.2, %v1277_v33  ;;  %v1280_v39 = vadd.f32 %v4844_v32, %v1279_v31  ;;  %v1469_v32 = vlaneseq }
 0x2ba   :  { %v1353_v30 = vmax.f32 %v1285_v26, %v1321_v25  ;;  %v1322_v35 = vmul.f32 0.2, %v1288_v28 }
 0x2bb   :  { %v1351_v52 = vmax.f32 %v1277_v33, %v1319_v61  ;;  %v1320_v47 = vmul.f32 0.2, %v1280_v39  ;;  %1775 = vmatmul.mubr.bf16.gmra.mrb[132].mxu1 %v1432_v48  ;;  %v4965_v9 = vshrl.u32 %v1469_v32, 7 }
 0x2bc   :  { %v1354_v24 = vmax.f32 %v1288_v28, %v1322_v35  ;;  %1784 = vmatprep.mubr.bf16.mxu1 %v5564_v43  ;;  %v1417_v27 = vadd.f32 %v1385_v21, %v1353_v30 }
 0x2bd   :  { %v1352_v22 = vmax.f32 %v1280_v39, %v1320_v47  ;;  %v1415_v59 = vadd.f32 %v1383_v17, %v1351_v52  ;;  %v1471_v3 = vsub.s32 0, %v4965_v9  ;;  %v1475_v1 = vsub.s32 1, %v4965_v9 }
 0x2be   :  { %v1418_v57 = vadd.f32 %v1386_v38, %v1354_v24  ;;  %v1479_v10 = vsub.s32 2, %v4965_v9 }
 0x2bf   :  { %v1416_v50 = vadd.f32 %v1384_v42, %v1352_v22  ;;  %v4975_v54 = vrot.slane %v1467_v62, %v1471_v3 }
 0x2c0   :  { %v1434_v2 = vpack.c.bf16 %v1418_v57, %v1417_v27  ;;  %v4981_v56 = vrot.slane %v1467_v62, %v1479_v10 }
 0x2c1   :  { %v1433_v51 = vpack.c.bf16 %v1416_v50, %v1415_v59 }
 0x2c3   :  { %1785 = vmatmul.mubr.bf16.gmra.mrb[136].mxu1 %v1433_v51  ;;  %3941 = vmatprep.mubr.bf16.mxu0 %v1433_v51  ;;  %v4181_v51 = vld [vmem:[%s5551_s14] sm:$0xff]  }
 0x2c4   :  { %3942 = vmatmul.mubr.bf16.gmra.mrb[108].mxu0 %v1434_v2  ;;  %1794 = vmatprep.mubr.bf16.mxu1 %v5564_v43  ;;  %v4979_v43 = vrot.slane %v1467_v62, %v1475_v1 }
 0x2cb   :  { %1795 = vmatmul.mubr.bf16.gmra.mrb[140].mxu1 %v1434_v2 }
 0x326   :  { %v1646_v49 = vpop.f32.mrb[80].mxu1 }
 0x327   :  { %v1647_v19 = vadd.f32 %v1646_v49, %v4975_v54  ;;  %v1648_v46 = vpop.f32.mrb[81].mxu1  ;;  %v3915_v29 = vpop.f32.mrb[80].mxu0 }
 0x328   :  { %v1649_v45 = vadd.f32 %v1648_v46, %v4979_v43  ;;  %v1848_v6 = vadd.f32 %v3915_v29, %v4981_v56  ;;  %v1650_v8 = vpop.f32.mrb[82].mxu1  ;;  %v1839_v12 = vpop.f32.mrb[81].mxu0 }
 0x329   :  { %v1966_v15 = vmul.f32 0.2, %v1647_v19  ;;  %v1651_v34 = vadd.f32 %v1650_v8, %v4975_v54  ;;  %v1840_v53 = vadd.f32 %v1839_v12, %v4981_v56  ;;  %v1652_v11 = vpop.f32.mrb[83].mxu1  ;;  %v3916_v14 = vpop.f32.mrb[82].mxu0 }
 0x32a   :  { %v1967_v5 = vmul.f32 0.2, %v1649_v45  ;;  %v1974_v7 = vmul.f32 0.2, %v1848_v6  ;;  %v1653_v40 = vadd.f32 %v1652_v11, %v4979_v43  ;;  %v1851_v0 = vadd.f32 %v3916_v14, %v4981_v56  ;;  %v1842_v37 = vpop.f32.mrb[83].mxu0 }
 0x32b   :  { %v1969_v58 = vmul.f32 0.2, %v1651_v34  ;;  %v1968_v18 = vmul.f32 0.2, %v1840_v53  ;;  %v1843_v20 = vadd.f32 %v1842_v37, %v4981_v56  ;;  %v2062_v48 = vmax.f32 %v1647_v19, %v1966_v15  ;;  %v4182_v19 = vld [vmem:[%s5551_s14 + $0x48] sm:$0xff]  }
 0x32c   :  { %v1970_v16 = vmul.f32 0.2, %v1653_v40  ;;  %v1977_v60 = vmul.f32 0.2, %v1851_v0  ;;  %v2063_v23 = vmax.f32 %v1649_v45, %v1967_v5  ;;  %v2070_v26 = vmax.f32 %v1848_v6, %v1974_v7  ;;  %v4183_v37 = vld [vmem:[%s5551_s14 + $0x8] sm:$0xff]  }
 0x32d   :  { %v2065_v41 = vmax.f32 %v1651_v34, %v1969_v58  ;;  %v1971_v4 = vmul.f32 0.2, %v1843_v20  ;;  %v2064_v55 = vmax.f32 %v1840_v53, %v1968_v18 }
 0x32e   :  { %v2066_v36 = vmax.f32 %v1653_v40, %v1970_v16  ;;  %v2073_v44 = vmax.f32 %v1851_v0, %v1977_v60  ;;  %v1656_v33 = vpop.f32.mrb[84].mxu1  ;;  %v4184_v16 = vld [vmem:[%s5551_s14 + $0x50] sm:$0xff]  }
 0x32f   :  { %v2067_v63 = vmax.f32 %v1843_v20, %v1971_v4  ;;  %v1657_v25 = vadd.f32 %v1656_v33, %v4975_v54  ;;  %v1658_v28 = vpop.f32.mrb[85].mxu1  ;;  %v2158_v31 = vpack.c.bf16 %v2065_v41, %v2062_v48 }
 0x330   :  { %v2159_v61 = vpack.c.bf16 %v2066_v36, %v2063_v23  ;;  %v1659_v39 = vadd.f32 %v1658_v28, %v4979_v43  ;;  %v1660_v30 = vpop.f32.mrb[86].mxu1  ;;  %v2163_v21 = vpack.c.bf16 %v2073_v44, %v2070_v26 }
 0x331   :  { %v1972_v35 = vmul.f32 0.2, %v1657_v25  ;;  %v1661_v38 = vadd.f32 %v1660_v30, %v4975_v54  ;;  %v1662_v52 = vpop.f32.mrb[87].mxu1  ;;  %3961 = vmatprep.mubr.bf16.mxu0 %v2158_v31  ;;  %v2160_v17 = vpack.c.bf16 %v2067_v63, %v2064_v55  ;;  %v4185_v55 = vld [vmem:[%s5551_s14 + $0x10] sm:$0xff]  }
 0x332   :  { %v1973_v47 = vmul.f32 0.2, %v1659_v39  ;;  %v1663_v42 = vadd.f32 %v1662_v52, %v4979_v43 }
 0x333   :  { %v1975_v24 = vmul.f32 0.2, %v1661_v38  ;;  %2738 = vmatprep.mubr.bf16.mxu1 %v2160_v17  ;;  %v2068_v27 = vmax.f32 %v1657_v25, %v1972_v35 }
 0x334   :  { %v1976_v22 = vmul.f32 0.2, %v1663_v42  ;;  %2739 = vmatmul.mubr.bf16.vlgmr.msra.gmra.mrb[144].mxu1 %v2159_v61  ;;  %v2069_v59 = vmax.f32 %v1659_v39, %v1973_v47  ;;  %v4186_v39 = vld [vmem:[%s5551_s14 + $0x58] sm:$0xff]  }
 0x335   :  { %v2071_v57 = vmax.f32 %v1661_v38, %v1975_v24  ;;  %2748 = vmatprep.mubr.bf16.mxu1 %v2163_v21 }
 0x336   :  { %v2072_v50 = vmax.f32 %v1663_v42, %v1976_v22  ;;  %v1666_v2 = vpop.f32.mrb[88].mxu1 }
 0x337   :  { %v2161_v32 = vpack.c.bf16 %v2071_v57, %v2068_v27  ;;  %v1667_v62 = vadd.f32 %v1666_v2, %v4975_v54  ;;  %v1668_v10 = vpop.f32.mrb[89].mxu1  ;;  %v3919_v49 = vpop.f32.mrb[84].mxu0  ;;  %v4187_v27 = vld [vmem:[%s5551_s14 + $0x18] sm:$0xff]  }
 0x338   :  { %v1669_v46 = vadd.f32 %v1668_v10, %v4979_v43  ;;  %v1864_v29 = vadd.f32 %v3919_v49, %v4981_v56  ;;  %v1670_v45 = vpop.f32.mrb[90].mxu1  ;;  %v1855_v6 = vpop.f32.mrb[85].mxu0  ;;  %v2162_v8 = vpack.c.bf16 %v2072_v50, %v2069_v59  ;;  %v4188_v59 = vld [vmem:[%s5551_s14 + $0x60] sm:$0xff]  }
 0x339   :  { %v1978_v12 = vmul.f32 0.2, %v1667_v62  ;;  %v1671_v15 = vadd.f32 %v1670_v45, %v4975_v54  ;;  %v1856_v34 = vadd.f32 %v1855_v6, %v4981_v56  ;;  %v1672_v53 = vpop.f32.mrb[91].mxu1  ;;  %v3920_v11 = vpop.f32.mrb[86].mxu0  ;;  %3962 = vmatmul.mubr.bf16.vlgmr.msra.gmra.mrb[112].mxu0 %v2161_v32  ;;  %v4189_v49 = vld [vmem:[%s5551_s14 + $0x20] sm:$0xff]   ;;  %v4190_v6 = vld [vmem:[%s5551_s14 + $0x68] sm:$0xff]  }
 0x33a   :  { %v1979_v14 = vmul.f32 0.2, %v1669_v46  ;;  %v1986_v5 = vmul.f32 0.2, %v1864_v29  ;;  %v1673_v7 = vadd.f32 %v1672_v53, %v4979_v43  ;;  %v1867_v40 = vadd.f32 %v3920_v11, %v4981_v56  ;;  %v1858_v0 = vpop.f32.mrb[87].mxu0  ;;  %3738 = vmatpush3.bf16.msra.mxu0 %v4181_v51 }
 0x33b   :  { %v1981_v58 = vmul.f32 0.2, %v1671_v15  ;;  %v1980_v18 = vmul.f32 0.2, %v1856_v34  ;;  %v1859_v20 = vadd.f32 %v1858_v0, %v4981_v56  ;;  %3739 = vmatprep.subr.bf16.mxu0 %v4182_v19  ;;  %v2074_v48 = vmax.f32 %v1667_v62, %v1978_v12 }
 0x33c   :  { %v1982_v60 = vmul.f32 0.2, %v1673_v7  ;;  %v1989_v13 = vmul.f32 0.2, %v1867_v40  ;;  %2749 = vmatmul.mubr.bf16.gmra.mrb[148].mxu1 %v2162_v8  ;;  %v2075_v23 = vmax.f32 %v1669_v46, %v1979_v14  ;;  %v2082_v26 = vmax.f32 %v1864_v29, %v1986_v5 }
 0x33d   :  { %v2077_v41 = vmax.f32 %v1671_v15, %v1981_v58  ;;  %v1983_v4 = vmul.f32 0.2, %v1859_v20  ;;  %v2076_v63 = vmax.f32 %v1856_v34, %v1980_v18 }
 0x33e   :  { %v2078_v36 = vmax.f32 %v1673_v7, %v1982_v60  ;;  %v2085_v44 = vmax.f32 %v1867_v40, %v1989_v13  ;;  %v1676_v33 = vpop.f32.mrb[92].mxu1  ;;  %3740 = vmatpush3.bf16.msra.mxu0 %v4183_v37 }
 0x33f   :  { %v2079_v25 = vmax.f32 %v1859_v20, %v1983_v4  ;;  %v1677_v28 = vadd.f32 %v1676_v33, %v4975_v54  ;;  %v1678_v31 = vpop.f32.mrb[93].mxu1  ;;  %v2164_v61 = vpack.c.bf16 %v2077_v41, %v2074_v48  ;;  %3741 = vmatprep.subr.bf16.mxu0 %v4184_v16  ;;  %v4191_v16 = vld [vmem:[%s5551_s14 + $0x28] sm:$0xff]  }
 0x340   :  { %v1679_v30 = vadd.f32 %v1678_v31, %v4979_v43  ;;  %v1680_v21 = vpop.f32.mrb[94].mxu1  ;;  %v2165_v35 = vpack.c.bf16 %v2078_v36, %v2075_v23  ;;  %v2169_v38 = vpack.c.bf16 %v2085_v44, %v2082_v26 }
 0x341   :  { %v1984_v52 = vmul.f32 0.2, %v1677_v28  ;;  %v1681_v17 = vadd.f32 %v1680_v21, %v4975_v54  ;;  %v1682_v47 = vpop.f32.mrb[95].mxu1  ;;  %3965 = vmatprep.mubr.bf16.mxu0 %v2164_v61  ;;  %v2166_v42 = vpack.c.bf16 %v2079_v25, %v2076_v63 }
 0x342   :  { %v1985_v24 = vmul.f32 0.2, %v1679_v30  ;;  %v1683_v22 = vadd.f32 %v1682_v47, %v4979_v43  ;;  %3742 = vmatpush3.bf16.msra.mxu0 %v4185_v55 }
 0x343   :  { %v1987_v57 = vmul.f32 0.2, %v1681_v17  ;;  %2758 = vmatprep.mubr.bf16.mxu1 %v2166_v42  ;;  %3743 = vmatprep.subr.bf16.mxu0 %v4186_v39  ;;  %v2080_v2 = vmax.f32 %v1677_v28, %v1984_v52 }
 0x344   :  { %v1988_v50 = vmul.f32 0.2, %v1683_v22  ;;  %2759 = vmatmul.mubr.bf16.gmra.mrb[152].mxu1 %v2165_v35  ;;  %v2081_v32 = vmax.f32 %v1679_v30, %v1985_v24 }
 0x345   :  { %v2083_v51 = vmax.f32 %v1681_v17, %v1987_v57  ;;  %2768 = vmatprep.mubr.bf16.mxu1 %v2169_v38 }
 0x346   :  { %v2084_v62 = vmax.f32 %v1683_v22, %v1988_v50  ;;  %v1686_v10 = vpop.f32.mrb[96].mxu1  ;;  %3744 = vmatpush3.bf16.msra.mxu0 %v4187_v27 }
 0x347   :  { %v1687_v19 = vadd.f32 %v1686_v10, %v4975_v54  ;;  %v1688_v46 = vpop.f32.mrb[97].mxu1  ;;  %v3923_v29 = vpop.f32.mrb[88].mxu0  ;;  %v2167_v45 = vpack.c.bf16 %v2083_v51, %v2080_v2  ;;  %3745 = vmatprep.subr.bf16.mxu0 %v4188_v59 }
 0x348   :  { %v1689_v8 = vadd.f32 %v1688_v46, %v4979_v43  ;;  %v1880_v12 = vadd.f32 %v3923_v29, %v4981_v56  ;;  %v1690_v15 = vpop.f32.mrb[98].mxu1  ;;  %v1871_v34 = vpop.f32.mrb[89].mxu0  ;;  %v2168_v53 = vpack.c.bf16 %v2084_v62, %v2081_v32 }
 0x349   :  { %v1990_v11 = vmul.f32 0.2, %v1687_v19  ;;  %v1691_v14 = vadd.f32 %v1690_v15, %v4975_v54  ;;  %v1872_v5 = vadd.f32 %v1871_v34, %v4981_v56  ;;  %v1692_v7 = vpop.f32.mrb[99].mxu1  ;;  %v3924_v40 = vpop.f32.mrb[90].mxu0  ;;  %3966 = vmatmul.mubr.bf16.gmra.mrb[116].mxu0 %v2167_v45 }
 0x34a   :  { %v1991_v0 = vmul.f32 0.2, %v1689_v8  ;;  %v1998_v37 = vmul.f32 0.2, %v1880_v12  ;;  %v1693_v58 = vadd.f32 %v1692_v7, %v4979_v43  ;;  %v1883_v18 = vadd.f32 %v3924_v40, %v4981_v56  ;;  %v1874_v20 = vpop.f32.mrb[91].mxu0  ;;  %3746 = vmatpush3.bf16.msra.mxu0 %v4189_v49 }
 0x34b   :  { %v1993_v60 = vmul.f32 0.2, %v1691_v14  ;;  %v1992_v13 = vmul.f32 0.2, %v1872_v5  ;;  %v1875_v48 = vadd.f32 %v1874_v20, %v4981_v56  ;;  %3747 = vmatprep.subr.bf16.mxu0 %v4190_v6  ;;  %v2086_v23 = vmax.f32 %v1687_v19, %v1990_v11 }
 0x34c   :  { %v1994_v41 = vmul.f32 0.2, %v1693_v58  ;;  %v2001_v4 = vmul.f32 0.2, %v1883_v18  ;;  %2769 = vmatmul.mubr.bf16.gmra.mrb[156].mxu1 %v2168_v53  ;;  %v2087_v44 = vmax.f32 %v1689_v8, %v1991_v0  ;;  %v2094_v33 = vmax.f32 %v1880_v12, %v1998_v37 }
 0x34d   :  { %v2089_v26 = vmax.f32 %v1691_v14, %v1993_v60  ;;  %v1995_v36 = vmul.f32 0.2, %v1875_v48  ;;  %v2088_v28 = vmax.f32 %v1872_v5, %v1992_v13 }
 0x34e   :  { %v2090_v55 = vmax.f32 %v1693_v58, %v1994_v41  ;;  %v2097_v63 = vmax.f32 %v1883_v18, %v2001_v4  ;;  %v1696_v25 = vpop.f32.mrb[100].mxu1  ;;  %3748 = vmatpush3.bf16.msra.mxu0 %v4191_v16 }
 0x34f   :  { %v2091_v31 = vmax.f32 %v1875_v48, %v1995_v36  ;;  %v1697_v61 = vadd.f32 %v1696_v25, %v4975_v54  ;;  %v1698_v39 = vpop.f32.mrb[101].mxu1  ;;  %v2170_v30 = vpack.c.bf16 %v2089_v26, %v2086_v23 }
 0x350   :  { %v1699_v21 = vadd.f32 %v1698_v39, %v4979_v43  ;;  %v1700_v35 = vpop.f32.mrb[102].mxu1  ;;  %v2171_v38 = vpack.c.bf16 %v2090_v55, %v2087_v44  ;;  %v2175_v52 = vpack.c.bf16 %v2097_v63, %v2094_v33 }
 0x351   :  { %v1996_v17 = vmul.f32 0.2, %v1697_v61  ;;  %v1701_v47 = vadd.f32 %v1700_v35, %v4975_v54  ;;  %v1702_v42 = vpop.f32.mrb[103].mxu1  ;;  %3969 = vmatprep.mubr.bf16.mxu0 %v2170_v30  ;;  %v2172_v24 = vpack.c.bf16 %v2091_v31, %v2088_v28 }
 0x352   :  { %v1997_v22 = vmul.f32 0.2, %v1699_v21  ;;  %v1703_v27 = vadd.f32 %v1702_v42, %v4979_v43 }
 0x353   :  { %v1999_v57 = vmul.f32 0.2, %v1701_v47  ;;  %2778 = vmatprep.mubr.bf16.mxu1 %v2172_v24  ;;  %v2092_v50 = vmax.f32 %v1697_v61, %v1996_v17 }
 0x354   :  { %v2000_v59 = vmul.f32 0.2, %v1703_v27  ;;  %2779 = vmatmul.mubr.bf16.gmra.mrb[160].mxu1 %v2171_v38  ;;  %v2093_v51 = vmax.f32 %v1699_v21, %v1997_v22 }
 0x355   :  { %v2095_v2 = vmax.f32 %v1701_v47, %v1999_v57  ;;  %2788 = vmatprep.mubr.bf16.mxu1 %v2175_v52 }
 0x356   :  { %v2096_v32 = vmax.f32 %v1703_v27, %v2000_v59  ;;  %v1706_v62 = vpop.f32.mrb[104].mxu1 }
 0x357   :  { %v1707_v10 = vadd.f32 %v1706_v62, %v4975_v54  ;;  %v1708_v49 = vpop.f32.mrb[105].mxu1  ;;  %v3927_v19 = vpop.f32.mrb[92].mxu0  ;;  %v2173_v46 = vpack.c.bf16 %v2095_v2, %v2092_v50 }
 0x358   :  { %v1709_v29 = vadd.f32 %v1708_v49, %v4979_v43  ;;  %v1896_v45 = vadd.f32 %v3927_v19, %v4981_v56  ;;  %v1710_v6 = vpop.f32.mrb[106].mxu1  ;;  %v1887_v8 = vpop.f32.mrb[93].mxu0  ;;  %v2174_v12 = vpack.c.bf16 %v2096_v32, %v2093_v51 }
 0x359   :  { %v2002_v15 = vmul.f32 0.2, %v1707_v10  ;;  %v1711_v34 = vadd.f32 %v1710_v6, %v4975_v54  ;;  %v1888_v53 = vadd.f32 %v1887_v8, %v4981_v56  ;;  %v1712_v11 = vpop.f32.mrb[107].mxu1  ;;  %v3928_v14 = vpop.f32.mrb[94].mxu0  ;;  %3970 = vmatmul.mubr.bf16.gmra.mrb[120].mxu0 %v2173_v46 }
 0x35a   :  { %v2003_v5 = vmul.f32 0.2, %v1709_v29  ;;  %v2010_v7 = vmul.f32 0.2, %v1896_v45  ;;  %v1713_v40 = vadd.f32 %v1712_v11, %v4979_v43  ;;  %v1899_v0 = vadd.f32 %v3928_v14, %v4981_v56  ;;  %v1890_v37 = vpop.f32.mrb[95].mxu0 }
 0x35b   :  { %v2005_v58 = vmul.f32 0.2, %v1711_v34  ;;  %v2004_v18 = vmul.f32 0.2, %v1888_v53  ;;  %v1891_v20 = vadd.f32 %v1890_v37, %v4981_v56  ;;  %v2098_v13 = vmax.f32 %v1707_v10, %v2002_v15 }
 0x35c   :  { %v2006_v16 = vmul.f32 0.2, %v1713_v40  ;;  %v2013_v60 = vmul.f32 0.2, %v1899_v0  ;;  %2789 = vmatmul.mubr.bf16.gmra.mrb[164].mxu1 %v2174_v12  ;;  %v2099_v4 = vmax.f32 %v1709_v29, %v2003_v5  ;;  %v2106_v23 = vmax.f32 %v1896_v45, %v2010_v7 }
 0x35d   :  { %v2101_v48 = vmax.f32 %v1711_v34, %v2005_v58  ;;  %v2007_v41 = vmul.f32 0.2, %v1891_v20  ;;  %v2100_v33 = vmax.f32 %v1888_v53, %v2004_v18 }
 0x35e   :  { %v2102_v26 = vmax.f32 %v1713_v40, %v2006_v16  ;;  %v2109_v36 = vmax.f32 %v1899_v0, %v2013_v60  ;;  %v1716_v44 = vpop.f32.mrb[108].mxu1 }
 0x35f   :  { %v2103_v55 = vmax.f32 %v1891_v20, %v2007_v41  ;;  %v1717_v63 = vadd.f32 %v1716_v44, %v4975_v54  ;;  %v1718_v25 = vpop.f32.mrb[109].mxu1  ;;  %v2176_v28 = vpack.c.bf16 %v2101_v48, %v2098_v13 }
 0x360   :  { %v1719_v31 = vadd.f32 %v1718_v25, %v4979_v43  ;;  %v1720_v61 = vpop.f32.mrb[110].mxu1  ;;  %v2177_v39 = vpack.c.bf16 %v2102_v26, %v2099_v4  ;;  %v2181_v30 = vpack.c.bf16 %v2109_v36, %v2106_v23 }
 0x361   :  { %v2008_v21 = vmul.f32 0.2, %v1717_v63  ;;  %v1721_v35 = vadd.f32 %v1720_v61, %v4975_v54  ;;  %v1722_v38 = vpop.f32.mrb[111].mxu1  ;;  %3973 = vmatprep.mubr.bf16.mxu0 %v2176_v28  ;;  %v2178_v52 = vpack.c.bf16 %v2103_v55, %v2100_v33 }
 0x362   :  { %v2009_v17 = vmul.f32 0.2, %v1719_v31  ;;  %v1723_v47 = vadd.f32 %v1722_v38, %v4979_v43 }
 0x363   :  { %v2011_v42 = vmul.f32 0.2, %v1721_v35  ;;  %2798 = vmatprep.mubr.bf16.mxu1 %v2178_v52  ;;  %v2104_v22 = vmax.f32 %v1717_v63, %v2008_v21 }
 0x364   :  { %v2012_v24 = vmul.f32 0.2, %v1723_v47  ;;  %2799 = vmatmul.mubr.bf16.gmra.mrb[168].mxu1 %v2177_v39  ;;  %v2105_v57 = vmax.f32 %v1719_v31, %v2009_v17 }
 0x365   :  { %v2107_v27 = vmax.f32 %v1721_v35, %v2011_v42  ;;  %2808 = vmatprep.mubr.bf16.mxu1 %v2181_v30 }
 0x366   :  { %v2108_v59 = vmax.f32 %v1723_v47, %v2012_v24  ;;  %v1726_v50 = vpop.f32.mrb[112].mxu1 }
 0x367   :  { %v1727_v2 = vadd.f32 %v1726_v50, %v4975_v54  ;;  %v1728_v51 = vpop.f32.mrb[113].mxu1  ;;  %v3931_v32 = vpop.f32.mrb[96].mxu0  ;;  %v2179_v62 = vpack.c.bf16 %v2107_v27, %v2104_v22 }
 0x368   :  { %v1729_v10 = vadd.f32 %v1728_v51, %v4979_v43  ;;  %v1912_v49 = vadd.f32 %v3931_v32, %v4981_v56  ;;  %v1730_v19 = vpop.f32.mrb[114].mxu1  ;;  %v1903_v46 = vpop.f32.mrb[97].mxu0  ;;  %v2180_v29 = vpack.c.bf16 %v2108_v59, %v2105_v57 }
 0x369   :  { %v2014_v45 = vmul.f32 0.2, %v1727_v2  ;;  %v1731_v6 = vadd.f32 %v1730_v19, %v4975_v54  ;;  %v1904_v8 = vadd.f32 %v1903_v46, %v4981_v56  ;;  %v1732_v12 = vpop.f32.mrb[115].mxu1  ;;  %v3932_v15 = vpop.f32.mrb[98].mxu0  ;;  %3974 = vmatmul.mubr.bf16.gmra.mrb[124].mxu0 %v2179_v62 }
 0x36a   :  { %v2015_v34 = vmul.f32 0.2, %v1729_v10  ;;  %v2022_v53 = vmul.f32 0.2, %v1912_v49  ;;  %v1733_v11 = vadd.f32 %v1732_v12, %v4979_v43  ;;  %v1915_v14 = vadd.f32 %v3932_v15, %v4981_v56  ;;  %v1906_v5 = vpop.f32.mrb[99].mxu0 }
 0x36b   :  { %v2017_v7 = vmul.f32 0.2, %v1731_v6  ;;  %v2016_v40 = vmul.f32 0.2, %v1904_v8  ;;  %v1907_v0 = vadd.f32 %v1906_v5, %v4981_v56  ;;  %v2110_v18 = vmax.f32 %v1727_v2, %v2014_v45 }
 0x36c   :  { %v2018_v37 = vmul.f32 0.2, %v1733_v11  ;;  %v2025_v58 = vmul.f32 0.2, %v1915_v14  ;;  %2809 = vmatmul.mubr.bf16.gmra.mrb[172].mxu1 %v2180_v29  ;;  %v2111_v60 = vmax.f32 %v1729_v10, %v2015_v34  ;;  %v2118_v13 = vmax.f32 %v1912_v49, %v2022_v53 }
 0x36d   :  { %v2113_v20 = vmax.f32 %v1731_v6, %v2017_v7  ;;  %v2019_v16 = vmul.f32 0.2, %v1907_v0  ;;  %v2112_v23 = vmax.f32 %v1904_v8, %v2016_v40 }
 0x36e   :  { %v2114_v48 = vmax.f32 %v1733_v11, %v2018_v37  ;;  %v2121_v41 = vmax.f32 %v1915_v14, %v2025_v58  ;;  %v1736_v4 = vpop.f32.mrb[116].mxu1 }
 0x36f   :  { %v2115_v26 = vmax.f32 %v1907_v0, %v2019_v16  ;;  %v1737_v36 = vadd.f32 %v1736_v4, %v4975_v54  ;;  %v1738_v44 = vpop.f32.mrb[117].mxu1  ;;  %v2182_v33 = vpack.c.bf16 %v2113_v20, %v2110_v18 }
 0x370   :  { %v1739_v55 = vadd.f32 %v1738_v44, %v4979_v43  ;;  %v1740_v63 = vpop.f32.mrb[118].mxu1  ;;  %v2183_v25 = vpack.c.bf16 %v2114_v48, %v2111_v60  ;;  %v2187_v28 = vpack.c.bf16 %v2121_v41, %v2118_v13 }
 0x371   :  { %v2020_v31 = vmul.f32 0.2, %v1737_v36  ;;  %v1741_v61 = vadd.f32 %v1740_v63, %v4975_v54  ;;  %v1742_v39 = vpop.f32.mrb[119].mxu1  ;;  %3977 = vmatprep.mubr.bf16.mxu0 %v2182_v33  ;;  %v2184_v30 = vpack.c.bf16 %v2115_v26, %v2112_v23 }
 0x372   :  { %v2021_v21 = vmul.f32 0.2, %v1739_v55  ;;  %v1743_v35 = vadd.f32 %v1742_v39, %v4979_v43 }
 0x373   :  { %v2023_v38 = vmul.f32 0.2, %v1741_v61  ;;  %2818 = vmatprep.mubr.bf16.mxu1 %v2184_v30  ;;  %v2116_v17 = vmax.f32 %v1737_v36, %v2020_v31 }
 0x374   :  { %v2024_v52 = vmul.f32 0.2, %v1743_v35  ;;  %2819 = vmatmul.mubr.bf16.gmra.mrb[176].mxu1 %v2183_v25  ;;  %v2117_v42 = vmax.f32 %v1739_v55, %v2021_v21 }
 0x375   :  { %v2119_v47 = vmax.f32 %v1741_v61, %v2023_v38  ;;  %2828 = vmatprep.mubr.bf16.mxu1 %v2187_v28 }
 0x376   :  { %v2120_v24 = vmax.f32 %v1743_v35, %v2024_v52  ;;  %v1746_v22 = vpop.f32.mrb[120].mxu1 }
 0x377   :  { %v1747_v27 = vadd.f32 %v1746_v22, %v4975_v54  ;;  %v1748_v57 = vpop.f32.mrb[121].mxu1  ;;  %v3935_v59 = vpop.f32.mrb[100].mxu0  ;;  %v2185_v50 = vpack.c.bf16 %v2119_v47, %v2116_v17 }
 0x378   :  { %v1749_v2 = vadd.f32 %v1748_v57, %v4979_v43  ;;  %v1928_v51 = vadd.f32 %v3935_v59, %v4981_v56  ;;  %v1750_v32 = vpop.f32.mrb[122].mxu1  ;;  %v1919_v62 = vpop.f32.mrb[101].mxu0  ;;  %v2186_v10 = vpack.c.bf16 %v2120_v24, %v2117_v42 }
 0x379   :  { %v2026_v49 = vmul.f32 0.2, %v1747_v27  ;;  %v1751_v19 = vadd.f32 %v1750_v32, %v4975_v54  ;;  %v1920_v46 = vadd.f32 %v1919_v62, %v4981_v56  ;;  %v1752_v29 = vpop.f32.mrb[123].mxu1  ;;  %v3936_v45 = vpop.f32.mrb[102].mxu0  ;;  %3978 = vmatmul.mubr.bf16.gmra.mrb[128].mxu0 %v2185_v50 }
 0x37a   :  { %v2027_v6 = vmul.f32 0.2, %v1749_v2  ;;  %v2034_v8 = vmul.f32 0.2, %v1928_v51  ;;  %v1753_v12 = vadd.f32 %v1752_v29, %v4979_v43  ;;  %v1931_v15 = vadd.f32 %v3936_v45, %v4981_v56  ;;  %v1922_v34 = vpop.f32.mrb[103].mxu0 }
 0x37b   :  { %v2029_v53 = vmul.f32 0.2, %v1751_v19  ;;  %v2028_v11 = vmul.f32 0.2, %v1920_v46  ;;  %v1923_v14 = vadd.f32 %v1922_v34, %v4981_v56  ;;  %v2122_v40 = vmax.f32 %v1747_v27, %v2026_v49 }
 0x37c   :  { %v2030_v5 = vmul.f32 0.2, %v1753_v12  ;;  %v2037_v7 = vmul.f32 0.2, %v1931_v15  ;;  %2829 = vmatmul.mubr.bf16.gmra.mrb[180].mxu1 %v2186_v10  ;;  %v2123_v58 = vmax.f32 %v1749_v2, %v2027_v6  ;;  %v2130_v18 = vmax.f32 %v1928_v51, %v2034_v8 }
 0x37d   :  { %v2125_v0 = vmax.f32 %v1751_v19, %v2029_v53  ;;  %v2031_v37 = vmul.f32 0.2, %v1923_v14  ;;  %v2124_v13 = vmax.f32 %v1920_v46, %v2028_v11 }
 0x37e   :  { %v2126_v20 = vmax.f32 %v1753_v12, %v2030_v5  ;;  %v2133_v16 = vmax.f32 %v1931_v15, %v2037_v7  ;;  %v1756_v60 = vpop.f32.mrb[124].mxu1 }
 0x37f   :  { %v2127_v48 = vmax.f32 %v1923_v14, %v2031_v37  ;;  %v1757_v41 = vadd.f32 %v1756_v60, %v4975_v54  ;;  %v1758_v4 = vpop.f32.mrb[125].mxu1  ;;  %v2188_v23 = vpack.c.bf16 %v2125_v0, %v2122_v40 }
 0x380   :  { %v1759_v26 = vadd.f32 %v1758_v4, %v4979_v43  ;;  %v1760_v36 = vpop.f32.mrb[126].mxu1  ;;  %v2189_v44 = vpack.c.bf16 %v2126_v20, %v2123_v58  ;;  %v2193_v33 = vpack.c.bf16 %v2133_v16, %v2130_v18  ;;  %v4192_v18 = vld [vmem:[%s5551_s14 + $0x70] sm:$0xff]  }
 0x381   :  { %v2032_v55 = vmul.f32 0.2, %v1757_v41  ;;  %v1761_v63 = vadd.f32 %v1760_v36, %v4975_v54  ;;  %v1762_v25 = vpop.f32.mrb[127].mxu1  ;;  %3981 = vmatprep.mubr.bf16.mxu0 %v2188_v23  ;;  %v2190_v28 = vpack.c.bf16 %v2127_v48, %v2124_v13  ;;  %3749 = vmatprep.subr.bf16.mxu0 %v4192_v18 }
 0x382   :  { %v2033_v31 = vmul.f32 0.2, %v1759_v26  ;;  %v1763_v61 = vadd.f32 %v1762_v25, %v4979_v43 }
 0x383   :  { %v2035_v39 = vmul.f32 0.2, %v1761_v63  ;;  %2838 = vmatprep.mubr.bf16.mxu1 %v2190_v28  ;;  %v2128_v21 = vmax.f32 %v1757_v41, %v2032_v55  ;;  %v4193_v41 = vld [vmem:[%s5551_s14 + $0x30] sm:$0xff]  }
 0x384   :  { %v2036_v30 = vmul.f32 0.2, %v1763_v61  ;;  %2839 = vmatmul.mubr.bf16.gmra.mrb[184].mxu1 %v2189_v44  ;;  %v2129_v38 = vmax.f32 %v1759_v26, %v2033_v31  ;;  %3750 = vmatpush3.bf16.msra.mxu0 %v4193_v41  ;;  %v4194_v31 = vld [vmem:[%s5551_s14 + $0x78] sm:$0xff]  }
 0x385   :  { %v2131_v35 = vmax.f32 %v1761_v63, %v2035_v39  ;;  %2848 = vmatprep.mubr.bf16.mxu1 %v2193_v33  ;;  %v4195_v39 = vld [vmem:[%s5551_s14 + $0x38] sm:$0xff]   ;;  %3751 = vmatprep.subr.bf16.mxu0 %v4194_v31 }
 0x386   :  { %v2132_v52 = vmax.f32 %v1763_v61, %v2036_v30  ;;  %v1766_v17 = vpop.f32.mrb[128].mxu1 }
 0x387   :  { %v1767_v47 = vadd.f32 %v1766_v17, %v4975_v54  ;;  %v1768_v42 = vpop.f32.mrb[129].mxu1  ;;  %v3939_v24 = vpop.f32.mrb[104].mxu0  ;;  %v2191_v22 = vpack.c.bf16 %v2131_v35, %v2128_v21 }
 0x388   :  { %v1769_v27 = vadd.f32 %v1768_v42, %v4979_v43  ;;  %v1944_v57 = vadd.f32 %v3939_v24, %v4981_v56  ;;  %v1770_v59 = vpop.f32.mrb[130].mxu1  ;;  %v1935_v50 = vpop.f32.mrb[105].mxu0  ;;  %v2192_v2 = vpack.c.bf16 %v2132_v52, %v2129_v38  ;;  %3752 = vmatpush3.bf16.msra.mxu0 %v4195_v39 }
 0x389   :  { %v2038_v51 = vmul.f32 0.2, %v1767_v47  ;;  %v1771_v32 = vadd.f32 %v1770_v59, %v4975_v54  ;;  %v1936_v62 = vadd.f32 %v1935_v50, %v4981_v56  ;;  %v1772_v10 = vpop.f32.mrb[131].mxu1  ;;  %v3940_v49 = vpop.f32.mrb[106].mxu0  ;;  %3982 = vmatmul.mubr.bf16.gmra.mrb[132].mxu0 %v2191_v22 }
 0x38a   :  { %v2039_v19 = vmul.f32 0.2, %v1769_v27  ;;  %v2046_v46 = vmul.f32 0.2, %v1944_v57  ;;  %v1773_v29 = vadd.f32 %v1772_v10, %v4979_v43  ;;  %v1947_v45 = vadd.f32 %v3940_v49, %v4981_v56  ;;  %v1938_v6 = vpop.f32.mrb[107].mxu0 }
 0x38b   :  { %v2041_v8 = vmul.f32 0.2, %v1771_v32  ;;  %v2040_v12 = vmul.f32 0.2, %v1936_v62  ;;  %v1939_v15 = vadd.f32 %v1938_v6, %v4981_v56  ;;  %v2134_v11 = vmax.f32 %v1767_v47, %v2038_v51 }
 0x38c   :  { %v2042_v34 = vmul.f32 0.2, %v1773_v29  ;;  %v2049_v53 = vmul.f32 0.2, %v1947_v45  ;;  %2849 = vmatmul.mubr.bf16.gmra.mrb[188].mxu1 %v2192_v2  ;;  %v2135_v7 = vmax.f32 %v1769_v27, %v2039_v19  ;;  %v2142_v40 = vmax.f32 %v1944_v57, %v2046_v46 }
 0x38d   :  { %v2137_v14 = vmax.f32 %v1771_v32, %v2041_v8  ;;  %v2043_v5 = vmul.f32 0.2, %v1939_v15  ;;  %v2136_v20 = vmax.f32 %v1936_v62, %v2040_v12 }
 0x38e   :  { %v2138_v0 = vmax.f32 %v1773_v29, %v2042_v34  ;;  %v2145_v37 = vmax.f32 %v1947_v45, %v2049_v53  ;;  %v1776_v58 = vpop.f32.mrb[132].mxu1 }
 0x38f   :  { %v2139_v16 = vmax.f32 %v1939_v15, %v2043_v5  ;;  %v1777_v60 = vadd.f32 %v1776_v58, %v4975_v54  ;;  %v1778_v13 = vpop.f32.mrb[133].mxu1  ;;  %v2194_v48 = vpack.c.bf16 %v2137_v14, %v2134_v11 }
 0x390   :  { %v1779_v4 = vadd.f32 %v1778_v13, %v4979_v43  ;;  %v1780_v23 = vpop.f32.mrb[134].mxu1  ;;  %v2195_v26 = vpack.c.bf16 %v2138_v0, %v2135_v7  ;;  %v2199_v36 = vpack.c.bf16 %v2145_v37, %v2142_v40 }
 0x391   :  { %v2044_v44 = vmul.f32 0.2, %v1777_v60  ;;  %v1781_v33 = vadd.f32 %v1780_v23, %v4975_v54  ;;  %v1782_v55 = vpop.f32.mrb[135].mxu1  ;;  %3985 = vmatprep.mubr.bf16.mxu0 %v2194_v48  ;;  %v2196_v63 = vpack.c.bf16 %v2139_v16, %v2136_v20 }
 0x392   :  { %v2045_v25 = vmul.f32 0.2, %v1779_v4  ;;  %v1783_v28 = vadd.f32 %v1782_v55, %v4979_v43 }
 0x393   :  { %v2047_v61 = vmul.f32 0.2, %v1781_v33  ;;  %2858 = vmatprep.mubr.bf16.mxu1 %v2196_v63  ;;  %v2140_v21 = vmax.f32 %v1777_v60, %v2044_v44 }
 0x394   :  { %v2048_v30 = vmul.f32 0.2, %v1783_v28  ;;  %2859 = vmatmul.mubr.bf16.gmra.mrb[192].mxu1 %v2195_v26  ;;  %v2141_v38 = vmax.f32 %v1779_v4, %v2045_v25 }
 0x395   :  { %v2143_v35 = vmax.f32 %v1781_v33, %v2047_v61  ;;  %2868 = vmatprep.mubr.bf16.mxu1 %v2199_v36 }
 0x396   :  { %v2144_v52 = vmax.f32 %v1783_v28, %v2048_v30  ;;  %v1786_v17 = vpop.f32.mrb[136].mxu1 }
 0x397   :  { %v1787_v47 = vadd.f32 %v1786_v17, %v4975_v54  ;;  %v1788_v42 = vpop.f32.mrb[137].mxu1  ;;  %v3943_v24 = vpop.f32.mrb[108].mxu0  ;;  %v2197_v22 = vpack.c.bf16 %v2143_v35, %v2140_v21 }
 0x398   :  { %v1789_v27 = vadd.f32 %v1788_v42, %v4979_v43  ;;  %v1960_v57 = vadd.f32 %v3943_v24, %v4981_v56  ;;  %v1790_v59 = vpop.f32.mrb[138].mxu1  ;;  %v1951_v50 = vpop.f32.mrb[109].mxu0  ;;  %v2198_v2 = vpack.c.bf16 %v2144_v52, %v2141_v38 }
 0x399   :  { %v2050_v51 = vmul.f32 0.2, %v1787_v47  ;;  %v1791_v32 = vadd.f32 %v1790_v59, %v4975_v54  ;;  %v1952_v62 = vadd.f32 %v1951_v50, %v4981_v56  ;;  %v1792_v10 = vpop.f32.mrb[139].mxu1  ;;  %v3944_v49 = vpop.f32.mrb[110].mxu0  ;;  %3986 = vmatmul.mubr.bf16.gmra.mrb[136].mxu0 %v2197_v22 }
 0x39a   :  { %v2051_v19 = vmul.f32 0.2, %v1789_v27  ;;  %v2058_v46 = vmul.f32 0.2, %v1960_v57  ;;  %v1793_v29 = vadd.f32 %v1792_v10, %v4979_v43  ;;  %v1963_v45 = vadd.f32 %v3944_v49, %v4981_v56  ;;  %v1954_v6 = vpop.f32.mrb[111].mxu0 }
 0x39b   :  { %v2053_v8 = vmul.f32 0.2, %v1791_v32  ;;  %v2052_v12 = vmul.f32 0.2, %v1952_v62  ;;  %v1955_v15 = vadd.f32 %v1954_v6, %v4981_v56  ;;  %v2146_v11 = vmax.f32 %v1787_v47, %v2050_v51 }
 0x39c   :  { %v2054_v34 = vmul.f32 0.2, %v1793_v29  ;;  %v2061_v53 = vmul.f32 0.2, %v1963_v45  ;;  %2869 = vmatmul.mubr.bf16.gmra.mrb[196].mxu1 %v2198_v2  ;;  %v2147_v7 = vmax.f32 %v1789_v27, %v2051_v19  ;;  %v2154_v40 = vmax.f32 %v1960_v57, %v2058_v46  ;;  %v5144_v27 = vld [vmem:[%s5548_s11] ss:$0 sm:$0xff] }
 0x39d   :  { %v2149_v14 = vmax.f32 %v1791_v32, %v2053_v8  ;;  %v2055_v5 = vmul.f32 0.2, %v1955_v15  ;;  %v2148_v18 = vmax.f32 %v1952_v62, %v2052_v12  ;;  %v5150_v57 = vstv %s5537_s0  ;;  %s3648_s11 = sld [smem:[#allocation3 + $0x1]] }
 0x39e   :  { %v2150_v0 = vmax.f32 %v1793_v29, %v2054_v34  ;;  %v2157_v37 = vmax.f32 %v1963_v45, %v2061_v53  ;;  %v1796_v58 = vpop.f32.mrb[140].mxu1 }
 0x39f   :  { %v2151_v20 = vmax.f32 %v1955_v15, %v2055_v5  ;;  %v1797_v16 = vadd.f32 %v1796_v58, %v4975_v54  ;;  %v1798_v60 = vpop.f32.mrb[141].mxu1  ;;  %v2200_v13 = vpack.c.bf16 %v2149_v14, %v2146_v11 }
 0x3a0   :  { %v1799_v48 = vadd.f32 %v1798_v60, %v4979_v43  ;;  %v1800_v56 = vpop.f32.mrb[142].mxu1  ;;  %v2201_v41 = vpack.c.bf16 %v2150_v0, %v2147_v7  ;;  %v2205_v4 = vpack.c.bf16 %v2157_v37, %v2154_v40 }
 0x3a1   :  { %v2056_v23 = vmul.f32 0.2, %v1797_v16  ;;  %v1801_v26 = vadd.f32 %v1800_v56, %v4975_v54  ;;  %v1802_v36 = vpop.f32.mrb[143].mxu1  ;;  %3989 = vmatprep.mubr.bf16.mxu0 %v2200_v13  ;;  %v2202_v44 = vpack.c.bf16 %v2151_v20, %v2148_v18  ;;  %v2534_v54 = vld [vmem:[%s5550_s13] sm:$0x3] }
 0x3a2   :  { %v2057_v33 = vmul.f32 0.2, %v1799_v48  ;;  %v1803_v55 = vadd.f32 %v1802_v36, %v4979_v43  ;;  %v5132_v43 = vrot.slane %v2534_v54, %v1471_v3  ;;  %v5136_v35 = vrot.slane %v2534_v54, %v1475_v1 }
 0x3a3   :  { %v2059_v63 = vmul.f32 0.2, %v1801_v26  ;;  %2878 = vmatprep.mubr.bf16.mxu1 %v2202_v44  ;;  %v2152_v28 = vmax.f32 %v1797_v16, %v2056_v23  ;;  %s3160_s6 = smul.f32 %s3648_s11, %s3647_s25 }
 0x3a4   :  { %v2060_v25 = vmul.f32 0.2, %v1803_v55  ;;  %2879 = vmatmul.mubr.bf16.gmra.mrb[200].mxu1 %v2201_v41  ;;  %v2153_v61 = vmax.f32 %v1799_v48, %v2057_v33 }
 0x3a5   :  { %v2155_v31 = vmax.f32 %v1801_v26, %v2059_v63  ;;  %2888 = vmatprep.mubr.bf16.mxu1 %v2205_v4  ;;  %s3161_s26 = sadd.f32 %s3160_s6, %s3157_s20 }
 0x3a6   :  { %v2156_v39 = vmax.f32 %v1803_v55, %v2060_v25 }
 0x3a7   :  { %v2203_v30 = vpack.c.bf16 %v2155_v31, %v2152_v28 }
 0x3a8   :  { %v2204_v21 = vpack.c.bf16 %v2156_v39, %v2153_v61 }
 0x3a9   :  { %3990 = vmatmul.mubr.bf16.gmra.mrb[140].mxu0 %v2203_v30 }
 0x3ac   :  { %2889 = vmatmul.mubr.bf16.gmra.mrb[204].mxu1 %v2204_v21 }
 0x407   :  { %v2740_v38 = vpop.f32.mrb[144].mxu1 }
 0x408   :  { %v2741_v52 = vadd.f32 %v2740_v38, %v5132_v43  ;;  %v2742_v17 = vpop.f32.mrb[145].mxu1 }
 0x409   :  { %v2743_v47 = vadd.f32 %v2742_v17, %v5136_v35  ;;  %v2744_v42 = vpop.f32.mrb[146].mxu1 }
 0x40a   :  { %v2745_v24 = vadd.f32 %v2744_v42, %v5132_v43  ;;  %v2746_v22 = vpop.f32.mrb[147].mxu1  ;;  %v2899_v1 = vmul.f32 0.2, %v2741_v52 }
 0x40b   :  { %v2900_v3 = vmul.f32 0.2, %v2743_v47  ;;  %v2747_v9 = vadd.f32 %v2746_v22, %v5136_v35 }
 0x40c   :  { %v3963_v59 = vpop.f32.mrb[112].mxu0  ;;  %v2901_v2 = vmul.f32 0.2, %v2745_v24  ;;  %v2963_v12 = vmax.f32 %v2741_v52, %v2899_v1 }
 0x40d   :  { %v2964_v50 = vmax.f32 %v2743_v47, %v2900_v3  ;;  %v2902_v51 = vmul.f32 0.2, %v2747_v9  ;;  %v2320_v32 = vadd.f32 %v3963_v59, %v5144_v27  ;;  %v2311_v62 = vpop.f32.mrb[113].mxu0 }
 0x40e   :  { %v2312_v10 = vadd.f32 %v5144_v27, %v2311_v62  ;;  %v3964_v49 = vpop.f32.mrb[114].mxu0  ;;  %v2965_v14 = vmax.f32 %v2745_v24, %v2901_v2 }
 0x40f   :  { %v3029_v19 = vmul.f32 %v5150_v57, %v2964_v50  ;;  %v2966_v46 = vmax.f32 %v2747_v9, %v2902_v51  ;;  %v2440_v29 = vmul.f32 0.2, %v2320_v32  ;;  %v2323_v45 = vadd.f32 %v3964_v49, %v5144_v27  ;;  %v2314_v6 = vpop.f32.mrb[115].mxu0  ;;  %v2750_v8 = vpop.f32.mrb[148].mxu1 }
 0x410   :  { %v2438_v15 = vmul.f32 0.2, %v2312_v10  ;;  %v2315_v34 = vadd.f32 %v5144_v27, %v2314_v6  ;;  %v2751_v53 = vadd.f32 %v2750_v8, %v5132_v43  ;;  %v2752_v11 = vpop.f32.mrb[149].mxu1 }
 0x411   :  { %v3030_v5 = vmul.f32 %v5150_v57, %v2966_v46  ;;  %v2441_v7 = vmul.f32 0.2, %v2323_v45  ;;  %v2753_v40 = vadd.f32 %v2752_v11, %v5136_v35  ;;  %v2754_v0 = vpop.f32.mrb[150].mxu1  ;;  %v2472_v37 = vmax.f32 %v2320_v32, %v2440_v29 }
 0x412   :  { %v2439_v58 = vmul.f32 0.2, %v2315_v34  ;;  %v2903_v18 = vmul.f32 0.2, %v2751_v53  ;;  %v2755_v20 = vadd.f32 %v2754_v0, %v5132_v43  ;;  %v2756_v16 = vpop.f32.mrb[151].mxu1  ;;  %v3061_v56 = vsub.f32 %v3029_v19, %v2963_v12 }
 0x413   :  { %v2473_v60 = vmax.f32 %v2323_v45, %v2441_v7  ;;  %v2904_v13 = vmul.f32 0.2, %v2753_v40  ;;  %v2757_v48 = vadd.f32 %v2756_v16, %v5136_v35  ;;  %v2470_v41 = vmax.f32 %v2312_v10, %v2438_v15 }
 0x414   :  { %v2471_v4 = vmax.f32 %v2315_v34, %v2439_v58  ;;  %v3062_v23 = vsub.f32 %v3030_v5, %v2965_v14  ;;  %v2905_v36 = vmul.f32 0.2, %v2755_v20  ;;  %v2967_v25 = vmax.f32 %v2751_v53, %v2903_v18 }
 0x415   :  { %v2968_v26 = vmax.f32 %v2753_v40, %v2904_v13  ;;  %v2906_v44 = vmul.f32 0.2, %v2757_v48  ;;  %v3095_v33 = vpack.c.bf16 %v2473_v60, %v2472_v37 }
 0x416   :  { %v3093_v55 = vpack.c.bf16 %v2471_v4, %v2470_v41  ;;  %v3094_v63 = vpack.c.bf16 %v3062_v23, %v3061_v56  ;;  %v2969_v21 = vmax.f32 %v2755_v20, %v2905_v36 }
 0x417   :  { %v3031_v28 = vmul.f32 %v5150_v57, %v2968_v26  ;;  %v2970_v31 = vmax.f32 %v2757_v48, %v2906_v44  ;;  %v2760_v61 = vpop.f32.mrb[152].mxu1 }
 0x418   :  { %v2761_v39 = vadd.f32 %v2760_v61, %v5132_v43  ;;  %3291 = vmatprep.mubr.bf16.mxu0 %v3094_v63  ;;  %v2762_v30 = vpop.f32.mrb[153].mxu1 }
 0x419   :  { %v3032_v54 = vmul.f32 %v5150_v57, %v2970_v31  ;;  %v2763_v38 = vadd.f32 %v2762_v30, %v5136_v35  ;;  %3292 = vmatmul.mubr.bf16.vlgmr.msra.gmra.mrb[144].mxu0 %v3093_v55  ;;  %v2764_v52 = vpop.f32.mrb[154].mxu1  ;;  %v3063_v17 = vsub.f32 %v3031_v28, %v2967_v25 }
 0x41a   :  { %v2765_v47 = vadd.f32 %v2764_v52, %v5132_v43  ;;  %v2766_v42 = vpop.f32.mrb[155].mxu1  ;;  %v2907_v9 = vmul.f32 0.2, %v2761_v39 }
 0x41b   :  { %v2908_v24 = vmul.f32 0.2, %v2763_v38  ;;  %v2767_v22 = vadd.f32 %v2766_v42, %v5136_v35  ;;  %v3064_v3 = vsub.f32 %v3032_v54, %v2969_v21 }
 0x41c   :  { %v2909_v1 = vmul.f32 0.2, %v2765_v47  ;;  %v3967_v59 = vpop.f32.mrb[116].mxu0  ;;  %v2971_v12 = vmax.f32 %v2761_v39, %v2907_v9 }
 0x41d   :  { %v2972_v50 = vmax.f32 %v2763_v38, %v2908_v24  ;;  %v2910_v2 = vmul.f32 0.2, %v2767_v22  ;;  %v2336_v51 = vadd.f32 %v3967_v59, %v5144_v27  ;;  %v2327_v32 = vpop.f32.mrb[117].mxu0  ;;  %v3096_v62 = vpack.c.bf16 %v3064_v3, %v3063_v17 }
 0x41e   :  { %v2328_v10 = vadd.f32 %v5144_v27, %v2327_v32  ;;  %v3968_v49 = vpop.f32.mrb[118].mxu0  ;;  %v2973_v14 = vmax.f32 %v2765_v47, %v2909_v1 }
 0x41f   :  { %v3033_v19 = vmul.f32 %v5150_v57, %v2972_v50  ;;  %v2974_v46 = vmax.f32 %v2767_v22, %v2910_v2  ;;  %v2444_v29 = vmul.f32 0.2, %v2336_v51  ;;  %v2339_v45 = vadd.f32 %v3968_v49, %v5144_v27  ;;  %v2330_v6 = vpop.f32.mrb[119].mxu0  ;;  %v2770_v8 = vpop.f32.mrb[156].mxu1  ;;  %3299 = vmatprep.mubr.bf16.mxu0 %v3096_v62 }
 0x420   :  { %v2442_v15 = vmul.f32 0.2, %v2328_v10  ;;  %v2331_v34 = vadd.f32 %v5144_v27, %v2330_v6  ;;  %v2771_v53 = vadd.f32 %v2770_v8, %v5132_v43  ;;  %v2772_v11 = vpop.f32.mrb[157].mxu1 }
 0x421   :  { %v3034_v5 = vmul.f32 %v5150_v57, %v2974_v46  ;;  %v2445_v7 = vmul.f32 0.2, %v2339_v45  ;;  %v2773_v40 = vadd.f32 %v2772_v11, %v5136_v35  ;;  %3300 = vmatmul.mubr.bf16.gmra.mrb[148].mxu0 %v3095_v33  ;;  %v2774_v0 = vpop.f32.mrb[158].mxu1  ;;  %v2476_v37 = vmax.f32 %v2336_v51, %v2444_v29 }
 0x422   :  { %v2443_v58 = vmul.f32 0.2, %v2331_v34  ;;  %v2911_v18 = vmul.f32 0.2, %v2771_v53  ;;  %v2775_v20 = vadd.f32 %v2774_v0, %v5132_v43  ;;  %v2776_v16 = vpop.f32.mrb[159].mxu1  ;;  %v3065_v56 = vsub.f32 %v3033_v19, %v2971_v12 }
 0x423   :  { %v2477_v60 = vmax.f32 %v2339_v45, %v2445_v7  ;;  %v2912_v13 = vmul.f32 0.2, %v2773_v40  ;;  %v2777_v48 = vadd.f32 %v2776_v16, %v5136_v35  ;;  %v2474_v41 = vmax.f32 %v2328_v10, %v2442_v15 }
 0x424   :  { %v2475_v4 = vmax.f32 %v2331_v34, %v2443_v58  ;;  %v3066_v23 = vsub.f32 %v3034_v5, %v2973_v14  ;;  %v2913_v36 = vmul.f32 0.2, %v2775_v20  ;;  %v2975_v25 = vmax.f32 %v2771_v53, %v2911_v18 }
 0x425   :  { %v2976_v26 = vmax.f32 %v2773_v40, %v2912_v13  ;;  %v2914_v44 = vmul.f32 0.2, %v2777_v48  ;;  %v3099_v55 = vpack.c.bf16 %v2477_v60, %v2476_v37 }
 0x426   :  { %v3098_v33 = vpack.c.bf16 %v3066_v23, %v3065_v56  ;;  %v3097_v63 = vpack.c.bf16 %v2475_v4, %v2474_v41  ;;  %v2977_v21 = vmax.f32 %v2775_v20, %v2913_v36 }
 0x427   :  { %v3035_v28 = vmul.f32 %v5150_v57, %v2976_v26  ;;  %v2978_v31 = vmax.f32 %v2777_v48, %v2914_v44  ;;  %v2780_v61 = vpop.f32.mrb[160].mxu1 }
 0x428   :  { %v2781_v39 = vadd.f32 %v2780_v61, %v5132_v43  ;;  %3307 = vmatprep.mubr.bf16.mxu0 %v3098_v33  ;;  %v2782_v30 = vpop.f32.mrb[161].mxu1 }
 0x429   :  { %v3036_v54 = vmul.f32 %v5150_v57, %v2978_v31  ;;  %v2783_v38 = vadd.f32 %v2782_v30, %v5136_v35  ;;  %3308 = vmatmul.mubr.bf16.gmra.mrb[152].mxu0 %v3097_v63  ;;  %v2784_v52 = vpop.f32.mrb[162].mxu1  ;;  %v3067_v17 = vsub.f32 %v3035_v28, %v2975_v25 }
 0x42a   :  { %v2785_v47 = vadd.f32 %v2784_v52, %v5132_v43  ;;  %v2786_v42 = vpop.f32.mrb[163].mxu1  ;;  %v2915_v9 = vmul.f32 0.2, %v2781_v39 }
 0x42b   :  { %v2916_v24 = vmul.f32 0.2, %v2783_v38  ;;  %v2787_v22 = vadd.f32 %v2786_v42, %v5136_v35  ;;  %v3068_v3 = vsub.f32 %v3036_v54, %v2977_v21 }
 0x42c   :  { %v2917_v1 = vmul.f32 0.2, %v2785_v47  ;;  %v3971_v59 = vpop.f32.mrb[120].mxu0  ;;  %v2979_v12 = vmax.f32 %v2781_v39, %v2915_v9 }
 0x42d   :  { %v2980_v50 = vmax.f32 %v2783_v38, %v2916_v24  ;;  %v2918_v2 = vmul.f32 0.2, %v2787_v22  ;;  %v2352_v51 = vadd.f32 %v3971_v59, %v5144_v27  ;;  %v2343_v32 = vpop.f32.mrb[121].mxu0  ;;  %v3100_v62 = vpack.c.bf16 %v3068_v3, %v3067_v17 }
 0x42e   :  { %v2344_v10 = vadd.f32 %v5144_v27, %v2343_v32  ;;  %v3972_v49 = vpop.f32.mrb[122].mxu0  ;;  %v2981_v14 = vmax.f32 %v2785_v47, %v2917_v1 }
 0x42f   :  { %v3037_v19 = vmul.f32 %v5150_v57, %v2980_v50  ;;  %v2982_v46 = vmax.f32 %v2787_v22, %v2918_v2  ;;  %v2448_v29 = vmul.f32 0.2, %v2352_v51  ;;  %v2355_v45 = vadd.f32 %v3972_v49, %v5144_v27  ;;  %v2346_v6 = vpop.f32.mrb[123].mxu0  ;;  %v2790_v8 = vpop.f32.mrb[164].mxu1  ;;  %3315 = vmatprep.mubr.bf16.mxu0 %v3100_v62 }
 0x430   :  { %v2446_v15 = vmul.f32 0.2, %v2344_v10  ;;  %v2347_v34 = vadd.f32 %v5144_v27, %v2346_v6  ;;  %v2791_v53 = vadd.f32 %v2790_v8, %v5132_v43  ;;  %v2792_v11 = vpop.f32.mrb[165].mxu1 }
 0x431   :  { %v3038_v5 = vmul.f32 %v5150_v57, %v2982_v46  ;;  %v2449_v7 = vmul.f32 0.2, %v2355_v45  ;;  %v2793_v40 = vadd.f32 %v2792_v11, %v5136_v35  ;;  %3316 = vmatmul.mubr.bf16.gmra.mrb[156].mxu0 %v3099_v55  ;;  %v2794_v0 = vpop.f32.mrb[166].mxu1  ;;  %v2480_v37 = vmax.f32 %v2352_v51, %v2448_v29 }
 0x432   :  { %v2447_v58 = vmul.f32 0.2, %v2347_v34  ;;  %v2919_v18 = vmul.f32 0.2, %v2791_v53  ;;  %v2795_v20 = vadd.f32 %v2794_v0, %v5132_v43  ;;  %v2796_v16 = vpop.f32.mrb[167].mxu1  ;;  %v3069_v56 = vsub.f32 %v3037_v19, %v2979_v12 }
 0x433   :  { %v2481_v60 = vmax.f32 %v2355_v45, %v2449_v7  ;;  %v2920_v13 = vmul.f32 0.2, %v2793_v40  ;;  %v2797_v48 = vadd.f32 %v2796_v16, %v5136_v35  ;;  %v2478_v41 = vmax.f32 %v2344_v10, %v2446_v15 }
 0x434   :  { %v2479_v4 = vmax.f32 %v2347_v34, %v2447_v58  ;;  %v3070_v23 = vsub.f32 %v3038_v5, %v2981_v14  ;;  %v2921_v36 = vmul.f32 0.2, %v2795_v20  ;;  %v2983_v25 = vmax.f32 %v2791_v53, %v2919_v18 }
 0x435   :  { %v2984_v26 = vmax.f32 %v2793_v40, %v2920_v13  ;;  %v2922_v44 = vmul.f32 0.2, %v2797_v48  ;;  %v3103_v33 = vpack.c.bf16 %v2481_v60, %v2480_v37 }
 0x436   :  { %v3102_v55 = vpack.c.bf16 %v3070_v23, %v3069_v56  ;;  %v3101_v63 = vpack.c.bf16 %v2479_v4, %v2478_v41  ;;  %v2985_v21 = vmax.f32 %v2795_v20, %v2921_v36 }
 0x437   :  { %v3039_v28 = vmul.f32 %v5150_v57, %v2984_v26  ;;  %v2986_v31 = vmax.f32 %v2797_v48, %v2922_v44  ;;  %v2800_v61 = vpop.f32.mrb[168].mxu1 }
 0x438   :  { %v2801_v39 = vadd.f32 %v2800_v61, %v5132_v43  ;;  %3323 = vmatprep.mubr.bf16.mxu0 %v3102_v55  ;;  %v2802_v30 = vpop.f32.mrb[169].mxu1 }
 0x439   :  { %v3040_v54 = vmul.f32 %v5150_v57, %v2986_v31  ;;  %v2803_v38 = vadd.f32 %v2802_v30, %v5136_v35  ;;  %3324 = vmatmul.mubr.bf16.gmra.mrb[160].mxu0 %v3101_v63  ;;  %v2804_v52 = vpop.f32.mrb[170].mxu1  ;;  %v3071_v17 = vsub.f32 %v3039_v28, %v2983_v25 }
 0x43a   :  { %v2805_v47 = vadd.f32 %v2804_v52, %v5132_v43  ;;  %v2806_v42 = vpop.f32.mrb[171].mxu1  ;;  %v2923_v9 = vmul.f32 0.2, %v2801_v39 }
 0x43b   :  { %v2924_v24 = vmul.f32 0.2, %v2803_v38  ;;  %v2807_v22 = vadd.f32 %v2806_v42, %v5136_v35  ;;  %v3072_v3 = vsub.f32 %v3040_v54, %v2985_v21 }
 0x43c   :  { %v2925_v1 = vmul.f32 0.2, %v2805_v47  ;;  %v3975_v59 = vpop.f32.mrb[124].mxu0  ;;  %v2987_v12 = vmax.f32 %v2801_v39, %v2923_v9 }
 0x43d   :  { %v2988_v50 = vmax.f32 %v2803_v38, %v2924_v24  ;;  %v2926_v2 = vmul.f32 0.2, %v2807_v22  ;;  %v2368_v51 = vadd.f32 %v3975_v59, %v5144_v27  ;;  %v2359_v32 = vpop.f32.mrb[125].mxu0  ;;  %v3104_v62 = vpack.c.bf16 %v3072_v3, %v3071_v17 }
 0x43e   :  { %v2360_v10 = vadd.f32 %v5144_v27, %v2359_v32  ;;  %v3976_v49 = vpop.f32.mrb[126].mxu0  ;;  %v2989_v14 = vmax.f32 %v2805_v47, %v2925_v1 }
 0x43f   :  { %v3041_v19 = vmul.f32 %v5150_v57, %v2988_v50  ;;  %v2990_v46 = vmax.f32 %v2807_v22, %v2926_v2  ;;  %v2452_v29 = vmul.f32 0.2, %v2368_v51  ;;  %v2371_v45 = vadd.f32 %v3976_v49, %v5144_v27  ;;  %v2362_v6 = vpop.f32.mrb[127].mxu0  ;;  %v2810_v8 = vpop.f32.mrb[172].mxu1  ;;  %3331 = vmatprep.mubr.bf16.mxu0 %v3104_v62 }
 0x440   :  { %v2450_v15 = vmul.f32 0.2, %v2360_v10  ;;  %v2363_v34 = vadd.f32 %v5144_v27, %v2362_v6  ;;  %v2811_v53 = vadd.f32 %v2810_v8, %v5132_v43  ;;  %v2812_v11 = vpop.f32.mrb[173].mxu1 }
 0x441   :  { %v3042_v5 = vmul.f32 %v5150_v57, %v2990_v46  ;;  %v2453_v7 = vmul.f32 0.2, %v2371_v45  ;;  %v2813_v40 = vadd.f32 %v2812_v11, %v5136_v35  ;;  %3332 = vmatmul.mubr.bf16.gmra.mrb[164].mxu0 %v3103_v33  ;;  %v2814_v0 = vpop.f32.mrb[174].mxu1  ;;  %v2484_v37 = vmax.f32 %v2368_v51, %v2452_v29 }
 0x442   :  { %v2451_v58 = vmul.f32 0.2, %v2363_v34  ;;  %v2927_v18 = vmul.f32 0.2, %v2811_v53  ;;  %v2815_v20 = vadd.f32 %v2814_v0, %v5132_v43  ;;  %v2816_v16 = vpop.f32.mrb[175].mxu1  ;;  %v3073_v56 = vsub.f32 %v3041_v19, %v2987_v12 }
 0x443   :  { %v2485_v60 = vmax.f32 %v2371_v45, %v2453_v7  ;;  %v2928_v13 = vmul.f32 0.2, %v2813_v40  ;;  %v2817_v48 = vadd.f32 %v2816_v16, %v5136_v35  ;;  %v2482_v41 = vmax.f32 %v2360_v10, %v2450_v15 }
 0x444   :  { %v2483_v4 = vmax.f32 %v2363_v34, %v2451_v58  ;;  %v3074_v23 = vsub.f32 %v3042_v5, %v2989_v14  ;;  %v2929_v36 = vmul.f32 0.2, %v2815_v20  ;;  %v2991_v25 = vmax.f32 %v2811_v53, %v2927_v18 }
 0x445   :  { %v2992_v26 = vmax.f32 %v2813_v40, %v2928_v13  ;;  %v2930_v44 = vmul.f32 0.2, %v2817_v48  ;;  %v3107_v55 = vpack.c.bf16 %v2485_v60, %v2484_v37 }
 0x446   :  { %v3106_v33 = vpack.c.bf16 %v3074_v23, %v3073_v56  ;;  %v3105_v63 = vpack.c.bf16 %v2483_v4, %v2482_v41  ;;  %v2993_v21 = vmax.f32 %v2815_v20, %v2929_v36 }
 0x447   :  { %v3043_v28 = vmul.f32 %v5150_v57, %v2992_v26  ;;  %v2994_v31 = vmax.f32 %v2817_v48, %v2930_v44  ;;  %v2820_v61 = vpop.f32.mrb[176].mxu1 }
 0x448   :  { %v2821_v39 = vadd.f32 %v2820_v61, %v5132_v43  ;;  %3339 = vmatprep.mubr.bf16.mxu0 %v3106_v33  ;;  %v2822_v30 = vpop.f32.mrb[177].mxu1 }
 0x449   :  { %v3044_v54 = vmul.f32 %v5150_v57, %v2994_v31  ;;  %v2823_v38 = vadd.f32 %v2822_v30, %v5136_v35  ;;  %3340 = vmatmul.mubr.bf16.gmra.mrb[168].mxu0 %v3105_v63  ;;  %v2824_v52 = vpop.f32.mrb[178].mxu1  ;;  %v3075_v17 = vsub.f32 %v3043_v28, %v2991_v25 }
 0x44a   :  { %v2825_v47 = vadd.f32 %v2824_v52, %v5132_v43  ;;  %v2826_v42 = vpop.f32.mrb[179].mxu1  ;;  %v2931_v9 = vmul.f32 0.2, %v2821_v39 }
 0x44b   :  { %v2932_v24 = vmul.f32 0.2, %v2823_v38  ;;  %v2827_v22 = vadd.f32 %v2826_v42, %v5136_v35  ;;  %v3076_v3 = vsub.f32 %v3044_v54, %v2993_v21 }
 0x44c   :  { %v2933_v1 = vmul.f32 0.2, %v2825_v47  ;;  %v3979_v59 = vpop.f32.mrb[128].mxu0  ;;  %v2995_v12 = vmax.f32 %v2821_v39, %v2931_v9 }
 0x44d   :  { %v2996_v50 = vmax.f32 %v2823_v38, %v2932_v24  ;;  %v2934_v2 = vmul.f32 0.2, %v2827_v22  ;;  %v2384_v51 = vadd.f32 %v3979_v59, %v5144_v27  ;;  %v2375_v32 = vpop.f32.mrb[129].mxu0  ;;  %v3108_v62 = vpack.c.bf16 %v3076_v3, %v3075_v17 }
 0x44e   :  { %v2376_v10 = vadd.f32 %v5144_v27, %v2375_v32  ;;  %v3980_v49 = vpop.f32.mrb[130].mxu0  ;;  %v2997_v14 = vmax.f32 %v2825_v47, %v2933_v1 }
 0x44f   :  { %v3045_v19 = vmul.f32 %v5150_v57, %v2996_v50  ;;  %v2998_v46 = vmax.f32 %v2827_v22, %v2934_v2  ;;  %v2456_v29 = vmul.f32 0.2, %v2384_v51  ;;  %v2387_v45 = vadd.f32 %v3980_v49, %v5144_v27  ;;  %v2378_v6 = vpop.f32.mrb[131].mxu0  ;;  %v2830_v8 = vpop.f32.mrb[180].mxu1  ;;  %3347 = vmatprep.mubr.bf16.mxu0 %v3108_v62 }
 0x450   :  { %v2454_v15 = vmul.f32 0.2, %v2376_v10  ;;  %v2379_v34 = vadd.f32 %v5144_v27, %v2378_v6  ;;  %v2831_v53 = vadd.f32 %v2830_v8, %v5132_v43  ;;  %v2832_v11 = vpop.f32.mrb[181].mxu1 }
 0x451   :  { %v3046_v5 = vmul.f32 %v5150_v57, %v2998_v46  ;;  %v2457_v7 = vmul.f32 0.2, %v2387_v45  ;;  %v2833_v40 = vadd.f32 %v2832_v11, %v5136_v35  ;;  %3348 = vmatmul.mubr.bf16.gmra.mrb[172].mxu0 %v3107_v55  ;;  %v2834_v0 = vpop.f32.mrb[182].mxu1  ;;  %v2488_v37 = vmax.f32 %v2384_v51, %v2456_v29 }
 0x452   :  { %v2455_v58 = vmul.f32 0.2, %v2379_v34  ;;  %v2935_v18 = vmul.f32 0.2, %v2831_v53  ;;  %v2835_v20 = vadd.f32 %v2834_v0, %v5132_v43  ;;  %v2836_v16 = vpop.f32.mrb[183].mxu1  ;;  %v3077_v56 = vsub.f32 %v3045_v19, %v2995_v12 }
 0x453   :  { %v2489_v60 = vmax.f32 %v2387_v45, %v2457_v7  ;;  %v2936_v13 = vmul.f32 0.2, %v2833_v40  ;;  %v2837_v48 = vadd.f32 %v2836_v16, %v5136_v35  ;;  %v2486_v41 = vmax.f32 %v2376_v10, %v2454_v15 }
 0x454   :  { %v2487_v4 = vmax.f32 %v2379_v34, %v2455_v58  ;;  %v3078_v23 = vsub.f32 %v3046_v5, %v2997_v14  ;;  %v2937_v36 = vmul.f32 0.2, %v2835_v20  ;;  %v2999_v25 = vmax.f32 %v2831_v53, %v2935_v18 }
 0x455   :  { %v3000_v26 = vmax.f32 %v2833_v40, %v2936_v13  ;;  %v2938_v44 = vmul.f32 0.2, %v2837_v48  ;;  %v3111_v33 = vpack.c.bf16 %v2489_v60, %v2488_v37 }
 0x456   :  { %v3110_v55 = vpack.c.bf16 %v3078_v23, %v3077_v56  ;;  %v3109_v63 = vpack.c.bf16 %v2487_v4, %v2486_v41  ;;  %v3001_v21 = vmax.f32 %v2835_v20, %v2937_v36 }
 0x457   :  { %v3047_v28 = vmul.f32 %v5150_v57, %v3000_v26  ;;  %v3002_v31 = vmax.f32 %v2837_v48, %v2938_v44  ;;  %v2840_v61 = vpop.f32.mrb[184].mxu1 }
 0x458   :  { %v2841_v39 = vadd.f32 %v2840_v61, %v5132_v43  ;;  %3355 = vmatprep.mubr.bf16.mxu0 %v3110_v55  ;;  %v2842_v30 = vpop.f32.mrb[185].mxu1 }
 0x459   :  { %v3048_v54 = vmul.f32 %v5150_v57, %v3002_v31  ;;  %v2843_v38 = vadd.f32 %v2842_v30, %v5136_v35  ;;  %3356 = vmatmul.mubr.bf16.gmra.mrb[176].mxu0 %v3109_v63  ;;  %v2844_v52 = vpop.f32.mrb[186].mxu1  ;;  %v3079_v17 = vsub.f32 %v3047_v28, %v2999_v25 }
 0x45a   :  { %v2845_v47 = vadd.f32 %v2844_v52, %v5132_v43  ;;  %v2846_v42 = vpop.f32.mrb[187].mxu1  ;;  %v2939_v9 = vmul.f32 0.2, %v2841_v39 }
 0x45b   :  { %v2940_v24 = vmul.f32 0.2, %v2843_v38  ;;  %v2847_v22 = vadd.f32 %v2846_v42, %v5136_v35  ;;  %v3080_v3 = vsub.f32 %v3048_v54, %v3001_v21 }
 0x45c   :  { %v2941_v1 = vmul.f32 0.2, %v2845_v47  ;;  %v3983_v59 = vpop.f32.mrb[132].mxu0  ;;  %v3003_v12 = vmax.f32 %v2841_v39, %v2939_v9 }
 0x45d   :  { %v3004_v50 = vmax.f32 %v2843_v38, %v2940_v24  ;;  %v2942_v2 = vmul.f32 0.2, %v2847_v22  ;;  %v2400_v51 = vadd.f32 %v3983_v59, %v5144_v27  ;;  %v2391_v32 = vpop.f32.mrb[133].mxu0  ;;  %v3112_v62 = vpack.c.bf16 %v3080_v3, %v3079_v17 }
 0x45e   :  { %v2392_v10 = vadd.f32 %v5144_v27, %v2391_v32  ;;  %v3984_v49 = vpop.f32.mrb[134].mxu0  ;;  %v3005_v14 = vmax.f32 %v2845_v47, %v2941_v1 }
 0x45f   :  { %v3049_v19 = vmul.f32 %v5150_v57, %v3004_v50  ;;  %v3006_v46 = vmax.f32 %v2847_v22, %v2942_v2  ;;  %v2460_v29 = vmul.f32 0.2, %v2400_v51  ;;  %v2403_v45 = vadd.f32 %v3984_v49, %v5144_v27  ;;  %v2394_v6 = vpop.f32.mrb[135].mxu0  ;;  %v2850_v8 = vpop.f32.mrb[188].mxu1  ;;  %3363 = vmatprep.mubr.bf16.mxu0 %v3112_v62 }
 0x460   :  { %v2458_v15 = vmul.f32 0.2, %v2392_v10  ;;  %v2395_v34 = vadd.f32 %v5144_v27, %v2394_v6  ;;  %v2851_v53 = vadd.f32 %v2850_v8, %v5132_v43  ;;  %v2852_v11 = vpop.f32.mrb[189].mxu1 }
 0x461   :  { %v3050_v5 = vmul.f32 %v5150_v57, %v3006_v46  ;;  %v2461_v7 = vmul.f32 0.2, %v2403_v45  ;;  %v2853_v40 = vadd.f32 %v2852_v11, %v5136_v35  ;;  %3364 = vmatmul.mubr.bf16.gmra.mrb[180].mxu0 %v3111_v33  ;;  %v2854_v0 = vpop.f32.mrb[190].mxu1  ;;  %v2492_v37 = vmax.f32 %v2400_v51, %v2460_v29 }
 0x462   :  { %v2459_v58 = vmul.f32 0.2, %v2395_v34  ;;  %v2943_v18 = vmul.f32 0.2, %v2851_v53  ;;  %v2855_v20 = vadd.f32 %v2854_v0, %v5132_v43  ;;  %v2856_v16 = vpop.f32.mrb[191].mxu1  ;;  %v3081_v56 = vsub.f32 %v3049_v19, %v3003_v12 }
 0x463   :  { %v2493_v60 = vmax.f32 %v2403_v45, %v2461_v7  ;;  %v2944_v13 = vmul.f32 0.2, %v2853_v40  ;;  %v2857_v48 = vadd.f32 %v2856_v16, %v5136_v35  ;;  %v2490_v41 = vmax.f32 %v2392_v10, %v2458_v15 }
 0x464   :  { %v2491_v4 = vmax.f32 %v2395_v34, %v2459_v58  ;;  %v3082_v23 = vsub.f32 %v3050_v5, %v3005_v14  ;;  %v2945_v36 = vmul.f32 0.2, %v2855_v20  ;;  %v3007_v25 = vmax.f32 %v2851_v53, %v2943_v18 }
 0x465   :  { %v3008_v26 = vmax.f32 %v2853_v40, %v2944_v13  ;;  %v2946_v44 = vmul.f32 0.2, %v2857_v48  ;;  %v3115_v55 = vpack.c.bf16 %v2493_v60, %v2492_v37 }
 0x466   :  { %v3114_v33 = vpack.c.bf16 %v3082_v23, %v3081_v56  ;;  %v3113_v63 = vpack.c.bf16 %v2491_v4, %v2490_v41  ;;  %v3009_v21 = vmax.f32 %v2855_v20, %v2945_v36 }
 0x467   :  { %v3051_v28 = vmul.f32 %v5150_v57, %v3008_v26  ;;  %v3010_v31 = vmax.f32 %v2857_v48, %v2946_v44  ;;  %v2860_v61 = vpop.f32.mrb[192].mxu1 }
 0x468   :  { %v2861_v39 = vadd.f32 %v2860_v61, %v5132_v43  ;;  %3371 = vmatprep.mubr.bf16.mxu0 %v3114_v33  ;;  %v2862_v30 = vpop.f32.mrb[193].mxu1 }
 0x469   :  { %v3052_v54 = vmul.f32 %v5150_v57, %v3010_v31  ;;  %v2863_v38 = vadd.f32 %v2862_v30, %v5136_v35  ;;  %3372 = vmatmul.mubr.bf16.gmra.mrb[184].mxu0 %v3113_v63  ;;  %v2864_v52 = vpop.f32.mrb[194].mxu1  ;;  %v3083_v17 = vsub.f32 %v3051_v28, %v3007_v25 }
 0x46a   :  { %v2865_v47 = vadd.f32 %v2864_v52, %v5132_v43  ;;  %v2866_v42 = vpop.f32.mrb[195].mxu1  ;;  %v2947_v9 = vmul.f32 0.2, %v2861_v39 }
 0x46b   :  { %v2948_v24 = vmul.f32 0.2, %v2863_v38  ;;  %v2867_v22 = vadd.f32 %v2866_v42, %v5136_v35  ;;  %v3084_v3 = vsub.f32 %v3052_v54, %v3009_v21 }
 0x46c   :  { %v2949_v1 = vmul.f32 0.2, %v2865_v47  ;;  %v3987_v59 = vpop.f32.mrb[136].mxu0  ;;  %v3011_v12 = vmax.f32 %v2861_v39, %v2947_v9 }
 0x46d   :  { %v3012_v50 = vmax.f32 %v2863_v38, %v2948_v24  ;;  %v2950_v2 = vmul.f32 0.2, %v2867_v22  ;;  %v2416_v51 = vadd.f32 %v3987_v59, %v5144_v27  ;;  %v2407_v32 = vpop.f32.mrb[137].mxu0  ;;  %v3116_v62 = vpack.c.bf16 %v3084_v3, %v3083_v17 }
 0x46e   :  { %v2408_v10 = vadd.f32 %v5144_v27, %v2407_v32  ;;  %v3988_v49 = vpop.f32.mrb[138].mxu0  ;;  %v3013_v14 = vmax.f32 %v2865_v47, %v2949_v1 }
 0x46f   :  { %v3053_v19 = vmul.f32 %v5150_v57, %v3012_v50  ;;  %v3014_v46 = vmax.f32 %v2867_v22, %v2950_v2  ;;  %v2464_v29 = vmul.f32 0.2, %v2416_v51  ;;  %v2419_v45 = vadd.f32 %v3988_v49, %v5144_v27  ;;  %v2410_v6 = vpop.f32.mrb[139].mxu0  ;;  %v2870_v8 = vpop.f32.mrb[196].mxu1  ;;  %3379 = vmatprep.mubr.bf16.mxu0 %v3116_v62 }
 0x470   :  { %v2462_v15 = vmul.f32 0.2, %v2408_v10  ;;  %v2411_v34 = vadd.f32 %v5144_v27, %v2410_v6  ;;  %v2871_v53 = vadd.f32 %v2870_v8, %v5132_v43  ;;  %v2872_v11 = vpop.f32.mrb[197].mxu1 }
 0x471   :  { %v3054_v5 = vmul.f32 %v5150_v57, %v3014_v46  ;;  %v2465_v7 = vmul.f32 0.2, %v2419_v45  ;;  %v2873_v40 = vadd.f32 %v2872_v11, %v5136_v35  ;;  %3380 = vmatmul.mubr.bf16.gmra.mrb[188].mxu0 %v3115_v55  ;;  %v2874_v0 = vpop.f32.mrb[198].mxu1  ;;  %v2496_v37 = vmax.f32 %v2416_v51, %v2464_v29 }
 0x472   :  { %v2463_v58 = vmul.f32 0.2, %v2411_v34  ;;  %v2951_v18 = vmul.f32 0.2, %v2871_v53  ;;  %v2875_v20 = vadd.f32 %v2874_v0, %v5132_v43  ;;  %v2876_v16 = vpop.f32.mrb[199].mxu1  ;;  %v3085_v56 = vsub.f32 %v3053_v19, %v3011_v12 }
 0x473   :  { %v2497_v60 = vmax.f32 %v2419_v45, %v2465_v7  ;;  %v2952_v13 = vmul.f32 0.2, %v2873_v40  ;;  %v2877_v48 = vadd.f32 %v2876_v16, %v5136_v35  ;;  %v2494_v41 = vmax.f32 %v2408_v10, %v2462_v15 }
 0x474   :  { %v2495_v4 = vmax.f32 %v2411_v34, %v2463_v58  ;;  %v3086_v23 = vsub.f32 %v3054_v5, %v3013_v14  ;;  %v2953_v36 = vmul.f32 0.2, %v2875_v20  ;;  %v3015_v25 = vmax.f32 %v2871_v53, %v2951_v18 }
 0x475   :  { %v3016_v26 = vmax.f32 %v2873_v40, %v2952_v13  ;;  %v2954_v44 = vmul.f32 0.2, %v2877_v48  ;;  %v3119_v33 = vpack.c.bf16 %v2497_v60, %v2496_v37 }
 0x476   :  { %v3118_v55 = vpack.c.bf16 %v3086_v23, %v3085_v56  ;;  %v3117_v63 = vpack.c.bf16 %v2495_v4, %v2494_v41  ;;  %v3017_v21 = vmax.f32 %v2875_v20, %v2953_v36 }
 0x477   :  { %v3055_v28 = vmul.f32 %v5150_v57, %v3016_v26  ;;  %v3018_v31 = vmax.f32 %v2877_v48, %v2954_v44  ;;  %v2880_v61 = vpop.f32.mrb[200].mxu1 }
 0x478   :  { %v2881_v39 = vadd.f32 %v2880_v61, %v5132_v43  ;;  %3387 = vmatprep.mubr.bf16.mxu0 %v3118_v55  ;;  %v2882_v30 = vpop.f32.mrb[201].mxu1 }
 0x479   :  { %v3056_v54 = vmul.f32 %v5150_v57, %v3018_v31  ;;  %v2883_v38 = vadd.f32 %v2882_v30, %v5136_v35  ;;  %3388 = vmatmul.mubr.bf16.gmra.mrb[192].mxu0 %v3117_v63  ;;  %v2884_v52 = vpop.f32.mrb[202].mxu1  ;;  %v3087_v17 = vsub.f32 %v3055_v28, %v3015_v25 }
 0x47a   :  { %v2885_v47 = vadd.f32 %v2884_v52, %v5132_v43  ;;  %v2886_v42 = vpop.f32.mrb[203].mxu1  ;;  %v2955_v9 = vmul.f32 0.2, %v2881_v39  ;;  %v3420_v52 = vld [vmem:[%s5540_s3] sm:$0xff] }
 0x47b   :  { %v2956_v24 = vmul.f32 0.2, %v2883_v38  ;;  %v2887_v22 = vadd.f32 %v2886_v42, %v5136_v35  ;;  %v3088_v3 = vsub.f32 %v3056_v54, %v3017_v21  ;;  %v5279_v21 = vstv %s3161_s26 }
 0x47c   :  { %v2957_v1 = vmul.f32 0.2, %v2885_v47  ;;  %v3991_v59 = vpop.f32.mrb[140].mxu0  ;;  %v3019_v12 = vmax.f32 %v2881_v39, %v2955_v9 }
 0x47d   :  { %v3020_v50 = vmax.f32 %v2883_v38, %v2956_v24  ;;  %v2958_v2 = vmul.f32 0.2, %v2887_v22  ;;  %v2432_v51 = vadd.f32 %v3991_v59, %v5144_v27  ;;  %v2423_v32 = vpop.f32.mrb[141].mxu0  ;;  %v3120_v62 = vpack.c.bf16 %v3088_v3, %v3087_v17  ;;  %v3421_v24 = vld [vmem:[%s5540_s3 + $0x8] sm:$0xff] }
 0x47e   :  { %v2424_v10 = vadd.f32 %v5144_v27, %v2423_v32  ;;  %v3992_v49 = vpop.f32.mrb[142].mxu0  ;;  %v3021_v14 = vmax.f32 %v2885_v47, %v2957_v1 }
 0x47f   :  { %v3057_v19 = vmul.f32 %v5150_v57, %v3020_v50  ;;  %v3022_v46 = vmax.f32 %v2887_v22, %v2958_v2  ;;  %v2468_v29 = vmul.f32 0.2, %v2432_v51  ;;  %v2435_v45 = vadd.f32 %v3992_v49, %v5144_v27  ;;  %v2426_v6 = vpop.f32.mrb[143].mxu0  ;;  %v2890_v8 = vpop.f32.mrb[204].mxu1  ;;  %3395 = vmatprep.mubr.bf16.mxu0 %v3120_v62  ;;  %v3423_v49 = vld [vmem:[%s5540_s3 + $0x18] sm:$0xff] }
 0x480   :  { %v2466_v15 = vmul.f32 0.2, %v2424_v10  ;;  %v2427_v34 = vadd.f32 %v5144_v27, %v2426_v6  ;;  %v2891_v53 = vadd.f32 %v2890_v8, %v5132_v43  ;;  %v2892_v11 = vpop.f32.mrb[205].mxu1 }
 0x481   :  { %v3058_v5 = vmul.f32 %v5150_v57, %v3022_v46  ;;  %v2469_v7 = vmul.f32 0.2, %v2435_v45  ;;  %v2893_v40 = vadd.f32 %v2892_v11, %v5136_v35  ;;  %3396 = vmatmul.mubr.bf16.gmra.mrb[196].mxu0 %v3119_v33  ;;  %v2894_v0 = vpop.f32.mrb[206].mxu1  ;;  %v2500_v37 = vmax.f32 %v2432_v51, %v2468_v29  ;;  %v3422_v51 = vld [vmem:[%s5540_s3 + $0x10] sm:$0xff] }
 0x482   :  { %v2467_v58 = vmul.f32 0.2, %v2427_v34  ;;  %v2959_v18 = vmul.f32 0.2, %v2891_v53  ;;  %v2895_v20 = vadd.f32 %v2894_v0, %v5132_v43  ;;  %v2896_v16 = vpop.f32.mrb[207].mxu1  ;;  %v3089_v48 = vsub.f32 %v3057_v19, %v3019_v12 }
 0x483   :  { %v2501_v60 = vmax.f32 %v2435_v45, %v2469_v7  ;;  %v2960_v13 = vmul.f32 0.2, %v2893_v40  ;;  %v2897_v27 = vadd.f32 %v2896_v16, %v5136_v35  ;;  %v2498_v56 = vmax.f32 %v2424_v10, %v2466_v15  ;;  %v3424_v15 = vld [vmem:[%s5540_s3 + $0x20] sm:$0xff] }
 0x484   :  { %v2499_v41 = vmax.f32 %v2427_v34, %v2467_v58  ;;  %v3090_v4 = vsub.f32 %v3058_v5, %v3021_v14  ;;  %v2961_v26 = vmul.f32 0.2, %v2895_v20  ;;  %v3023_v63 = vmax.f32 %v2891_v53, %v2959_v18  ;;  %v3425_v14 = vld [vmem:[%s5540_s3 + $0x28] sm:$0xff] }
 0x485   :  { %v3024_v23 = vmax.f32 %v2893_v40, %v2960_v13  ;;  %v2962_v36 = vmul.f32 0.2, %v2897_v27  ;;  %v3123_v44 = vpack.c.bf16 %v2501_v60, %v2500_v37 }
 0x486   :  { %v3122_v33 = vpack.c.bf16 %v3090_v4, %v3089_v48  ;;  %v3121_v55 = vpack.c.bf16 %v2499_v41, %v2498_v56  ;;  %v3025_v43 = vmax.f32 %v2895_v20, %v2961_v26  ;;  %v3426_v20 = vld [vmem:[%s5540_s3 + $0x30] sm:$0xff] }
 0x487   :  { %v3059_v25 = vmul.f32 %v5150_v57, %v3024_v23  ;;  %v3026_v28 = vmax.f32 %v2897_v27, %v2962_v36  ;;  %v3427_v27 = vld [vmem:[%s5540_s3 + $0x38] sm:$0xff] }
 0x488   :  { %3403 = vmatprep.mubr.bf16.mxu0 %v3122_v33 }
 0x489   :  { %v3060_v31 = vmul.f32 %v5150_v57, %v3026_v28  ;;  %3404 = vmatmul.mubr.bf16.gmra.mrb[200].mxu0 %v3121_v55  ;;  %v3091_v35 = vsub.f32 %v3059_v25, %v3023_v63  ;;  %v3429_v25 = vld [vmem:[%s5540_s3 + $0x48] sm:$0xff] }
 0x48b   :  { %v3092_v61 = vsub.f32 %v3060_v31, %v3025_v43 }
 0x48d   :  { %v3124_v39 = vpack.c.bf16 %v3092_v61, %v3091_v35 }
 0x48f   :  { %3411 = vmatprep.mubr.bf16.mxu0 %v3124_v39 }
 0x491   :  { %3412 = vmatmul.mubr.bf16.gmra.mrb[204].mxu0 %v3123_v44  ;;  %v3428_v44 = vld [vmem:[%s5540_s3 + $0x40] sm:$0xff] }
 0x4ec   :  { %v3753_v30 = vpop.f32.mrb[144].mxu0 }
 0x4ed   :  { %v3754_v54 = vpop.f32.mrb[145].mxu0 }
 0x4ee   :  { %v3755_v38 = vadd.f32 %v3754_v54, %v3753_v30  ;;  %v3756_v57 = vpop.f32.mrb[146].mxu0  ;;  %v3430_v54 = vld [vmem:[%s5540_s3 + $0x50] sm:$0xff] }
 0x4ef   :  { %v3757_v17 = vpop.f32.mrb[147].mxu0 }
 0x4f0   :  { %v3294_v47 = vadd.f32 %v3755_v38, %v5279_v21  ;;  %v3758_v42 = vadd.f32 %v3757_v17, %v3756_v57  ;;  %v3431_v17 = vld [vmem:[%s5540_s3 + $0x58] sm:$0xff] }
 0x4f2   :  { %v3452_v22 = vsub.f32 %v3294_v47, %v3420_v52  ;;  %v3297_v3 = vadd.f32 %v3758_v42, %v5279_v21 }
 0x4f4   :  { %3485 = vst.msk [vmem:[%s5552_s15] sm:$0xff] %vm3484_vm0, %v3452_v22  ;;  %v3453_v9 = vsub.f32 %v3297_v3, %v3421_v24  ;;  %v3759_v1 = vpop.f32.mrb[148].mxu0 }
 0x4f5   :  { %v3760_v59 = vpop.f32.mrb[149].mxu0 }
 0x4f6   :  { %3486 = vst.msk [vmem:[%s5552_s15 + $0x8] sm:$0xff] %vm3484_vm0, %v3453_v9  ;;  %v3761_v50 = vadd.f32 %v3760_v59, %v3759_v1  ;;  %v3762_v2 = vpop.f32.mrb[150].mxu0  ;;  %v3432_v59 = vld [vmem:[%s5540_s3 + $0x60] sm:$0xff] }
 0x4f7   :  { %v3763_v32 = vpop.f32.mrb[151].mxu0 }
 0x4f8   :  { %v3302_v62 = vadd.f32 %v3761_v50, %v5279_v21  ;;  %v3764_v10 = vadd.f32 %v3763_v32, %v3762_v2  ;;  %v3433_v32 = vld [vmem:[%s5540_s3 + $0x68] sm:$0xff] }
 0x4fa   :  { %v3454_v19 = vsub.f32 %v3302_v62, %v3422_v51  ;;  %v3305_v46 = vadd.f32 %v3764_v10, %v5279_v21 }
 0x4fc   :  { %3487 = vst.msk [vmem:[%s5552_s15 + $0x10] sm:$0xff] %vm3484_vm0, %v3454_v19  ;;  %v3455_v29 = vsub.f32 %v3305_v46, %v3423_v49  ;;  %v3765_v45 = vpop.f32.mrb[152].mxu0 }
 0x4fd   :  { %v3766_v6 = vpop.f32.mrb[153].mxu0 }
 0x4fe   :  { %3488 = vst.msk [vmem:[%s5552_s15 + $0x18] sm:$0xff] %vm3484_vm0, %v3455_v29  ;;  %v3767_v8 = vadd.f32 %v3766_v6, %v3765_v45  ;;  %v3768_v12 = vpop.f32.mrb[154].mxu0  ;;  %v3434_v6 = vld [vmem:[%s5540_s3 + $0x70] sm:$0xff] }
 0x4ff   :  { %v3769_v34 = vpop.f32.mrb[155].mxu0 }
 0x500   :  { %v3310_v53 = vadd.f32 %v3767_v8, %v5279_v21  ;;  %v3770_v11 = vadd.f32 %v3769_v34, %v3768_v12  ;;  %v3435_v34 = vld [vmem:[%s5540_s3 + $0x78] sm:$0xff] }
 0x502   :  { %v3456_v5 = vsub.f32 %v3310_v53, %v3424_v15  ;;  %v3313_v7 = vadd.f32 %v3770_v11, %v5279_v21 }
 0x504   :  { %3489 = vst.msk [vmem:[%s5552_s15 + $0x20] sm:$0xff] %vm3484_vm0, %v3456_v5  ;;  %v3457_v40 = vsub.f32 %v3313_v7, %v3425_v14  ;;  %v3771_v0 = vpop.f32.mrb[156].mxu0 }
 0x505   :  { %v3772_v37 = vpop.f32.mrb[157].mxu0 }
 0x506   :  { %3490 = vst.msk [vmem:[%s5552_s15 + $0x28] sm:$0xff] %vm3484_vm0, %v3457_v40  ;;  %v3773_v58 = vadd.f32 %v3772_v37, %v3771_v0  ;;  %v3774_v18 = vpop.f32.mrb[158].mxu0  ;;  %v3436_v37 = vld [vmem:[%s5540_s3 + $0x80] sm:$0xff] }
 0x507   :  { %v3775_v16 = vpop.f32.mrb[159].mxu0 }
 0x508   :  { %v3318_v60 = vadd.f32 %v3773_v58, %v5279_v21  ;;  %v3776_v13 = vadd.f32 %v3775_v16, %v3774_v18  ;;  %v3437_v16 = vld [vmem:[%s5540_s3 + $0x88] sm:$0xff] }
 0x50a   :  { %v3458_v48 = vsub.f32 %v3318_v60, %v3426_v20  ;;  %v3321_v56 = vadd.f32 %v3776_v13, %v5279_v21 }
 0x50c   :  { %3491 = vst.msk [vmem:[%s5552_s15 + $0x30] sm:$0xff] %vm3484_vm0, %v3458_v48  ;;  %v3459_v41 = vsub.f32 %v3321_v56, %v3427_v27  ;;  %v3777_v4 = vpop.f32.mrb[160].mxu0 }
 0x50d   :  { %v3778_v23 = vpop.f32.mrb[161].mxu0 }
 0x50e   :  { %3492 = vst.msk [vmem:[%s5552_s15 + $0x38] sm:$0xff] %vm3484_vm0, %v3459_v41  ;;  %v3779_v26 = vadd.f32 %v3778_v23, %v3777_v4  ;;  %v3780_v36 = vpop.f32.mrb[162].mxu0  ;;  %v3438_v23 = vld [vmem:[%s5540_s3 + $0x90] sm:$0xff] }
 0x50f   :  { %v3781_v33 = vpop.f32.mrb[163].mxu0 }
 0x510   :  { %v3326_v55 = vadd.f32 %v3779_v26, %v5279_v21  ;;  %v3782_v63 = vadd.f32 %v3781_v33, %v3780_v36  ;;  %v3439_v33 = vld [vmem:[%s5540_s3 + $0x98] sm:$0xff] }
 0x512   :  { %v3460_v28 = vsub.f32 %v3326_v55, %v3428_v44  ;;  %v3329_v43 = vadd.f32 %v3782_v63, %v5279_v21 }
 0x514   :  { %3493 = vst.msk [vmem:[%s5552_s15 + $0x40] sm:$0xff] %vm3484_vm0, %v3460_v28  ;;  %v3461_v31 = vsub.f32 %v3329_v43, %v3429_v25  ;;  %v3783_v35 = vpop.f32.mrb[164].mxu0 }
 0x515   :  { %v3784_v61 = vpop.f32.mrb[165].mxu0 }
 0x516   :  { %3494 = vst.msk [vmem:[%s5552_s15 + $0x48] sm:$0xff] %vm3484_vm0, %v3461_v31  ;;  %v3785_v39 = vadd.f32 %v3784_v61, %v3783_v35  ;;  %v3786_v30 = vpop.f32.mrb[166].mxu0  ;;  %v3440_v61 = vld [vmem:[%s5540_s3 + $0xa0] sm:$0xff] }
 0x517   :  { %v3787_v38 = vpop.f32.mrb[167].mxu0 }
 0x518   :  { %v3334_v57 = vadd.f32 %v3785_v39, %v5279_v21  ;;  %v3788_v52 = vadd.f32 %v3787_v38, %v3786_v30  ;;  %v3441_v38 = vld [vmem:[%s5540_s3 + $0xa8] sm:$0xff] }
 0x51a   :  { %v3462_v47 = vsub.f32 %v3334_v57, %v3430_v54  ;;  %v3337_v42 = vadd.f32 %v3788_v52, %v5279_v21 }
 0x51c   :  { %3495 = vst.msk [vmem:[%s5552_s15 + $0x50] sm:$0xff] %vm3484_vm0, %v3462_v47  ;;  %v3463_v24 = vsub.f32 %v3337_v42, %v3431_v17  ;;  %v3789_v22 = vpop.f32.mrb[168].mxu0 }
 0x51d   :  { %v3790_v3 = vpop.f32.mrb[169].mxu0 }
 0x51e   :  { %3496 = vst.msk [vmem:[%s5552_s15 + $0x58] sm:$0xff] %vm3484_vm0, %v3463_v24  ;;  %v3791_v9 = vadd.f32 %v3790_v3, %v3789_v22  ;;  %v3792_v1 = vpop.f32.mrb[170].mxu0  ;;  %v3442_v3 = vld [vmem:[%s5540_s3 + $0xb0] sm:$0xff] }
 0x51f   :  { %v3793_v50 = vpop.f32.mrb[171].mxu0 }
 0x520   :  { %v3342_v2 = vadd.f32 %v3791_v9, %v5279_v21  ;;  %v3794_v51 = vadd.f32 %v3793_v50, %v3792_v1  ;;  %v3443_v50 = vld [vmem:[%s5540_s3 + $0xb8] sm:$0xff] }
 0x522   :  { %v3464_v62 = vsub.f32 %v3342_v2, %v3432_v59  ;;  %v3345_v10 = vadd.f32 %v3794_v51, %v5279_v21 }
 0x524   :  { %3497 = vst.msk [vmem:[%s5552_s15 + $0x60] sm:$0xff] %vm3484_vm0, %v3464_v62  ;;  %v3465_v49 = vsub.f32 %v3345_v10, %v3433_v32  ;;  %v3795_v19 = vpop.f32.mrb[172].mxu0 }
 0x525   :  { %v3796_v46 = vpop.f32.mrb[173].mxu0 }
 0x526   :  { %3498 = vst.msk [vmem:[%s5552_s15 + $0x68] sm:$0xff] %vm3484_vm0, %v3465_v49  ;;  %v3797_v29 = vadd.f32 %v3796_v46, %v3795_v19  ;;  %v3798_v45 = vpop.f32.mrb[174].mxu0  ;;  %v3444_v46 = vld [vmem:[%s5540_s3 + $0xc0] sm:$0xff] }
 0x527   :  { %v3799_v8 = vpop.f32.mrb[175].mxu0 }
 0x528   :  { %v3350_v12 = vadd.f32 %v3797_v29, %v5279_v21  ;;  %v3800_v15 = vadd.f32 %v3799_v8, %v3798_v45  ;;  %v3445_v8 = vld [vmem:[%s5540_s3 + $0xc8] sm:$0xff] }
 0x52a   :  { %v3466_v53 = vsub.f32 %v3350_v12, %v3434_v6  ;;  %v3353_v11 = vadd.f32 %v3800_v15, %v5279_v21 }
 0x52c   :  { %3499 = vst.msk [vmem:[%s5552_s15 + $0x70] sm:$0xff] %vm3484_vm0, %v3466_v53  ;;  %v3467_v14 = vsub.f32 %v3353_v11, %v3435_v34  ;;  %v3801_v5 = vpop.f32.mrb[176].mxu0 }
 0x52d   :  { %v3802_v7 = vpop.f32.mrb[177].mxu0 }
 0x52e   :  { %3500 = vst.msk [vmem:[%s5552_s15 + $0x78] sm:$0xff] %vm3484_vm0, %v3467_v14  ;;  %v3803_v40 = vadd.f32 %v3802_v7, %v3801_v5  ;;  %v3804_v0 = vpop.f32.mrb[178].mxu0  ;;  %v3446_v7 = vld [vmem:[%s5540_s3 + $0xd0] sm:$0xff] }
 0x52f   :  { %v3805_v58 = vpop.f32.mrb[179].mxu0 }
 0x530   :  { %v3358_v18 = vadd.f32 %v3803_v40, %v5279_v21  ;;  %v3806_v20 = vadd.f32 %v3805_v58, %v3804_v0  ;;  %v3447_v58 = vld [vmem:[%s5540_s3 + $0xd8] sm:$0xff] }
 0x532   :  { %v3468_v60 = vsub.f32 %v3358_v18, %v3436_v37  ;;  %v3361_v13 = vadd.f32 %v3806_v20, %v5279_v21 }
 0x534   :  { %3501 = vst.msk [vmem:[%s5552_s15 + $0x80] sm:$0xff] %vm3484_vm0, %v3468_v60  ;;  %v3469_v27 = vsub.f32 %v3361_v13, %v3437_v16  ;;  %v3807_v48 = vpop.f32.mrb[180].mxu0 }
 0x535   :  { %v3808_v56 = vpop.f32.mrb[181].mxu0 }
 0x536   :  { %3502 = vst.msk [vmem:[%s5552_s15 + $0x88] sm:$0xff] %vm3484_vm0, %v3469_v27  ;;  %v3809_v41 = vadd.f32 %v3808_v56, %v3807_v48  ;;  %v3810_v4 = vpop.f32.mrb[182].mxu0  ;;  %v3448_v56 = vld [vmem:[%s5540_s3 + $0xe0] sm:$0xff] }
 0x537   :  { %v3811_v26 = vpop.f32.mrb[183].mxu0 }
 0x538   :  { %v3366_v36 = vadd.f32 %v3809_v41, %v5279_v21  ;;  %v3812_v44 = vadd.f32 %v3811_v26, %v3810_v4  ;;  %v3449_v26 = vld [vmem:[%s5540_s3 + $0xe8] sm:$0xff] }
 0x53a   :  { %v3470_v55 = vsub.f32 %v3366_v36, %v3438_v23  ;;  %v3369_v63 = vadd.f32 %v3812_v44, %v5279_v21 }
 0x53c   :  { %3503 = vst.msk [vmem:[%s5552_s15 + $0x90] sm:$0xff] %vm3484_vm0, %v3470_v55  ;;  %v3471_v25 = vsub.f32 %v3369_v63, %v3439_v33  ;;  %v3813_v28 = vpop.f32.mrb[184].mxu0 }
 0x53d   :  { %v3814_v43 = vpop.f32.mrb[185].mxu0 }
 0x53e   :  { %3504 = vst.msk [vmem:[%s5552_s15 + $0x98] sm:$0xff] %vm3484_vm0, %v3471_v25  ;;  %v3815_v31 = vadd.f32 %v3814_v43, %v3813_v28  ;;  %v3816_v35 = vpop.f32.mrb[186].mxu0  ;;  %v3450_v43 = vld [vmem:[%s5540_s3 + $0xf0] sm:$0xff] }
 0x53f   :  { %v3817_v39 = vpop.f32.mrb[187].mxu0 }
 0x540   :  { %v3374_v30 = vadd.f32 %v3815_v31, %v5279_v21  ;;  %v3818_v54 = vadd.f32 %v3817_v39, %v3816_v35  ;;  %v3451_v39 = vld [vmem:[%s5540_s3 + $0xf8] sm:$0xff] }
 0x542   :  { %v3472_v57 = vsub.f32 %v3374_v30, %v3440_v61  ;;  %v3377_v52 = vadd.f32 %v3818_v54, %v5279_v21 }
 0x544   :  { %3505 = vst.msk [vmem:[%s5552_s15 + $0xa0] sm:$0xff] %vm3484_vm0, %v3472_v57  ;;  %v3473_v17 = vsub.f32 %v3377_v52, %v3441_v38  ;;  %v3819_v47 = vpop.f32.mrb[188].mxu0 }
 0x545   :  { %v3820_v42 = vpop.f32.mrb[189].mxu0 }
 0x546   :  { %3506 = vst.msk [vmem:[%s5552_s15 + $0xa8] sm:$0xff] %vm3484_vm0, %v3473_v17  ;;  %v3821_v24 = vadd.f32 %v3820_v42, %v3819_v47  ;;  %v3822_v22 = vpop.f32.mrb[190].mxu0 }
 0x547   :  { %v3823_v9 = vpop.f32.mrb[191].mxu0 }
 0x548   :  { %v3382_v1 = vadd.f32 %v3821_v24, %v5279_v21  ;;  %v3824_v59 = vadd.f32 %v3823_v9, %v3822_v22 }
 0x54a   :  { %v3474_v2 = vsub.f32 %v3382_v1, %v3442_v3  ;;  %v3385_v51 = vadd.f32 %v3824_v59, %v5279_v21 }
 0x54c   :  { %3507 = vst.msk [vmem:[%s5552_s15 + $0xb0] sm:$0xff] %vm3484_vm0, %v3474_v2  ;;  %v3475_v32 = vsub.f32 %v3385_v51, %v3443_v50  ;;  %v3825_v62 = vpop.f32.mrb[192].mxu0 }
 0x54d   :  { %v3826_v10 = vpop.f32.mrb[193].mxu0 }
 0x54e   :  { %3508 = vst.msk [vmem:[%s5552_s15 + $0xb8] sm:$0xff] %vm3484_vm0, %v3475_v32  ;;  %v3827_v49 = vadd.f32 %v3826_v10, %v3825_v62  ;;  %v3828_v19 = vpop.f32.mrb[194].mxu0 }
 0x54f   :  { %v3829_v29 = vpop.f32.mrb[195].mxu0 }
 0x550   :  { %v3390_v45 = vadd.f32 %v3827_v49, %v5279_v21  ;;  %v3830_v6 = vadd.f32 %v3829_v29, %v3828_v19 }
 0x552   :  { %v3476_v12 = vsub.f32 %v3390_v45, %v3444_v46  ;;  %v3393_v15 = vadd.f32 %v3830_v6, %v5279_v21 }
 0x554   :  { %3509 = vst.msk [vmem:[%s5552_s15 + $0xc0] sm:$0xff] %vm3484_vm0, %v3476_v12  ;;  %v3477_v34 = vsub.f32 %v3393_v15, %v3445_v8  ;;  %v3831_v53 = vpop.f32.mrb[196].mxu0 }
 0x555   :  { %v3832_v11 = vpop.f32.mrb[197].mxu0 }
 0x556   :  { %3510 = vst.msk [vmem:[%s5552_s15 + $0xc8] sm:$0xff] %vm3484_vm0, %v3477_v34  ;;  %v3833_v14 = vadd.f32 %v3832_v11, %v3831_v53  ;;  %v3834_v5 = vpop.f32.mrb[198].mxu0 }
 0x557   :  { %v3835_v40 = vpop.f32.mrb[199].mxu0 }
 0x558   :  { %v3398_v0 = vadd.f32 %v3833_v14, %v5279_v21  ;;  %v3836_v37 = vadd.f32 %v3835_v40, %v3834_v5 }
 0x55a   :  { %v3478_v18 = vsub.f32 %v3398_v0, %v3446_v7  ;;  %v3401_v20 = vadd.f32 %v3836_v37, %v5279_v21 }
 0x55c   :  { %3511 = vst.msk [vmem:[%s5552_s15 + $0xd0] sm:$0xff] %vm3484_vm0, %v3478_v18  ;;  %v3479_v16 = vsub.f32 %v3401_v20, %v3447_v58  ;;  %v3837_v60 = vpop.f32.mrb[200].mxu0 }
 0x55d   :  { %v3838_v13 = vpop.f32.mrb[201].mxu0 }
 0x55e   :  { %3512 = vst.msk [vmem:[%s5552_s15 + $0xd8] sm:$0xff] %vm3484_vm0, %v3479_v16  ;;  %v3839_v27 = vadd.f32 %v3838_v13, %v3837_v60  ;;  %v3840_v48 = vpop.f32.mrb[202].mxu0 }
 0x55f   :  { %v3841_v41 = vpop.f32.mrb[203].mxu0 }
 0x560   :  { %v3406_v4 = vadd.f32 %v3839_v27, %v5279_v21  ;;  %v3842_v23 = vadd.f32 %v3841_v41, %v3840_v48 }
 0x562   :  { %v3480_v36 = vsub.f32 %v3406_v4, %v3448_v56  ;;  %v3409_v44 = vadd.f32 %v3842_v23, %v5279_v21 }
 0x564   :  { %3513 = vst.msk [vmem:[%s5552_s15 + $0xe0] sm:$0xff] %vm3484_vm0, %v3480_v36  ;;  %v3481_v33 = vsub.f32 %v3409_v44, %v3449_v26  ;;  %v3843_v55 = vpop.f32.mrb[204].mxu0 }
 0x565   :  { %v3844_v63 = vpop.f32.mrb[205].mxu0 }
 0x566   :  { %3514 = vst.msk [vmem:[%s5552_s15 + $0xe8] sm:$0xff] %vm3484_vm0, %v3481_v33  ;;  %v3845_v25 = vadd.f32 %v3844_v63, %v3843_v55  ;;  %v3846_v28 = vpop.f32.mrb[206].mxu0 }
 0x567   :  { %v3847_v31 = vpop.f32.mrb[207].mxu0 }
 0x568   :  { %v3414_v35 = vadd.f32 %v3845_v25, %v5279_v21  ;;  %v3848_v61 = vadd.f32 %v3847_v31, %v3846_v28 }
 0x56a   :  { %v3482_v30 = vsub.f32 %v3414_v35, %v3450_v43  ;;  %v3417_v54 = vadd.f32 %v3848_v61, %v5279_v21 }
 0x56c   :  { %3515 = vst.msk [vmem:[%s5552_s15 + $0xf0] sm:$0xff] %vm3484_vm0, %v3482_v30  ;;  %v3483_v38 = vsub.f32 %v3417_v54, %v3451_v39 }
 0x56e   :  { %3516 = vst.msk [vmem:[%s5552_s15 + $0xf8] sm:$0xff] %vm3484_vm0, %v3483_v38 }
 0x56f   :  { %3521 = vsyncpa [#allocation4], 1 }
 0x570   :  { %3522 = vsyncpa [#allocation8], 1 }
 0x571   :  { %3523 = vsyncpa [#allocation5], 1 }

</bundles_post_ra>
